<compile_context>
chip_gen: v7x
topology: tpu7x:2x2x1
jax: 0.10.0
libtpu: 0.0.40
codegen_flags: <defaults>
</compile_context>

<pallas_src>
import functools
import numpy as np
import jax
import jax.numpy as jnp
from jax.experimental import pallas as pl
from jax.experimental.pallas import tpu as pltpu


def _round_up(x, m):
    return (x + m - 1) // m * m


# ----------------------------------------------------------------------------
# Fused linear kernel: y = act(x @ w + b), tiled over rows (used by the convs).
# ----------------------------------------------------------------------------
def _linear_kernel(x_ref, w_ref, b_ref, o_ref, *, act):
    y = jnp.dot(x_ref[...], w_ref[...], preferred_element_type=jnp.float32)
    y = y + b_ref[...]
    if act == "relu":
        y = jnp.maximum(y, 0.0)
    o_ref[...] = y.astype(o_ref.dtype)


def linear_act(x, w, b, act="none", out_dtype=jnp.float32):
    """y = act(x @ w + b).  x [M,K], w [K,N], b [N]."""
    M, K = x.shape
    N = w.shape[1]
    b2 = b.reshape(1, N).astype(jnp.float32)

    def _tile_bytes(tm):  # rough double-buffered pipeline footprint
        return (2 * (tm * K * x.dtype.itemsize
                     + tm * N * jnp.dtype(out_dtype).itemsize)
                + 2 * (K * N * w.dtype.itemsize + N * 4))

    if _tile_bytes(_round_up(M, 8)) <= 12 * 1024 * 1024:
        # Whole problem fits VMEM comfortably: no M padding at all.  Split
        # into two row tiles when large enough so v7x's second TensorCore
        # gets work on the 'parallel' grid axis.
        tm = M // 2 if (M >= 512 and M % 16 == 0) else M
        Mp = M
        xp = x
    else:
        tm = 256
        Mp = _round_up(M, tm)
        xp = jnp.pad(x, ((0, Mp - M), (0, 0))) if Mp != M else x

    out = pl.pallas_call(
        functools.partial(_linear_kernel, act=act),
        grid=(Mp // tm,),
        in_specs=[
            pl.BlockSpec((tm, K), lambda i: (i, 0)),
            pl.BlockSpec((K, N), lambda i: (0, 0)),
            pl.BlockSpec((1, N), lambda i: (0, 0)),
        ],
        out_specs=pl.BlockSpec((tm, N), lambda i: (i, 0)),
        out_shape=jax.ShapeDtypeStruct((Mp, N), out_dtype),
        compiler_params=pltpu.CompilerParams(
            dimension_semantics=("parallel",),
            vmem_limit_bytes=32 * 1024 * 1024),
    )(xp, w, b2)
    return out[:M] if Mp != M else out


# ----------------------------------------------------------------------------
# Conv2d (valid padding, stride) = NHWC im2col (glue) + fused Pallas matmul.
# ----------------------------------------------------------------------------
def im2col_nhwc(x, kh, kw, stride):
    """x [N,H,W,C] -> patches [N*OH*OW, kh*kw*C], feature order (kh, kw, C)."""
    N, H, W, C = x.shape
    OH = (H - kh) // stride + 1
    OW = (W - kw) // stride + 1
    cols = []
    for i in range(kh):
        for j in range(kw):
            cols.append(x[:, i:i + stride * OH:stride,
                          j:j + stride * OW:stride, :])
    col = jnp.concatenate(cols, axis=-1)              # [N, OH, OW, kh*kw*C]
    return col.reshape(N * OH * OW, kh * kw * C), OH, OW


def conv2d_relu_nhwc(x, wmat, b, kh, kw, stride):
    """x [N,H,W,C] bf16, wmat [kh*kw*C, OC] bf16 -> ReLU(conv)+b, NHWC bf16."""
    N = x.shape[0]
    OC = wmat.shape[1]
    col, OH, OW = im2col_nhwc(x, kh, kw, stride)
    y = linear_act(col, wmat, b, act="relu", out_dtype=jnp.bfloat16)
    return y.reshape(N, OH, OW, OC)


# ----------------------------------------------------------------------------
# Fused single-step GRU + policy head + value head (one pallas_call).
# ----------------------------------------------------------------------------
def _gru_heads_kernel(x_ref, h_ref, wih_ref, whh_ref, bih_ref, bhh_ref,
                      w1_ref, b1_ref, w2_ref, b2_ref,
                      h_out_ref, head_out_ref, *, hidden):
    H = hidden
    x = x_ref[...]                                    # bf16 [B, F]
    h = h_ref[...]                                    # f32  [B, H]
    # --- single-timestep GRU (PyTorch gate order r, z, n) ---
    gi = jnp.dot(x, wih_ref[...],
                 preferred_element_type=jnp.float32) + bih_ref[...]
    gh = jnp.dot(h.astype(jnp.bfloat16), whh_ref[...],
                 preferred_element_type=jnp.float32) + bhh_ref[...]
    r = jax.nn.sigmoid(gi[:, :H] + gh[:, :H])
    z = jax.nn.sigmoid(gi[:, H:2 * H] + gh[:, H:2 * H])
    n = jnp.tanh(gi[:, 2 * H:] + r * gh[:, 2 * H:])
    h_new = (1.0 - z) * n + z * h
    h_out_ref[...] = h_new
    # --- policy & value hidden layers as one lane-dense (256-wide) matmul ---
    hid = jnp.dot(h_new.astype(jnp.bfloat16), w1_ref[...],
                  preferred_element_type=jnp.float32) + b1_ref[...]
    hid = jnp.maximum(hid, 0.0)
    # --- logits & value via zero-padded block-diagonal second stage ---
    head = jnp.dot(hid.astype(jnp.bfloat16), w2_ref[...],
                   preferred_element_type=jnp.float32) + b2_ref[...]
    head_out_ref[...] = head


def gru_policy_value(x, h, p):
    """x [B,F] bf16, h [B,H] f32 -> (new hidden [B,H], head [B,128])."""
    B, F = x.shape
    H = h.shape[1]
    NH2 = p["w1"].shape[1]
    P = p["w2"].shape[1]
    return pl.pallas_call(
        functools.partial(_gru_heads_kernel, hidden=H),
        grid=(1,),
        in_specs=[
            pl.BlockSpec((B, F), lambda i: (0, 0)),
            pl.BlockSpec((B, H), lambda i: (0, 0)),
            pl.BlockSpec((F, 3 * H), lambda i: (0, 0)),
            pl.BlockSpec((H, 3 * H), lambda i: (0, 0)),
            pl.BlockSpec((1, 3 * H), lambda i: (0, 0)),
            pl.BlockSpec((1, 3 * H), lambda i: (0, 0)),
            pl.BlockSpec((H, NH2), lambda i: (0, 0)),
            pl.BlockSpec((1, NH2), lambda i: (0, 0)),
            pl.BlockSpec((NH2, P), lambda i: (0, 0)),
            pl.BlockSpec((1, P), lambda i: (0, 0)),
        ],
        out_specs=[
            pl.BlockSpec((B, H), lambda i: (0, 0)),
            pl.BlockSpec((B, P), lambda i: (0, 0)),
        ],
        out_shape=(jax.ShapeDtypeStruct((B, H), jnp.float32),
                   jax.ShapeDtypeStruct((B, P), jnp.float32)),
        compiler_params=pltpu.CompilerParams(
            dimension_semantics=("arbitrary",),
            vmem_limit_bytes=32 * 1024 * 1024),
    )(x, h, p["gru_w_ih"], p["gru_w_hh"], p["gru_b_ih"], p["gru_b_hh"],
      p["w1"], p["b1"], p["w2"], p["b2"])


# ----------------------------------------------------------------------------
# Deterministic parameter init (orthogonal, matching the module's init scheme),
# laid out directly in the kernels' matmul formats.
# ----------------------------------------------------------------------------
def orthogonal(rng, shape, gain=1.0):
    rows = shape[0]
    cols = int(np.prod(shape[1:]))
    a = rng.standard_normal((max(rows, cols), min(rows, cols)))
    q, r = np.linalg.qr(a)
    q = q * np.sign(np.diag(r))
    if rows < cols:
        q = q.T
    return (gain * q[:rows, :cols]).reshape(shape).astype(np.float32)


def init_params(input_shape=(4, 84, 84), num_actions=6, num_hidden=128,
                recurrent=256, seed=42):
    rng = np.random.default_rng(seed)
    relu_gain = float(np.sqrt(2.0))
    # smaller=True conv stack from the module
    conv_cfg = [(input_shape[0], 32, 8, 4), (32, 64, 4, 2),
                (64, 64, 4, 2), (64, 64, 3, 1)]
    convs = []
    sp = input_shape[1]
    for li, (cin, cout, k, s) in enumerate(conv_cfg):
        w = orthogonal(rng, (cout, cin, k, k), gain=relu_gain)   # OIHW
        if li == 0:
            w = w / 255.0        # fold the x/255 input normalization into conv1
        # (kh, kw, C, OC) flatten -> matches the NHWC im2col feature order.
        wmat = w.transpose(2, 3, 1, 0).reshape(k * k * cin, cout)
        convs.append((jnp.asarray(wmat, jnp.bfloat16),
                      jnp.zeros((cout,), jnp.float32), k, k, s))
        sp = (sp - k) // s + 1
    num_fc = conv_cfg[-1][1] * sp * sp

    H = recurrent
    A = num_actions
    p = {"convs": convs, "num_actions": A}
    p["gru_w_ih"] = jnp.asarray(orthogonal(rng, (3 * H, num_fc)).T, jnp.bfloat16)
    p["gru_w_hh"] = jnp.asarray(orthogonal(rng, (3 * H, H)).T, jnp.bfloat16)
    p["gru_b_ih"] = jnp.zeros((1, 3 * H), jnp.float32)
    p["gru_b_hh"] = jnp.zeros((1, 3 * H), jnp.float32)

    pw1 = orthogonal(rng, (num_hidden, H)).T         # [H, num_hidden]
    vw1 = orthogonal(rng, (num_hidden, H)).T         # [H, num_hidden]
    p["w1"] = jnp.asarray(np.concatenate([pw1, vw1], axis=1), jnp.bfloat16)
    p["b1"] = jnp.zeros((1, 2 * num_hidden), jnp.float32)

    pw2 = orthogonal(rng, (A, num_hidden)).T         # [num_hidden, A]
    vw2 = orthogonal(rng, (1, num_hidden)).T         # [num_hidden, 1]
    P = 128                                          # lane-dense padded head
    w2 = np.zeros((2 * num_hidden, P), np.float32)
    w2[:num_hidden, :A] = pw2
    w2[num_hidden:, A:A + 1] = vw2
    p["w2"] = jnp.asarray(w2, jnp.bfloat16)
    p["b2"] = jnp.zeros((1, P), jnp.float32)
    return p


# ----------------------------------------------------------------------------
# Forward pass (matches VisualAgentPPO.forward semantics).
# ----------------------------------------------------------------------------
def visual_agent_ppo_forward(params, x, hxs):
    B = x.shape[0]
    # One NCHW -> NHWC transpose; /255 is folded into the conv1 weights.
    h = x.astype(jnp.bfloat16).transpose(0, 2, 3, 1)
    for wmat, b, kh, kw, s in params["convs"]:
        h = conv2d_relu_nhwc(h, wmat, b, kh, kw, s)
    # NCHW-order flatten of the tiny final feature map (== torch .view order).
    latent_pre = h.transpose(0, 3, 1, 2).reshape(B, -1)
    h_new, head = gru_policy_value(latent_pre, hxs, params)
    A = params["num_actions"]
    logits = head[:, :A]
    value = head[:, A:A + 1]
    return logits, value, h_new      # seq_len == 1: GRU output == new state


if __name__ == "__main__":
    B = 2
    input_shape = (4, 84, 84)        # (C, H, W), minimum-size Atari-style input
    num_actions = 6
    recurrent = 256

    key = jax.random.PRNGKey(0)
    kx, kh = jax.random.split(key)
    x = jax.random.uniform(kx, (B,) + input_shape, jnp.float32, 0.0, 255.0)
    hxs = jax.random.normal(kh, (B, recurrent), jnp.float32)

    params = init_params(input_shape=input_shape, num_actions=num_actions,
                         num_hidden=128, recurrent=recurrent)

    fwd = jax.jit(lambda xx, hh: visual_agent_ppo_forward(params, xx, hh))
    logits, value, rnn_hxs = fwd(x, hxs)
    jax.block_until_ready((logits, value, rnn_hxs))

    assert logits.shape == (B, num_actions)
    assert value.shape == (B, 1)
    assert rnn_hxs.shape == (B, recurrent)
    assert bool(jnp.all(jnp.isfinite(logits))) and bool(jnp.all(jnp.isfinite(value)))
    print("KERNEL_OK")
</pallas_src>

<mosaic_0001>
module attributes {stable_mosaic.version = 11 : i64} {
  func.func @_linear_kernel(%arg0: i32, %arg1: memref<400x256xbf16, #tpu.memory_space<vmem>>, %arg2: memref<256x32xbf16, #tpu.memory_space<vmem>>, %arg3: memref<1x32xf32, #tpu.memory_space<vmem>>, %arg4: memref<400x32xbf16, #tpu.memory_space<vmem>>) attributes {dimension_semantics = [#tpu.dimension_semantics<parallel>], iteration_bounds = array<i64: 2>, scalar_prefetch = 0 : i64, scratch_operands = 0 : i64, tpu.core_type = #tpu.core_type<tc>, window_params = [{transform_indices = @transform_0, window_bounds = array<i64: 400, 256>}, {pipeline_mode = #tpu.pipeline_mode<synchronous>, transform_indices = @transform_1, window_bounds = array<i64: 256, 32>}, {pipeline_mode = #tpu.pipeline_mode<synchronous>, transform_indices = @transform_2, window_bounds = array<i64: 1, 32>}, {transform_indices = @transform_3, window_bounds = array<i64: 400, 32>}]} {
    %c0 = arith.constant 0 : index
    %c0_0 = arith.constant 0 : index
    %0 = vector.load %arg1[%c0, %c0_0] : memref<400x256xbf16, #tpu.memory_space<vmem>>, vector<400x256xbf16>
    %c0_1 = arith.constant 0 : index
    %c0_2 = arith.constant 0 : index
    %1 = vector.load %arg2[%c0_1, %c0_2] : memref<256x32xbf16, #tpu.memory_space<vmem>>, vector<256x32xbf16>
    %cst = arith.constant dense<0.000000e+00> : vector<400x32xf32>
    %2 = tpu.matmul %0, %1, %cst {dimension_numbers = #tpu.dot_dimension_numbers<[1], [0], [0], [1], [0, 0, 1, 1], [], []>} : vector<400x256xbf16>, vector<256x32xbf16>, vector<400x32xf32> -> vector<400x32xf32>
    %c0_3 = arith.constant 0 : index
    %c0_4 = arith.constant 0 : index
    %3 = vector.load %arg3[%c0_3, %c0_4] : memref<1x32xf32, #tpu.memory_space<vmem>>, vector<1x32xf32>
    %4 = vector.broadcast %3 : vector<1x32xf32> to vector<400x32xf32>
    %5 = arith.addf %2, %4 : vector<400x32xf32>
    %cst_5 = arith.constant 0.000000e+00 : f32
    %6 = vector.broadcast %cst_5 : f32 to vector<400x32xf32>
    %7 = arith.maximumf %5, %6 : vector<400x32xf32>
    %8 = arith.truncf %7 : vector<400x32xf32> to vector<400x32xbf16>
    %c0_6 = arith.constant 0 : index
    %c0_7 = arith.constant 0 : index
    %9 = vector.load %arg4[%c0_6, %c0_7] : memref<400x32xbf16, #tpu.memory_space<vmem>>, vector<400x32xbf16>
    tpu.vector_store %arg4[%c0_6, %c0_7], %8 {strides = array<i32>} : memref<400x32xbf16, #tpu.memory_space<vmem>>, vector<400x32xbf16>,
    return
  }
  func.func @transform_0(%arg0: i32) -> (i32, i32) {
    %c0_i32 = arith.constant 0 : i32
    %c0_i32_0 = arith.constant 0 : i32
    return %arg0, %c0_i32 : i32, i32
  }
  func.func @transform_1(%arg0: i32) -> (i32, i32) {
    %c0_i32 = arith.constant 0 : i32
    %c0_i32_0 = arith.constant 0 : i32
    %c0_i32_1 = arith.constant 0 : i32
    return %c0_i32, %c0_i32_0 : i32, i32
  }
  func.func @transform_2(%arg0: i32) -> (i32, i32) {
    %c0_i32 = arith.constant 0 : i32
    %c0_i32_0 = arith.constant 0 : i32
    %c0_i32_1 = arith.constant 0 : i32
    return %c0_i32, %c0_i32_0 : i32, i32
  }
  func.func @transform_3(%arg0: i32) -> (i32, i32) {
    %c0_i32 = arith.constant 0 : i32
    %c0_i32_0 = arith.constant 0 : i32
    return %arg0, %c0_i32 : i32, i32
  }
}

module attributes {stable_mosaic.version = 11 : i64} {
  func.func @_linear_kernel(%arg0: i32, %arg1: memref<162x512xbf16, #tpu.memory_space<vmem>>, %arg2: memref<512x64xbf16, #tpu.memory_space<vmem>>, %arg3: memref<1x64xf32, #tpu.memory_space<vmem>>, %arg4: memref<162x64xbf16, #tpu.memory_space<vmem>>) attributes {dimension_semantics = [#tpu.dimension_semantics<parallel>], iteration_bounds = array<i64: 1>, scalar_prefetch = 0 : i64, scratch_operands = 0 : i64, tpu.core_type = #tpu.core_type<tc>, window_params = [{transform_indices = @transform_0, window_bounds = array<i64: 162, 512>}, {pipeline_mode = #tpu.pipeline_mode<synchronous>, transform_indices = @transform_1, window_bounds = array<i64: 512, 64>}, {pipeline_mode = #tpu.pipeline_mode<synchronous>, transform_indices = @transform_2, window_bounds = array<i64: 1, 64>}, {transform_indices = @transform_3, window_bounds = array<i64: 162, 64>}]} {
    %c0 = arith.constant 0 : index
    %c0_0 = arith.constant 0 : index
    %0 = vector.load %arg1[%c0, %c0_0] : memref<162x512xbf16, #tpu.memory_space<vmem>>, vector<162x512xbf16>
    %c0_1 = arith.constant 0 : index
    %c0_2 = arith.constant 0 : index
    %1 = vector.load %arg2[%c0_1, %c0_2] : memref<512x64xbf16, #tpu.memory_space<vmem>>, vector<512x64xbf16>
    %cst = arith.constant dense<0.000000e+00> : vector<162x64xf32>
    %2 = tpu.matmul %0, %1, %cst {dimension_numbers = #tpu.dot_dimension_numbers<[1], [0], [0], [1], [0, 0, 1, 1], [], []>} : vector<162x512xbf16>, vector<512x64xbf16>, vector<162x64xf32> -> vector<162x64xf32>
    %c0_3 = arith.constant 0 : index
    %c0_4 = arith.constant 0 : index
    %3 = vector.load %arg3[%c0_3, %c0_4] : memref<1x64xf32, #tpu.memory_space<vmem>>, vector<1x64xf32>
    %4 = vector.broadcast %3 : vector<1x64xf32> to vector<162x64xf32>
    %5 = arith.addf %2, %4 : vector<162x64xf32>
    %cst_5 = arith.constant 0.000000e+00 : f32
    %6 = vector.broadcast %cst_5 : f32 to vector<162x64xf32>
    %7 = arith.maximumf %5, %6 : vector<162x64xf32>
    %8 = arith.truncf %7 : vector<162x64xf32> to vector<162x64xbf16>
    %c0_6 = arith.constant 0 : index
    %c0_7 = arith.constant 0 : index
    %9 = vector.load %arg4[%c0_6, %c0_7] : memref<162x64xbf16, #tpu.memory_space<vmem>>, vector<162x64xbf16>
    tpu.vector_store %arg4[%c0_6, %c0_7], %8 {strides = array<i32>} : memref<162x64xbf16, #tpu.memory_space<vmem>>, vector<162x64xbf16>,
    return
  }
  func.func @transform_0(%arg0: i32) -> (i32, i32) {
    %c0_i32 = arith.constant 0 : i32
    %c0_i32_0 = arith.constant 0 : i32
    return %arg0, %c0_i32 : i32, i32
  }
  func.func @transform_1(%arg0: i32) -> (i32, i32) {
    %c0_i32 = arith.constant 0 : i32
    %c0_i32_0 = arith.constant 0 : i32
    %c0_i32_1 = arith.constant 0 : i32
    return %c0_i32, %c0_i32_0 : i32, i32
  }
  func.func @transform_2(%arg0: i32) -> (i32, i32) {
    %c0_i32 = arith.constant 0 : i32
    %c0_i32_0 = arith.constant 0 : i32
    %c0_i32_1 = arith.constant 0 : i32
    return %c0_i32, %c0_i32_0 : i32, i32
  }
  func.func @transform_3(%arg0: i32) -> (i32, i32) {
    %c0_i32 = arith.constant 0 : i32
    %c0_i32_0 = arith.constant 0 : i32
    return %arg0, %c0_i32 : i32, i32
  }
}

module attributes {stable_mosaic.version = 11 : i64} {
  func.func @_linear_kernel(%arg0: i32, %arg1: memref<18x1024xbf16, #tpu.memory_space<vmem>>, %arg2: memref<1024x64xbf16, #tpu.memory_space<vmem>>, %arg3: memref<1x64xf32, #tpu.memory_space<vmem>>, %arg4: memref<18x64xbf16, #tpu.memory_space<vmem>>) attributes {dimension_semantics = [#tpu.dimension_semantics<parallel>], iteration_bounds = array<i64: 1>, scalar_prefetch = 0 : i64, scratch_operands = 0 : i64, tpu.core_type = #tpu.core_type<tc>, window_params = [{transform_indices = @transform_0, window_bounds = array<i64: 18, 1024>}, {pipeline_mode = #tpu.pipeline_mode<synchronous>, transform_indices = @transform_1, window_bounds = array<i64: 1024, 64>}, {pipeline_mode = #tpu.pipeline_mode<synchronous>, transform_indices = @transform_2, window_bounds = array<i64: 1, 64>}, {transform_indices = @transform_3, window_bounds = array<i64: 18, 64>}]} {
    %c0 = arith.constant 0 : index
    %c0_0 = arith.constant 0 : index
    %0 = vector.load %arg1[%c0, %c0_0] : memref<18x1024xbf16, #tpu.memory_space<vmem>>, vector<18x1024xbf16>
    %c0_1 = arith.constant 0 : index
    %c0_2 = arith.constant 0 : index
    %1 = vector.load %arg2[%c0_1, %c0_2] : memref<1024x64xbf16, #tpu.memory_space<vmem>>, vector<1024x64xbf16>
    %cst = arith.constant dense<0.000000e+00> : vector<18x64xf32>
    %2 = tpu.matmul %0, %1, %cst {dimension_numbers = #tpu.dot_dimension_numbers<[1], [0], [0], [1], [0, 0, 1, 1], [], []>} : vector<18x1024xbf16>, vector<1024x64xbf16>, vector<18x64xf32> -> vector<18x64xf32>
    %c0_3 = arith.constant 0 : index
    %c0_4 = arith.constant 0 : index
    %3 = vector.load %arg3[%c0_3, %c0_4] : memref<1x64xf32, #tpu.memory_space<vmem>>, vector<1x64xf32>
    %4 = vector.broadcast %3 : vector<1x64xf32> to vector<18x64xf32>
    %5 = arith.addf %2, %4 : vector<18x64xf32>
    %cst_5 = arith.constant 0.000000e+00 : f32
    %6 = vector.broadcast %cst_5 : f32 to vector<18x64xf32>
    %7 = arith.maximumf %5, %6 : vector<18x64xf32>
    %8 = arith.truncf %7 : vector<18x64xf32> to vector<18x64xbf16>
    %c0_6 = arith.constant 0 : index
    %c0_7 = arith.constant 0 : index
    %9 = vector.load %arg4[%c0_6, %c0_7] : memref<18x64xbf16, #tpu.memory_space<vmem>>, vector<18x64xbf16>
    tpu.vector_store %arg4[%c0_6, %c0_7], %8 {strides = array<i32>} : memref<18x64xbf16, #tpu.memory_space<vmem>>, vector<18x64xbf16>,
    return
  }
  func.func @transform_0(%arg0: i32) -> (i32, i32) {
    %c0_i32 = arith.constant 0 : i32
    %c0_i32_0 = arith.constant 0 : i32
    return %arg0, %c0_i32 : i32, i32
  }
  func.func @transform_1(%arg0: i32) -> (i32, i32) {
    %c0_i32 = arith.constant 0 : i32
    %c0_i32_0 = arith.constant 0 : i32
    %c0_i32_1 = arith.constant 0 : i32
    return %c0_i32, %c0_i32_0 : i32, i32
  }
  func.func @transform_2(%arg0: i32) -> (i32, i32) {
    %c0_i32 = arith.constant 0 : i32
    %c0_i32_0 = arith.constant 0 : i32
    %c0_i32_1 = arith.constant 0 : i32
    return %c0_i32, %c0_i32_0 : i32, i32
  }
  func.func @transform_3(%arg0: i32) -> (i32, i32) {
    %c0_i32 = arith.constant 0 : i32
    %c0_i32_0 = arith.constant 0 : i32
    return %arg0, %c0_i32 : i32, i32
  }
}

module attributes {stable_mosaic.version = 11 : i64} {
  func.func @_linear_kernel(%arg0: i32, %arg1: memref<2x576xbf16, #tpu.memory_space<vmem>>, %arg2: memref<576x64xbf16, #tpu.memory_space<vmem>>, %arg3: memref<1x64xf32, #tpu.memory_space<vmem>>, %arg4: memref<2x64xbf16, #tpu.memory_space<vmem>>) attributes {dimension_semantics = [#tpu.dimension_semantics<parallel>], iteration_bounds = array<i64: 1>, scalar_prefetch = 0 : i64, scratch_operands = 0 : i64, tpu.core_type = #tpu.core_type<tc>, window_params = [{transform_indices = @transform_0, window_bounds = array<i64: 2, 576>}, {pipeline_mode = #tpu.pipeline_mode<synchronous>, transform_indices = @transform_1, window_bounds = array<i64: 576, 64>}, {pipeline_mode = #tpu.pipeline_mode<synchronous>, transform_indices = @transform_2, window_bounds = array<i64: 1, 64>}, {transform_indices = @transform_3, window_bounds = array<i64: 2, 64>}]} {
    %c0 = arith.constant 0 : index
    %c0_0 = arith.constant 0 : index
    %0 = vector.load %arg1[%c0, %c0_0] : memref<2x576xbf16, #tpu.memory_space<vmem>>, vector<2x576xbf16>
    %c0_1 = arith.constant 0 : index
    %c0_2 = arith.constant 0 : index
    %1 = vector.load %arg2[%c0_1, %c0_2] : memref<576x64xbf16, #tpu.memory_space<vmem>>, vector<576x64xbf16>
    %cst = arith.constant dense<0.000000e+00> : vector<2x64xf32>
    %2 = tpu.matmul %0, %1, %cst {dimension_numbers = #tpu.dot_dimension_numbers<[1], [0], [0], [1], [0, 0, 1, 1], [], []>} : vector<2x576xbf16>, vector<576x64xbf16>, vector<2x64xf32> -> vector<2x64xf32>
    %c0_3 = arith.constant 0 : index
    %c0_4 = arith.constant 0 : index
    %3 = vector.load %arg3[%c0_3, %c0_4] : memref<1x64xf32, #tpu.memory_space<vmem>>, vector<1x64xf32>
    %4 = vector.broadcast %3 : vector<1x64xf32> to vector<2x64xf32>
    %5 = arith.addf %2, %4 : vector<2x64xf32>
    %cst_5 = arith.constant 0.000000e+00 : f32
    %6 = vector.broadcast %cst_5 : f32 to vector<2x64xf32>
    %7 = arith.maximumf %5, %6 : vector<2x64xf32>
    %8 = arith.truncf %7 : vector<2x64xf32> to vector<2x64xbf16>
    %c0_6 = arith.constant 0 : index
    %c0_7 = arith.constant 0 : index
    %9 = vector.load %arg4[%c0_6, %c0_7] : memref<2x64xbf16, #tpu.memory_space<vmem>>, vector<2x64xbf16>
    tpu.vector_store %arg4[%c0_6, %c0_7], %8 {strides = array<i32>} : memref<2x64xbf16, #tpu.memory_space<vmem>>, vector<2x64xbf16>,
    return
  }
  func.func @transform_0(%arg0: i32) -> (i32, i32) {
    %c0_i32 = arith.constant 0 : i32
    %c0_i32_0 = arith.constant 0 : i32
    return %arg0, %c0_i32 : i32, i32
  }
  func.func @transform_1(%arg0: i32) -> (i32, i32) {
    %c0_i32 = arith.constant 0 : i32
    %c0_i32_0 = arith.constant 0 : i32
    %c0_i32_1 = arith.constant 0 : i32
    return %c0_i32, %c0_i32_0 : i32, i32
  }
  func.func @transform_2(%arg0: i32) -> (i32, i32) {
    %c0_i32 = arith.constant 0 : i32
    %c0_i32_0 = arith.constant 0 : i32
    %c0_i32_1 = arith.constant 0 : i32
    return %c0_i32, %c0_i32_0 : i32, i32
  }
  func.func @transform_3(%arg0: i32) -> (i32, i32) {
    %c0_i32 = arith.constant 0 : i32
    %c0_i32_0 = arith.constant 0 : i32
    return %arg0, %c0_i32 : i32, i32
  }
}

module attributes {stable_mosaic.version = 11 : i64} {
  func.func @_gru_heads_kernel(%arg0: i32, %arg1: memref<2x64xbf16, #tpu.memory_space<vmem>>, %arg2: memref<2x256xf32, #tpu.memory_space<vmem>>, %arg3: memref<64x768xbf16, #tpu.memory_space<vmem>>, %arg4: memref<256x768xbf16, #tpu.memory_space<vmem>>, %arg5: memref<1x768xf32, #tpu.memory_space<vmem>>, %arg6: memref<1x768xf32, #tpu.memory_space<vmem>>, %arg7: memref<256x256xbf16, #tpu.memory_space<vmem>>, %arg8: memref<1x256xf32, #tpu.memory_space<vmem>>, %arg9: memref<256x128xbf16, #tpu.memory_space<vmem>>, %arg10: memref<1x128xf32, #tpu.memory_space<vmem>>, %arg11: memref<2x256xf32, #tpu.memory_space<vmem>>, %arg12: memref<2x128xf32, #tpu.memory_space<vmem>>) attributes {dimension_semantics = [#tpu.dimension_semantics<arbitrary>], iteration_bounds = array<i64: 1>, scalar_prefetch = 0 : i64, scratch_operands = 0 : i64, tpu.core_type = #tpu.core_type<tc>, window_params = [{pipeline_mode = #tpu.pipeline_mode<synchronous>, transform_indices = @transform_0, window_bounds = array<i64: 2, 64>}, {pipeline_mode = #tpu.pipeline_mode<synchronous>, transform_indices = @transform_1, window_bounds = array<i64: 2, 256>}, {pipeline_mode = #tpu.pipeline_mode<synchronous>, transform_indices = @transform_2, window_bounds = array<i64: 64, 768>}, {pipeline_mode = #tpu.pipeline_mode<synchronous>, transform_indices = @transform_3, window_bounds = array<i64: 256, 768>}, {pipeline_mode = #tpu.pipeline_mode<synchronous>, transform_indices = @transform_4, window_bounds = array<i64: 1, 768>}, {pipeline_mode = #tpu.pipeline_mode<synchronous>, transform_indices = @transform_5, window_bounds = array<i64: 1, 768>}, {pipeline_mode = #tpu.pipeline_mode<synchronous>, transform_indices = @transform_6, window_bounds = array<i64: 256, 256>}, {pipeline_mode = #tpu.pipeline_mode<synchronous>, transform_indices = @transform_7, window_bounds = array<i64: 1, 256>}, {pipeline_mode = #tpu.pipeline_mode<synchronous>, transform_indices = @transform_8, window_bounds = array<i64: 256, 128>}, {pipeline_mode = #tpu.pipeline_mode<synchronous>, transform_indices = @transform_9, window_bounds = array<i64: 1, 128>}, {pipeline_mode = #tpu.pipeline_mode<synchronous>, transform_indices = @transform_10, window_bounds = array<i64: 2, 256>}, {pipeline_mode = #tpu.pipeline_mode<synchronous>, transform_indices = @transform_11, window_bounds = array<i64: 2, 128>}]} {
    %c0 = arith.constant 0 : index
    %c0_0 = arith.constant 0 : index
    %0 = vector.load %arg1[%c0, %c0_0] : memref<2x64xbf16, #tpu.memory_space<vmem>>, vector<2x64xbf16>
    %c0_1 = arith.constant 0 : index
    %c0_2 = arith.constant 0 : index
    %1 = vector.load %arg2[%c0_1, %c0_2] : memref<2x256xf32, #tpu.memory_space<vmem>>, vector<2x256xf32>
    %c0_3 = arith.constant 0 : index
    %c0_4 = arith.constant 0 : index
    %2 = vector.load %arg3[%c0_3, %c0_4] : memref<64x768xbf16, #tpu.memory_space<vmem>>, vector<64x768xbf16>
    %cst = arith.constant dense<0.000000e+00> : vector<2x768xf32>
    %3 = tpu.matmul %0, %2, %cst {dimension_numbers = #tpu.dot_dimension_numbers<[1], [0], [0], [1], [0, 0, 1, 1], [], []>} : vector<2x64xbf16>, vector<64x768xbf16>, vector<2x768xf32> -> vector<2x768xf32>
    %c0_5 = arith.constant 0 : index
    %c0_6 = arith.constant 0 : index
    %4 = vector.load %arg5[%c0_5, %c0_6] : memref<1x768xf32, #tpu.memory_space<vmem>>, vector<1x768xf32>
    %5 = vector.broadcast %4 : vector<1x768xf32> to vector<2x768xf32>
    %6 = arith.addf %3, %5 : vector<2x768xf32>
    %7 = arith.truncf %1 : vector<2x256xf32> to vector<2x256xbf16>
    %c0_7 = arith.constant 0 : index
    %c0_8 = arith.constant 0 : index
    %8 = vector.load %arg4[%c0_7, %c0_8] : memref<256x768xbf16, #tpu.memory_space<vmem>>, vector<256x768xbf16>
    %cst_9 = arith.constant dense<0.000000e+00> : vector<2x768xf32>
    %9 = tpu.matmul %7, %8, %cst_9 {dimension_numbers = #tpu.dot_dimension_numbers<[1], [0], [0], [1], [0, 0, 1, 1], [], []>} : vector<2x256xbf16>, vector<256x768xbf16>, vector<2x768xf32> -> vector<2x768xf32>
    %c0_10 = arith.constant 0 : index
    %c0_11 = arith.constant 0 : index
    %10 = vector.load %arg6[%c0_10, %c0_11] : memref<1x768xf32, #tpu.memory_space<vmem>>, vector<1x768xf32>
    %11 = vector.broadcast %10 : vector<1x768xf32> to vector<2x768xf32>
    %12 = arith.addf %9, %11 : vector<2x768xf32>
    %13 = vector.extract_strided_slice %6 {offsets = [0, 0], sizes = [2, 256], strides = [1, 1]} : vector<2x768xf32> to vector<2x256xf32>
    %14 = vector.extract_strided_slice %12 {offsets = [0, 0], sizes = [2, 256], strides = [1, 1]} : vector<2x768xf32> to vector<2x256xf32>
    %15 = arith.addf %13, %14 : vector<2x256xf32>
    %16 = arith.negf %15 : vector<2x256xf32>
    %17 = math.exp %16 : vector<2x256xf32>
    %cst_12 = arith.constant 1.000000e+00 : f32
    %18 = vector.broadcast %cst_12 : f32 to vector<2x256xf32>
    %19 = arith.addf %18, %17 : vector<2x256xf32>
    %20 = arith.divf %18, %19 : vector<2x256xf32>
    %21 = vector.extract_strided_slice %6 {offsets = [0, 256], sizes = [2, 256], strides = [1, 1]} : vector<2x768xf32> to vector<2x256xf32>
    %22 = vector.extract_strided_slice %12 {offsets = [0, 256], sizes = [2, 256], strides = [1, 1]} : vector<2x768xf32> to vector<2x256xf32>
    %23 = arith.addf %21, %22 : vector<2x256xf32>
    %24 = arith.negf %23 : vector<2x256xf32>
    %25 = math.exp %24 : vector<2x256xf32>
    %cst_13 = arith.constant 1.000000e+00 : f32
    %26 = vector.broadcast %cst_13 : f32 to vector<2x256xf32>
    %27 = arith.addf %26, %25 : vector<2x256xf32>
    %28 = arith.divf %26, %27 : vector<2x256xf32>
    %29 = vector.extract_strided_slice %6 {offsets = [0, 512], sizes = [2, 256], strides = [1, 1]} : vector<2x768xf32> to vector<2x256xf32>
    %30 = vector.extract_strided_slice %12 {offsets = [0, 512], sizes = [2, 256], strides = [1, 1]} : vector<2x768xf32> to vector<2x256xf32>
    %31 = arith.mulf %20, %30 : vector<2x256xf32>
    %32 = arith.addf %29, %31 : vector<2x256xf32>
    %33 = math.tanh %32 : vector<2x256xf32>
    %cst_14 = arith.constant 1.000000e+00 : f32
    %34 = vector.broadcast %cst_14 : f32 to vector<2x256xf32>
    %35 = arith.subf %34, %28 : vector<2x256xf32>
    %36 = arith.mulf %35, %33 : vector<2x256xf32>
    %37 = arith.mulf %28, %1 : vector<2x256xf32>
    %38 = arith.addf %36, %37 : vector<2x256xf32>
    %c0_15 = arith.constant 0 : index
    %c0_16 = arith.constant 0 : index
    %39 = vector.load %arg11[%c0_15, %c0_16] : memref<2x256xf32, #tpu.memory_space<vmem>>, vector<2x256xf32>
    tpu.vector_store %arg11[%c0_15, %c0_16], %38 {strides = array<i32>} : memref<2x256xf32, #tpu.memory_space<vmem>>, vector<2x256xf32>,
    %40 = arith.truncf %38 : vector<2x256xf32> to vector<2x256xbf16>
    %c0_17 = arith.constant 0 : index
    %c0_18 = arith.constant 0 : index
    %41 = vector.load %arg7[%c0_17, %c0_18] : memref<256x256xbf16, #tpu.memory_space<vmem>>, vector<256x256xbf16>
    %cst_19 = arith.constant dense<0.000000e+00> : vector<2x256xf32>
    %42 = tpu.matmul %40, %41, %cst_19 {dimension_numbers = #tpu.dot_dimension_numbers<[1], [0], [0], [1], [0, 0, 1, 1], [], []>} : vector<2x256xbf16>, vector<256x256xbf16>, vector<2x256xf32> -> vector<2x256xf32>
    %c0_20 = arith.constant 0 : index
    %c0_21 = arith.constant 0 : index
    %43 = vector.load %arg8[%c0_20, %c0_21] : memref<1x256xf32, #tpu.memory_space<vmem>>, vector<1x256xf32>
    %44 = vector.broadcast %43 : vector<1x256xf32> to vector<2x256xf32>
    %45 = arith.addf %42, %44 : vector<2x256xf32>
    %cst_22 = arith.constant 0.000000e+00 : f32
    %46 = vector.broadcast %cst_22 : f32 to vector<2x256xf32>
    %47 = arith.maximumf %45, %46 : vector<2x256xf32>
    %48 = arith.truncf %47 : vector<2x256xf32> to vector<2x256xbf16>
    %c0_23 = arith.constant 0 : index
    %c0_24 = arith.constant 0 : index
    %49 = vector.load %arg9[%c0_23, %c0_24] : memref<256x128xbf16, #tpu.memory_space<vmem>>, vector<256x128xbf16>
    %cst_25 = arith.constant dense<0.000000e+00> : vector<2x128xf32>
    %50 = tpu.matmul %48, %49, %cst_25 {dimension_numbers = #tpu.dot_dimension_numbers<[1], [0], [0], [1], [0, 0, 1, 1], [], []>} : vector<2x256xbf16>, vector<256x128xbf16>, vector<2x128xf32> -> vector<2x128xf32>
    %c0_26 = arith.constant 0 : index
    %c0_27 = arith.constant 0 : index
    %51 = vector.load %arg10[%c0_26, %c0_27] : memref<1x128xf32, #tpu.memory_space<vmem>>, vector<1x128xf32>
    %52 = vector.broadcast %51 : vector<1x128xf32> to vector<2x128xf32>
    %53 = arith.addf %50, %52 : vector<2x128xf32>
    %c0_28 = arith.constant 0 : index
    %c0_29 = arith.constant 0 : index
    %54 = vector.load %arg12[%c0_28, %c0_29] : memref<2x128xf32, #tpu.memory_space<vmem>>, vector<2x128xf32>
    tpu.vector_store %arg12[%c0_28, %c0_29], %53 {strides = array<i32>} : memref<2x128xf32, #tpu.memory_space<vmem>>, vector<2x128xf32>,
    return
  }
  func.func @transform_0(%arg0: i32) -> (i32, i32) {
    %c0_i32 = arith.constant 0 : i32
    %c0_i32_0 = arith.constant 0 : i32
    %c0_i32_1 = arith.constant 0 : i32
    return %c0_i32, %c0_i32_0 : i32, i32
  }
  func.func @transform_1(%arg0: i32) -> (i32, i32) {
    %c0_i32 = arith.constant 0 : i32
    %c0_i32_0 = arith.constant 0 : i32
    %c0_i32_1 = arith.constant 0 : i32
    return %c0_i32, %c0_i32_0 : i32, i32
  }
  func.func @transform_2(%arg0: i32) -> (i32, i32) {
    %c0_i32 = arith.constant 0 : i32
    %c0_i32_0 = arith.constant 0 : i32
    %c0_i32_1 = arith.constant 0 : i32
    return %c0_i32, %c0_i32_0 : i32, i32
  }
  func.func @transform_3(%arg0: i32) -> (i32, i32) {
    %c0_i32 = arith.constant 0 : i32
    %c0_i32_0 = arith.constant 0 : i32
    %c0_i32_1 = arith.constant 0 : i32
    return %c0_i32, %c0_i32_0 : i32, i32
  }
  func.func @transform_4(%arg0: i32) -> (i32, i32) {
    %c0_i32 = arith.constant 0 : i32
    %c0_i32_0 = arith.constant 0 : i32
    %c0_i32_1 = arith.constant 0 : i32
    return %c0_i32, %c0_i32_0 : i32, i32
  }
  func.func @transform_5(%arg0: i32) -> (i32, i32) {
    %c0_i32 = arith.constant 0 : i32
    %c0_i32_0 = arith.constant 0 : i32
    %c0_i32_1 = arith.constant 0 : i32
    return %c0_i32, %c0_i32_0 : i32, i32
  }
  func.func @transform_6(%arg0: i32) -> (i32, i32) {
    %c0_i32 = arith.constant 0 : i32
    %c0_i32_0 = arith.constant 0 : i32
    %c0_i32_1 = arith.constant 0 : i32
    return %c0_i32, %c0_i32_0 : i32, i32
  }
  func.func @transform_7(%arg0: i32) -> (i32, i32) {
    %c0_i32 = arith.constant 0 : i32
    %c0_i32_0 = arith.constant 0 : i32
    %c0_i32_1 = arith.constant 0 : i32
    return %c0_i32, %c0_i32_0 : i32, i32
  }
  func.func @transform_8(%arg0: i32) -> (i32, i32) {
    %c0_i32 = arith.constant 0 : i32
    %c0_i32_0 = arith.constant 0 : i32
    %c0_i32_1 = arith.constant 0 : i32
    return %c0_i32, %c0_i32_0 : i32, i32
  }
  func.func @transform_9(%arg0: i32) -> (i32, i32) {
    %c0_i32 = arith.constant 0 : i32
    %c0_i32_0 = arith.constant 0 : i32
    %c0_i32_1 = arith.constant 0 : i32
    return %c0_i32, %c0_i32_0 : i32, i32
  }
  func.func @transform_10(%arg0: i32) -> (i32, i32) {
    %c0_i32 = arith.constant 0 : i32
    %c0_i32_0 = arith.constant 0 : i32
    %c0_i32_1 = arith.constant 0 : i32
    return %c0_i32, %c0_i32_0 : i32, i32
  }
  func.func @transform_11(%arg0: i32) -> (i32, i32) {
    %c0_i32 = arith.constant 0 : i32
    %c0_i32_0 = arith.constant 0 : i32
    %c0_i32_1 = arith.constant 0 : i32
    return %c0_i32, %c0_i32_0 : i32, i32
  }
}

</mosaic_0001>

<bundles_post_ra>
// kernel: _lambda_.5
= control target key start
LH: loop header
LB: loop body
LE: loop exit
PB: predicated region body
PF: predicated region fallthrough
CT: control target
= control target key end

     0   :  { %s1542_s12 = smov 0   ;;  %s1852_s0 = inlined_call_operand.vmem [shape: bf16[800,256], index: 0, kind: input, shape index: {}]   ;;  %s1853_s1 = inlined_call_operand.vmem [shape: bf16[256,32], index: 1, kind: input, shape index: {}]   ;;  %s1854_s2 = inlined_call_operand.vmem [shape: f32[1,32], index: 2, kind: input, shape index: {}]   ;;  %s1855_s3 = inlined_call_operand.vmem [shape: bf16[800,32], index: 3, kind: output, shape index: {}]  }
   0x1 LB: > { %s1203_s13 = sadd.s32 4294967295, %s1519_s12   ;;  %p1207_p0 = scmp.ge.s32.totalorder %s1519_s12, 1  ;;  %s1519_s12 = sphi %s1542_s12, %s13_s12  }
   0x2   : > { %p139_p1 = scmp.lt.s32.totalorder %s1519_s12, 3 }
   0x4   : > { %p140_p2 = pnand %p1207_p0, %p139_p1 }
   0x5   : > { %v1422_v0 = vld [vmem:[%s1853_s1] sm:$0xff] (!%p140_p2)   ;;  %v1521_v1 = vmov (!%p140_p2), 0   ;;  %s164_s16 = smul.u32 (!%p140_p2), 50, %s1203_s13  ;;  %v1423_v2 = vld [vmem:[%s1853_s1 + $0x8] sm:$0xff] (!%p140_p2)   ;;  %v1424_v3 = vld [vmem:[%s1853_s1 + $0x10] sm:$0xff] (!%p140_p2)   ;;  %vm1096_vm0 = vcmask (!%p140_p2), 257024  }
   0x6   : > { %143 = sbr.rel (%p140_p2) target bundleno = 387 (0x183), region = 32  ;;  %613 = vmatprep.subr.bf16.mxu0 (!%p140_p2), %v1521_v1  ;;  %1381 = vmatprep.subr.bf16.mxu1 (!%p140_p2), %v1521_v1  ;;  %v1425_v4 = vld [vmem:[%s1853_s1 + $0x18] sm:$0xff] (!%p140_p2)   ;;  %v1426_v5 = vld [vmem:[%s1853_s1 + $0x20] sm:$0xff] (!%p140_p2)   ;;  %v1427_v7 = vld [vmem:[%s1853_s1 + $0x28] sm:$0xff] (!%p140_p2)  }
   0x7   : > { %614 = vmatpush1.bf16.msra.mxu0 (!%p140_p2), %v1422_v0  ;;  %1397 = vmatpush1.bf16.msra.mxu1 (!%p140_p2), %v1422_v0  ;;  %p165_p3 = scmp.lt.s32.totalorder (!%p140_p2), %s164_s16, 99  ;;  %v1428_v9 = vld [vmem:[%s1853_s1 + $0x30] sm:$0xff] (!%p140_p2)   ;;  %v1429_v10 = vld [vmem:[%s1853_s1 + $0x38] sm:$0xff] (!%p140_p2)   ;;  %v1430_v11 = vld [vmem:[%s1853_s1 + $0x40] sm:$0xff] (!%p140_p2)  }
   0x8   : > { %615 = vmatprep.subr.bf16.mxu0 (!%p140_p2), %v1521_v1  ;;  %1382 = vmatprep.subr.bf16.mxu1 (!%p140_p2), %v1521_v1  ;;  %v1431_v12 = vld [vmem:[%s1853_s1 + $0x48] sm:$0xff] (!%p140_p2)   ;;  %v1432_v13 = vld [vmem:[%s1853_s1 + $0x50] sm:$0xff] (!%p140_p2)   ;;  %v1433_v14 = vld [vmem:[%s1853_s1 + $0x58] sm:$0xff] (!%p140_p2)  }
   0x9   : > { %v1434_v15 = vld [vmem:[%s1853_s1 + $0x60] sm:$0xff] (!%p140_p2)   ;;  %v1435_v16 = vld [vmem:[%s1853_s1 + $0x68] sm:$0xff] (!%p140_p2)   ;;  %v1436_v17 = vld [vmem:[%s1853_s1 + $0x70] sm:$0xff] (!%p140_p2)  }
   0xa   : > { %v1437_v18 = vld [vmem:[%s1853_s1 + $0x78] sm:$0xff] (!%p140_p2)  }
   0xb   : > { %616 = vmatpush1.bf16.msra.mxu0 (!%p140_p2), %v1423_v2  ;;  %1398 = vmatpush1.bf16.msra.mxu1 (!%p140_p2), %v1423_v2 }
   0xc   : > { %617 = vmatprep.subr.bf16.mxu0 (!%p140_p2), %v1521_v1  ;;  %1383 = vmatprep.subr.bf16.mxu1 (!%p140_p2), %v1521_v1 }
   0xd   : > { %s1857_s16 = smov (!%p165_p3, %s164_s16), 99 }
   0xe   : > { %s1330_s23 = sshll.u32 %s1857_s16, 3  ;;  %s1210_s29 = sshll.u32 %s1857_s16, 2 }
   0xf   : > { %618 = vmatpush1.bf16.msra.mxu0 %v1424_v3  ;;  %1399 = vmatpush1.bf16.msra.mxu1 %v1424_v3  ;;  %s1579_s28 = scalar_lea.vmem %s1852_s0, %s1330_s23  ;;  %v1691_v3 = vld [vmem:[%s1854_s2] ss:$0 sm:$0xff]  ;;  %s1701_s16 = scalar_lea.vmem %s1855_s3, %s1210_s29 }
  0x10   : > { %619 = vmatprep.subr.bf16.mxu0 %v1521_v1  ;;  %1384 = vmatprep.subr.bf16.mxu1 %v1521_v1  ;;  %v1440_v6 = vld [vmem:[%s1579_s28 + $0x4] ss:$8 sps:$4 sm:$0xff]   ;;  %v1443_v8 = vld [vmem:[%s1579_s28 + $0xd4] ss:$8 sps:$4 sm:$0xff]   ;;  %v1438_v19 = vld [vmem:[%s1579_s28] ss:$8 sps:$4 sm:$0xff]  }
  0x11   : > { %645 = vmatprep.mubr.bf16.mxu0 %v1440_v6  ;;  %749 = vmatprep.mubr.bf16.mxu1 %v1443_v8  ;;  %v1441_v20 = vld [vmem:[%s1579_s28 + $0xd0] ss:$8 sps:$4 sm:$0xff]   ;;  %v1444_v21 = vld [vmem:[%s1579_s28 + $0x14] ss:$8 sps:$4 sm:$0xff]   ;;  %v1447_v22 = vld [vmem:[%s1579_s28 + $0xe4] ss:$8 sps:$4 sm:$0xff]  }
  0x12   : > { %v1446_v23 = vld [vmem:[%s1579_s28 + $0x10] ss:$8 sps:$4 sm:$0xff]   ;;  %v1449_v24 = vld [vmem:[%s1579_s28 + $0xe0] ss:$8 sps:$4 sm:$0xff]   ;;  %v1450_v25 = vld [vmem:[%s1579_s28 + $0x24] ss:$8 sps:$4 sm:$0xff]  }
  0x13   : > { %620 = vmatpush1.bf16.msra.mxu0 %v1425_v4  ;;  %1400 = vmatpush1.bf16.msra.mxu1 %v1425_v4  ;;  %v1453_v26 = vld [vmem:[%s1579_s28 + $0xf4] ss:$8 sps:$4 sm:$0xff]   ;;  %v1452_v27 = vld [vmem:[%s1579_s28 + $0x20] ss:$8 sps:$4 sm:$0xff]   ;;  %v1455_v28 = vld [vmem:[%s1579_s28 + $0xf0] ss:$8 sps:$4 sm:$0xff]  }
  0x14   : > { %621 = vmatprep.subr.bf16.mxu0 %v1521_v1  ;;  %1385 = vmatprep.subr.bf16.mxu1 %v1521_v1  ;;  %v1456_v29 = vld [vmem:[%s1579_s28 + $0x34] ss:$8 sps:$4 sm:$0xff]   ;;  %v1459_v30 = vld [vmem:[%s1579_s28 + $0x104] ss:$8 sps:$4 sm:$0xff]   ;;  %v1458_v31 = vld [vmem:[%s1579_s28 + $0x30] ss:$8 sps:$4 sm:$0xff]  }
  0x15   : > { %v1461_v32 = vld [vmem:[%s1579_s28 + $0x100] ss:$8 sps:$4 sm:$0xff]   ;;  %v1462_v33 = vld [vmem:[%s1579_s28 + $0x44] ss:$8 sps:$4 sm:$0xff]   ;;  %v1465_v34 = vld [vmem:[%s1579_s28 + $0x114] ss:$8 sps:$4 sm:$0xff]  }
  0x16   : > { %v1464_v35 = vld [vmem:[%s1579_s28 + $0x40] ss:$8 sps:$4 sm:$0xff]   ;;  %v1467_v36 = vld [vmem:[%s1579_s28 + $0x110] ss:$8 sps:$4 sm:$0xff]   ;;  %v1468_v37 = vld [vmem:[%s1579_s28 + $0x54] ss:$8 sps:$4 sm:$0xff]  }
  0x17   : > { %622 = vmatpush1.bf16.msra.mxu0 %v1426_v5  ;;  %1401 = vmatpush1.bf16.msra.mxu1 %v1426_v5  ;;  %v1471_v38 = vld [vmem:[%s1579_s28 + $0x124] ss:$8 sps:$4 sm:$0xff]   ;;  %v1470_v39 = vld [vmem:[%s1579_s28 + $0x50] ss:$8 sps:$4 sm:$0xff]   ;;  %v1473_v40 = vld [vmem:[%s1579_s28 + $0x120] ss:$8 sps:$4 sm:$0xff]  }
  0x18   : > { %623 = vmatprep.subr.bf16.mxu0 %v1521_v1  ;;  %1386 = vmatprep.subr.bf16.mxu1 %v1521_v1  ;;  %v1474_v41 = vld [vmem:[%s1579_s28 + $0x64] ss:$8 sps:$4 sm:$0xff]   ;;  %v1477_v42 = vld [vmem:[%s1579_s28 + $0x134] ss:$8 sps:$4 sm:$0xff]   ;;  %v1476_v43 = vld [vmem:[%s1579_s28 + $0x60] ss:$8 sps:$4 sm:$0xff]  }
  0x19   : > { %v1479_v44 = vld [vmem:[%s1579_s28 + $0x130] ss:$8 sps:$4 sm:$0xff]   ;;  %v1480_v45 = vld [vmem:[%s1579_s28 + $0x74] ss:$8 sps:$4 sm:$0xff]   ;;  %v1483_v46 = vld [vmem:[%s1579_s28 + $0x144] ss:$8 sps:$4 sm:$0xff]  }
  0x1a   : > { %v1482_v47 = vld [vmem:[%s1579_s28 + $0x70] ss:$8 sps:$4 sm:$0xff]   ;;  %v1485_v48 = vld [vmem:[%s1579_s28 + $0x140] ss:$8 sps:$4 sm:$0xff]   ;;  %v1486_v49 = vld [vmem:[%s1579_s28 + $0x84] ss:$8 sps:$4 sm:$0xff]  }
  0x1b   : > { %624 = vmatpush1.bf16.msra.mxu0 %v1427_v7  ;;  %1402 = vmatpush1.bf16.msra.mxu1 %v1427_v7  ;;  %v1489_v50 = vld [vmem:[%s1579_s28 + $0x154] ss:$8 sps:$4 sm:$0xff]   ;;  %v1488_v51 = vld [vmem:[%s1579_s28 + $0x80] ss:$8 sps:$4 sm:$0xff]   ;;  %v1491_v52 = vld [vmem:[%s1579_s28 + $0x150] ss:$8 sps:$4 sm:$0xff]  }
  0x1c   : > { %625 = vmatprep.subr.bf16.mxu0 %v1521_v1  ;;  %1387 = vmatprep.subr.bf16.mxu1 %v1521_v1  ;;  %v1492_v53 = vld [vmem:[%s1579_s28 + $0x94] ss:$8 sps:$4 sm:$0xff]   ;;  %v1495_v54 = vld [vmem:[%s1579_s28 + $0x164] ss:$8 sps:$4 sm:$0xff]   ;;  %v1494_v55 = vld [vmem:[%s1579_s28 + $0x90] ss:$8 sps:$4 sm:$0xff]  }
  0x1d   : > { %v1497_v56 = vld [vmem:[%s1579_s28 + $0x160] ss:$8 sps:$4 sm:$0xff]   ;;  %v1498_v57 = vld [vmem:[%s1579_s28 + $0xa4] ss:$8 sps:$4 sm:$0xff]   ;;  %v1501_v58 = vld [vmem:[%s1579_s28 + $0x174] ss:$8 sps:$4 sm:$0xff]  }
  0x1e   : > { %v1500_v59 = vld [vmem:[%s1579_s28 + $0xa0] ss:$8 sps:$4 sm:$0xff]   ;;  %v1503_v60 = vld [vmem:[%s1579_s28 + $0x170] ss:$8 sps:$4 sm:$0xff]   ;;  %v1504_v61 = vld [vmem:[%s1579_s28 + $0xb4] ss:$8 sps:$4 sm:$0xff]  }
  0x1f   : > { %626 = vmatpush1.bf16.msra.mxu0 %v1428_v9  ;;  %1403 = vmatpush1.bf16.msra.mxu1 %v1428_v9  ;;  %v1507_v62 = vld [vmem:[%s1579_s28 + $0x184] ss:$8 sps:$4 sm:$0xff]   ;;  %v1506_v63 = vld [vmem:[%s1579_s28 + $0xb0] ss:$8 sps:$4 sm:$0xff]   ;;  %v1509_v0 = vld [vmem:[%s1579_s28 + $0x180] ss:$8 sps:$4 sm:$0xff]  }
  0x20   : > { %627 = vmatprep.subr.bf16.mxu0 %v1521_v1  ;;  %1388 = vmatprep.subr.bf16.mxu1 %v1521_v1  ;;  %v1512_v2 = vld [vmem:[%s1579_s28 + $0xc0] ss:$8 sps:$4 sm:$0xff]  }
  0x23   : > { %628 = vmatpush1.bf16.msra.mxu0 %v1429_v10  ;;  %1404 = vmatpush1.bf16.msra.mxu1 %v1429_v10 }
  0x24   : > { %629 = vmatprep.subr.bf16.mxu0 %v1521_v1  ;;  %1389 = vmatprep.subr.bf16.mxu1 %v1521_v1 }
  0x27   : > { %630 = vmatpush1.bf16.msra.mxu0 %v1430_v11  ;;  %1405 = vmatpush1.bf16.msra.mxu1 %v1430_v11 }
  0x28   : > { %631 = vmatprep.subr.bf16.mxu0 %v1521_v1  ;;  %1390 = vmatprep.subr.bf16.mxu1 %v1521_v1 }
  0x2b   : > { %632 = vmatpush1.bf16.msra.mxu0 %v1431_v12  ;;  %1406 = vmatpush1.bf16.msra.mxu1 %v1431_v12 }
  0x2c   : > { %633 = vmatprep.subr.bf16.mxu0 %v1521_v1  ;;  %1391 = vmatprep.subr.bf16.mxu1 %v1521_v1 }
  0x2f   : > { %634 = vmatpush1.bf16.msra.mxu0 %v1432_v13  ;;  %1407 = vmatpush1.bf16.msra.mxu1 %v1432_v13 }
  0x30   : > { %635 = vmatprep.subr.bf16.mxu0 %v1521_v1  ;;  %1392 = vmatprep.subr.bf16.mxu1 %v1521_v1 }
  0x33   : > { %636 = vmatpush1.bf16.msra.mxu0 %v1433_v14  ;;  %1408 = vmatpush1.bf16.msra.mxu1 %v1433_v14 }
  0x34   : > { %637 = vmatprep.subr.bf16.mxu0 %v1521_v1  ;;  %1393 = vmatprep.subr.bf16.mxu1 %v1521_v1 }
  0x37   : > { %638 = vmatpush1.bf16.msra.mxu0 %v1434_v15  ;;  %1409 = vmatpush1.bf16.msra.mxu1 %v1434_v15 }
  0x38   : > { %639 = vmatprep.subr.bf16.mxu0 %v1521_v1  ;;  %1394 = vmatprep.subr.bf16.mxu1 %v1521_v1 }
  0x3b   : > { %640 = vmatpush1.bf16.msra.mxu0 %v1435_v16  ;;  %1410 = vmatpush1.bf16.msra.mxu1 %v1435_v16 }
  0x3c   : > { %641 = vmatprep.subr.bf16.mxu0 %v1521_v1  ;;  %1395 = vmatprep.subr.bf16.mxu1 %v1521_v1 }
  0x3f   : > { %642 = vmatpush1.bf16.msra.mxu0 %v1436_v17  ;;  %1411 = vmatpush1.bf16.msra.mxu1 %v1436_v17 }
  0x40   : > { %643 = vmatprep.subr.bf16.mxu0 %v1521_v1  ;;  %1396 = vmatprep.subr.bf16.mxu1 %v1521_v1  ;;  %v1510_v1 = vld [vmem:[%s1579_s28 + $0xc4] ss:$8 sps:$4 sm:$0xff]  }
  0x43   : > { %644 = vmatpush1.bf16.msra.mxu0 %v1437_v18  ;;  %1412 = vmatpush1.bf16.msra.mxu1 %v1437_v18 }
  0x46   : > { %646 = vmatmul.mubr.bf16.vlgmr.msra.gmra.mrb[0].mxu0 %v1438_v19  ;;  %750 = vmatmul.mubr.bf16.vlgmr.msra.gmra.mrb[0].mxu1 %v1441_v20 }
  0x47   : > { %653 = vmatprep.mubr.bf16.mxu0 %v1444_v21  ;;  %757 = vmatprep.mubr.bf16.mxu1 %v1447_v22 }
  0x4e   : > { %654 = vmatmul.mubr.bf16.gmra.mrb[4].mxu0 %v1446_v23  ;;  %758 = vmatmul.mubr.bf16.gmra.mrb[4].mxu1 %v1449_v24 }
  0x4f   : > { %661 = vmatprep.mubr.bf16.mxu0 %v1450_v25  ;;  %765 = vmatprep.mubr.bf16.mxu1 %v1453_v26 }
  0x56   : > { %662 = vmatmul.mubr.bf16.gmra.mrb[8].mxu0 %v1452_v27  ;;  %766 = vmatmul.mubr.bf16.gmra.mrb[8].mxu1 %v1455_v28 }
  0x57   : > { %669 = vmatprep.mubr.bf16.mxu0 %v1456_v29  ;;  %773 = vmatprep.mubr.bf16.mxu1 %v1459_v30 }
  0x5e   : > { %670 = vmatmul.mubr.bf16.gmra.mrb[12].mxu0 %v1458_v31  ;;  %774 = vmatmul.mubr.bf16.gmra.mrb[12].mxu1 %v1461_v32 }
  0x5f   : > { %677 = vmatprep.mubr.bf16.mxu0 %v1462_v33  ;;  %781 = vmatprep.mubr.bf16.mxu1 %v1465_v34 }
  0x66   : > { %678 = vmatmul.mubr.bf16.gmra.mrb[16].mxu0 %v1464_v35  ;;  %782 = vmatmul.mubr.bf16.gmra.mrb[16].mxu1 %v1467_v36 }
  0x67   : > { %685 = vmatprep.mubr.bf16.mxu0 %v1468_v37  ;;  %789 = vmatprep.mubr.bf16.mxu1 %v1471_v38 }
  0x6e   : > { %686 = vmatmul.mubr.bf16.gmra.mrb[20].mxu0 %v1470_v39  ;;  %790 = vmatmul.mubr.bf16.gmra.mrb[20].mxu1 %v1473_v40 }
  0x6f   : > { %693 = vmatprep.mubr.bf16.mxu0 %v1474_v41  ;;  %797 = vmatprep.mubr.bf16.mxu1 %v1477_v42 }
  0x76   : > { %694 = vmatmul.mubr.bf16.gmra.mrb[24].mxu0 %v1476_v43  ;;  %798 = vmatmul.mubr.bf16.gmra.mrb[24].mxu1 %v1479_v44 }
  0x77   : > { %701 = vmatprep.mubr.bf16.mxu0 %v1480_v45  ;;  %805 = vmatprep.mubr.bf16.mxu1 %v1483_v46 }
  0x7e   : > { %702 = vmatmul.mubr.bf16.gmra.mrb[28].mxu0 %v1482_v47  ;;  %806 = vmatmul.mubr.bf16.gmra.mrb[28].mxu1 %v1485_v48 }
  0x7f   : > { %709 = vmatprep.mubr.bf16.mxu0 %v1486_v49  ;;  %813 = vmatprep.mubr.bf16.mxu1 %v1489_v50 }
  0x86   : > { %710 = vmatmul.mubr.bf16.gmra.mrb[32].mxu0 %v1488_v51  ;;  %814 = vmatmul.mubr.bf16.gmra.mrb[32].mxu1 %v1491_v52 }
  0x87   : > { %717 = vmatprep.mubr.bf16.mxu0 %v1492_v53  ;;  %821 = vmatprep.mubr.bf16.mxu1 %v1495_v54 }
  0x8e   : > { %718 = vmatmul.mubr.bf16.gmra.mrb[36].mxu0 %v1494_v55  ;;  %822 = vmatmul.mubr.bf16.gmra.mrb[36].mxu1 %v1497_v56 }
  0x8f   : > { %725 = vmatprep.mubr.bf16.mxu0 %v1498_v57  ;;  %829 = vmatprep.mubr.bf16.mxu1 %v1501_v58 }
  0x96   : > { %726 = vmatmul.mubr.bf16.gmra.mrb[40].mxu0 %v1500_v59  ;;  %830 = vmatmul.mubr.bf16.gmra.mrb[40].mxu1 %v1503_v60 }
  0x97   : > { %733 = vmatprep.mubr.bf16.mxu0 %v1504_v61  ;;  %837 = vmatprep.mubr.bf16.mxu1 %v1507_v62 }
  0x9e   : > { %734 = vmatmul.mubr.bf16.gmra.mrb[44].mxu0 %v1506_v63  ;;  %838 = vmatmul.mubr.bf16.gmra.mrb[44].mxu1 %v1509_v0 }
  0x9f   : > { %741 = vmatprep.mubr.bf16.mxu0 %v1510_v1 }
  0xa6   : > { %742 = vmatmul.mubr.bf16.gmra.mrb[48].mxu0 %v1512_v2 }
 0x119   : > { %v647_v4 = vpop.f32.mrb[0].mxu0  ;;  %v751_v5 = vpop.f32.mrb[0].mxu1 }
 0x11a   : > { %v648_v6 = vadd.f32 %v1691_v3, %v647_v4  ;;  %v649_v7 = vpop.f32.mrb[1].mxu0  ;;  %v752_v8 = vadd.f32 %v1691_v3, %v751_v5  ;;  %v753_v9 = vpop.f32.mrb[1].mxu1 }
 0x11b   : > { %v650_v10 = vpop.f32.mrb[2].mxu0  ;;  %v754_v11 = vpop.f32.mrb[2].mxu1 }
 0x11c   : > { %v846_v12 = vmax.f32 %v648_v6, 0.0  ;;  %v651_v13 = vadd.f32 %v1691_v3, %v650_v10  ;;  %v652_v14 = vpop.f32.mrb[3].mxu0  ;;  %v872_v15 = vmax.f32 %v752_v8, 0.0  ;;  %v755_v16 = vadd.f32 %v1691_v3, %v754_v11  ;;  %v756_v17 = vpop.f32.mrb[3].mxu1 }
 0x11e   : > { %v1331_v18 = vpack.c.bf16 %v846_v12, %v846_v12  ;;  %v847_v19 = vmax.f32 %v651_v13, 0.0  ;;  %v1357_v20 = vpack.c.bf16 %v872_v15, %v872_v15  ;;  %v873_v21 = vmax.f32 %v755_v16, 0.0 }
 0x120   : > { %1097 = vst.msk [vmem:[%s1701_s16] sm:$0xf] %vm1096_vm0, %v1331_v18  ;;  %v1332_v22 = vpack.c.bf16 %v847_v19, %v847_v19  ;;  %1123 = vst.msk [vmem:[%s1701_s16 + $0x68] sm:$0xf] %vm1096_vm0, %v1357_v20  ;;  %v1358_v23 = vpack.c.bf16 %v873_v21, %v873_v21 }
 0x121   : > { %v655_v24 = vpop.f32.mrb[4].mxu0  ;;  %v759_v25 = vpop.f32.mrb[4].mxu1 }
 0x122   : > { %1098 = vst.msk [vmem:[%s1701_s16 + $0x4] sm:$0xf] %vm1096_vm0, %v1332_v22  ;;  %1124 = vst.msk [vmem:[%s1701_s16 + $0x6c] sm:$0xf] %vm1096_vm0, %v1358_v23  ;;  %v656_v26 = vadd.f32 %v1691_v3, %v655_v24  ;;  %v657_v27 = vpop.f32.mrb[5].mxu0  ;;  %v760_v28 = vadd.f32 %v1691_v3, %v759_v25  ;;  %v761_v29 = vpop.f32.mrb[5].mxu1 }
 0x123   : > { %v658_v30 = vpop.f32.mrb[6].mxu0  ;;  %v762_v31 = vpop.f32.mrb[6].mxu1 }
 0x124   : > { %v848_v32 = vmax.f32 %v656_v26, 0.0  ;;  %v659_v33 = vadd.f32 %v1691_v3, %v658_v30  ;;  %v660_v34 = vpop.f32.mrb[7].mxu0  ;;  %v874_v35 = vmax.f32 %v760_v28, 0.0  ;;  %v763_v36 = vadd.f32 %v1691_v3, %v762_v31  ;;  %v764_v37 = vpop.f32.mrb[7].mxu1 }
 0x126   : > { %v1333_v38 = vpack.c.bf16 %v848_v32, %v848_v32  ;;  %v849_v39 = vmax.f32 %v659_v33, 0.0  ;;  %v1359_v40 = vpack.c.bf16 %v874_v35, %v874_v35  ;;  %v875_v41 = vmax.f32 %v763_v36, 0.0 }
 0x128   : > { %1099 = vst.msk [vmem:[%s1701_s16 + $0x8] sm:$0xf] %vm1096_vm0, %v1333_v38  ;;  %v1334_v42 = vpack.c.bf16 %v849_v39, %v849_v39  ;;  %1125 = vst.msk [vmem:[%s1701_s16 + $0x70] sm:$0xf] %vm1096_vm0, %v1359_v40  ;;  %v1360_v43 = vpack.c.bf16 %v875_v41, %v875_v41 }
 0x129   : > { %v663_v44 = vpop.f32.mrb[8].mxu0  ;;  %v767_v45 = vpop.f32.mrb[8].mxu1 }
 0x12a   : > { %1100 = vst.msk [vmem:[%s1701_s16 + $0xc] sm:$0xf] %vm1096_vm0, %v1334_v42  ;;  %1126 = vst.msk [vmem:[%s1701_s16 + $0x74] sm:$0xf] %vm1096_vm0, %v1360_v43  ;;  %v664_v46 = vadd.f32 %v1691_v3, %v663_v44  ;;  %v665_v47 = vpop.f32.mrb[9].mxu0  ;;  %v768_v48 = vadd.f32 %v1691_v3, %v767_v45  ;;  %v769_v49 = vpop.f32.mrb[9].mxu1 }
 0x12b   : > { %v666_v50 = vpop.f32.mrb[10].mxu0  ;;  %v770_v51 = vpop.f32.mrb[10].mxu1 }
 0x12c   : > { %v850_v52 = vmax.f32 %v664_v46, 0.0  ;;  %v667_v53 = vadd.f32 %v1691_v3, %v666_v50  ;;  %v668_v54 = vpop.f32.mrb[11].mxu0  ;;  %v876_v55 = vmax.f32 %v768_v48, 0.0  ;;  %v771_v56 = vadd.f32 %v1691_v3, %v770_v51  ;;  %v772_v57 = vpop.f32.mrb[11].mxu1 }
 0x12e   : > { %v1335_v58 = vpack.c.bf16 %v850_v52, %v850_v52  ;;  %v851_v59 = vmax.f32 %v667_v53, 0.0  ;;  %v1361_v60 = vpack.c.bf16 %v876_v55, %v876_v55  ;;  %v877_v61 = vmax.f32 %v771_v56, 0.0 }
 0x130   : > { %1101 = vst.msk [vmem:[%s1701_s16 + $0x10] sm:$0xf] %vm1096_vm0, %v1335_v58  ;;  %v1336_v62 = vpack.c.bf16 %v851_v59, %v851_v59  ;;  %1127 = vst.msk [vmem:[%s1701_s16 + $0x78] sm:$0xf] %vm1096_vm0, %v1361_v60  ;;  %v1362_v63 = vpack.c.bf16 %v877_v61, %v877_v61 }
 0x131   : > { %v671_v0 = vpop.f32.mrb[12].mxu0  ;;  %v775_v1 = vpop.f32.mrb[12].mxu1 }
 0x132   : > { %1102 = vst.msk [vmem:[%s1701_s16 + $0x14] sm:$0xf] %vm1096_vm0, %v1336_v62  ;;  %1128 = vst.msk [vmem:[%s1701_s16 + $0x7c] sm:$0xf] %vm1096_vm0, %v1362_v63  ;;  %v672_v2 = vadd.f32 %v1691_v3, %v671_v0  ;;  %v673_v4 = vpop.f32.mrb[13].mxu0  ;;  %v776_v5 = vadd.f32 %v1691_v3, %v775_v1  ;;  %v777_v6 = vpop.f32.mrb[13].mxu1 }
 0x133   : > { %v674_v7 = vpop.f32.mrb[14].mxu0  ;;  %v778_v8 = vpop.f32.mrb[14].mxu1 }
 0x134   : > { %v852_v9 = vmax.f32 %v672_v2, 0.0  ;;  %v675_v10 = vadd.f32 %v1691_v3, %v674_v7  ;;  %v676_v11 = vpop.f32.mrb[15].mxu0  ;;  %v878_v12 = vmax.f32 %v776_v5, 0.0  ;;  %v779_v13 = vadd.f32 %v1691_v3, %v778_v8  ;;  %v780_v14 = vpop.f32.mrb[15].mxu1 }
 0x136   : > { %v1337_v15 = vpack.c.bf16 %v852_v9, %v852_v9  ;;  %v853_v16 = vmax.f32 %v675_v10, 0.0  ;;  %v1363_v17 = vpack.c.bf16 %v878_v12, %v878_v12  ;;  %v879_v18 = vmax.f32 %v779_v13, 0.0 }
 0x138   : > { %1103 = vst.msk [vmem:[%s1701_s16 + $0x18] sm:$0xf] %vm1096_vm0, %v1337_v15  ;;  %v1338_v19 = vpack.c.bf16 %v853_v16, %v853_v16  ;;  %1129 = vst.msk [vmem:[%s1701_s16 + $0x80] sm:$0xf] %vm1096_vm0, %v1363_v17  ;;  %v1364_v20 = vpack.c.bf16 %v879_v18, %v879_v18 }
 0x139   : > { %v679_v21 = vpop.f32.mrb[16].mxu0  ;;  %v783_v22 = vpop.f32.mrb[16].mxu1 }
 0x13a   : > { %1104 = vst.msk [vmem:[%s1701_s16 + $0x1c] sm:$0xf] %vm1096_vm0, %v1338_v19  ;;  %1130 = vst.msk [vmem:[%s1701_s16 + $0x84] sm:$0xf] %vm1096_vm0, %v1364_v20  ;;  %v680_v23 = vadd.f32 %v1691_v3, %v679_v21  ;;  %v681_v24 = vpop.f32.mrb[17].mxu0  ;;  %v784_v25 = vadd.f32 %v1691_v3, %v783_v22  ;;  %v785_v26 = vpop.f32.mrb[17].mxu1 }
 0x13b   : > { %v682_v27 = vpop.f32.mrb[18].mxu0  ;;  %v786_v28 = vpop.f32.mrb[18].mxu1 }
 0x13c   : > { %v854_v29 = vmax.f32 %v680_v23, 0.0  ;;  %v683_v30 = vadd.f32 %v1691_v3, %v682_v27  ;;  %v684_v31 = vpop.f32.mrb[19].mxu0  ;;  %v880_v32 = vmax.f32 %v784_v25, 0.0  ;;  %v787_v33 = vadd.f32 %v1691_v3, %v786_v28  ;;  %v788_v34 = vpop.f32.mrb[19].mxu1 }
 0x13e   : > { %v1339_v35 = vpack.c.bf16 %v854_v29, %v854_v29  ;;  %v855_v36 = vmax.f32 %v683_v30, 0.0  ;;  %v1365_v37 = vpack.c.bf16 %v880_v32, %v880_v32  ;;  %v881_v38 = vmax.f32 %v787_v33, 0.0 }
 0x140   : > { %1105 = vst.msk [vmem:[%s1701_s16 + $0x20] sm:$0xf] %vm1096_vm0, %v1339_v35  ;;  %v1340_v39 = vpack.c.bf16 %v855_v36, %v855_v36  ;;  %1131 = vst.msk [vmem:[%s1701_s16 + $0x88] sm:$0xf] %vm1096_vm0, %v1365_v37  ;;  %v1366_v40 = vpack.c.bf16 %v881_v38, %v881_v38 }
 0x141   : > { %v687_v41 = vpop.f32.mrb[20].mxu0  ;;  %v791_v42 = vpop.f32.mrb[20].mxu1 }
 0x142   : > { %1106 = vst.msk [vmem:[%s1701_s16 + $0x24] sm:$0xf] %vm1096_vm0, %v1340_v39  ;;  %1132 = vst.msk [vmem:[%s1701_s16 + $0x8c] sm:$0xf] %vm1096_vm0, %v1366_v40  ;;  %v688_v43 = vadd.f32 %v1691_v3, %v687_v41  ;;  %v689_v44 = vpop.f32.mrb[21].mxu0  ;;  %v792_v45 = vadd.f32 %v1691_v3, %v791_v42  ;;  %v793_v46 = vpop.f32.mrb[21].mxu1 }
 0x143   : > { %v690_v47 = vpop.f32.mrb[22].mxu0  ;;  %v794_v48 = vpop.f32.mrb[22].mxu1 }
 0x144   : > { %v856_v49 = vmax.f32 %v688_v43, 0.0  ;;  %v691_v50 = vadd.f32 %v1691_v3, %v690_v47  ;;  %v692_v51 = vpop.f32.mrb[23].mxu0  ;;  %v882_v52 = vmax.f32 %v792_v45, 0.0  ;;  %v795_v53 = vadd.f32 %v1691_v3, %v794_v48  ;;  %v796_v54 = vpop.f32.mrb[23].mxu1 }
 0x146   : > { %v1341_v55 = vpack.c.bf16 %v856_v49, %v856_v49  ;;  %v857_v56 = vmax.f32 %v691_v50, 0.0  ;;  %v1367_v57 = vpack.c.bf16 %v882_v52, %v882_v52  ;;  %v883_v58 = vmax.f32 %v795_v53, 0.0 }
 0x148   : > { %1107 = vst.msk [vmem:[%s1701_s16 + $0x28] sm:$0xf] %vm1096_vm0, %v1341_v55  ;;  %v1342_v59 = vpack.c.bf16 %v857_v56, %v857_v56  ;;  %1133 = vst.msk [vmem:[%s1701_s16 + $0x90] sm:$0xf] %vm1096_vm0, %v1367_v57  ;;  %v1368_v60 = vpack.c.bf16 %v883_v58, %v883_v58 }
 0x149   : > { %v695_v61 = vpop.f32.mrb[24].mxu0  ;;  %v799_v62 = vpop.f32.mrb[24].mxu1 }
 0x14a   : > { %1108 = vst.msk [vmem:[%s1701_s16 + $0x2c] sm:$0xf] %vm1096_vm0, %v1342_v59  ;;  %1134 = vst.msk [vmem:[%s1701_s16 + $0x94] sm:$0xf] %vm1096_vm0, %v1368_v60  ;;  %v696_v63 = vadd.f32 %v1691_v3, %v695_v61  ;;  %v697_v0 = vpop.f32.mrb[25].mxu0  ;;  %v800_v1 = vadd.f32 %v1691_v3, %v799_v62  ;;  %v801_v2 = vpop.f32.mrb[25].mxu1 }
 0x14b   : > { %v698_v4 = vpop.f32.mrb[26].mxu0  ;;  %v802_v5 = vpop.f32.mrb[26].mxu1 }
 0x14c   : > { %v858_v6 = vmax.f32 %v696_v63, 0.0  ;;  %v699_v7 = vadd.f32 %v1691_v3, %v698_v4  ;;  %v700_v8 = vpop.f32.mrb[27].mxu0  ;;  %v884_v9 = vmax.f32 %v800_v1, 0.0  ;;  %v803_v10 = vadd.f32 %v1691_v3, %v802_v5  ;;  %v804_v11 = vpop.f32.mrb[27].mxu1 }
 0x14e   : > { %v1343_v12 = vpack.c.bf16 %v858_v6, %v858_v6  ;;  %v859_v13 = vmax.f32 %v699_v7, 0.0  ;;  %v1369_v14 = vpack.c.bf16 %v884_v9, %v884_v9  ;;  %v885_v15 = vmax.f32 %v803_v10, 0.0 }
 0x150   : > { %1109 = vst.msk [vmem:[%s1701_s16 + $0x30] sm:$0xf] %vm1096_vm0, %v1343_v12  ;;  %v1344_v16 = vpack.c.bf16 %v859_v13, %v859_v13  ;;  %1135 = vst.msk [vmem:[%s1701_s16 + $0x98] sm:$0xf] %vm1096_vm0, %v1369_v14  ;;  %v1370_v17 = vpack.c.bf16 %v885_v15, %v885_v15 }
 0x151   : > { %v703_v18 = vpop.f32.mrb[28].mxu0  ;;  %v807_v19 = vpop.f32.mrb[28].mxu1 }
 0x152   : > { %1110 = vst.msk [vmem:[%s1701_s16 + $0x34] sm:$0xf] %vm1096_vm0, %v1344_v16  ;;  %1136 = vst.msk [vmem:[%s1701_s16 + $0x9c] sm:$0xf] %vm1096_vm0, %v1370_v17  ;;  %v704_v20 = vadd.f32 %v1691_v3, %v703_v18  ;;  %v705_v21 = vpop.f32.mrb[29].mxu0  ;;  %v808_v22 = vadd.f32 %v1691_v3, %v807_v19  ;;  %v809_v23 = vpop.f32.mrb[29].mxu1 }
 0x153   : > { %v706_v24 = vpop.f32.mrb[30].mxu0  ;;  %v810_v25 = vpop.f32.mrb[30].mxu1 }
 0x154   : > { %v860_v26 = vmax.f32 %v704_v20, 0.0  ;;  %v707_v27 = vadd.f32 %v1691_v3, %v706_v24  ;;  %v708_v28 = vpop.f32.mrb[31].mxu0  ;;  %v886_v29 = vmax.f32 %v808_v22, 0.0  ;;  %v811_v30 = vadd.f32 %v1691_v3, %v810_v25  ;;  %v812_v31 = vpop.f32.mrb[31].mxu1 }
 0x156   : > { %v1345_v32 = vpack.c.bf16 %v860_v26, %v860_v26  ;;  %v861_v33 = vmax.f32 %v707_v27, 0.0  ;;  %v1371_v34 = vpack.c.bf16 %v886_v29, %v886_v29  ;;  %v887_v35 = vmax.f32 %v811_v30, 0.0 }
 0x158   : > { %1111 = vst.msk [vmem:[%s1701_s16 + $0x38] sm:$0xf] %vm1096_vm0, %v1345_v32  ;;  %v1346_v36 = vpack.c.bf16 %v861_v33, %v861_v33  ;;  %1137 = vst.msk [vmem:[%s1701_s16 + $0xa0] sm:$0xf] %vm1096_vm0, %v1371_v34  ;;  %v1372_v37 = vpack.c.bf16 %v887_v35, %v887_v35 }
 0x159   : > { %v711_v38 = vpop.f32.mrb[32].mxu0  ;;  %v815_v39 = vpop.f32.mrb[32].mxu1 }
 0x15a   : > { %1112 = vst.msk [vmem:[%s1701_s16 + $0x3c] sm:$0xf] %vm1096_vm0, %v1346_v36  ;;  %1138 = vst.msk [vmem:[%s1701_s16 + $0xa4] sm:$0xf] %vm1096_vm0, %v1372_v37  ;;  %v712_v40 = vadd.f32 %v1691_v3, %v711_v38  ;;  %v713_v41 = vpop.f32.mrb[33].mxu0  ;;  %v816_v42 = vadd.f32 %v1691_v3, %v815_v39  ;;  %v817_v43 = vpop.f32.mrb[33].mxu1 }
 0x15b   : > { %v714_v44 = vpop.f32.mrb[34].mxu0  ;;  %v818_v45 = vpop.f32.mrb[34].mxu1 }
 0x15c   : > { %v862_v46 = vmax.f32 %v712_v40, 0.0  ;;  %v715_v47 = vadd.f32 %v1691_v3, %v714_v44  ;;  %v716_v48 = vpop.f32.mrb[35].mxu0  ;;  %v888_v49 = vmax.f32 %v816_v42, 0.0  ;;  %v819_v50 = vadd.f32 %v1691_v3, %v818_v45  ;;  %v820_v51 = vpop.f32.mrb[35].mxu1 }
 0x15e   : > { %v1347_v52 = vpack.c.bf16 %v862_v46, %v862_v46  ;;  %v863_v53 = vmax.f32 %v715_v47, 0.0  ;;  %v1373_v54 = vpack.c.bf16 %v888_v49, %v888_v49  ;;  %v889_v55 = vmax.f32 %v819_v50, 0.0 }
 0x160   : > { %1113 = vst.msk [vmem:[%s1701_s16 + $0x40] sm:$0xf] %vm1096_vm0, %v1347_v52  ;;  %v1348_v56 = vpack.c.bf16 %v863_v53, %v863_v53  ;;  %1139 = vst.msk [vmem:[%s1701_s16 + $0xa8] sm:$0xf] %vm1096_vm0, %v1373_v54  ;;  %v1374_v57 = vpack.c.bf16 %v889_v55, %v889_v55 }
 0x161   : > { %v719_v58 = vpop.f32.mrb[36].mxu0  ;;  %v823_v59 = vpop.f32.mrb[36].mxu1 }
 0x162   : > { %1114 = vst.msk [vmem:[%s1701_s16 + $0x44] sm:$0xf] %vm1096_vm0, %v1348_v56  ;;  %1140 = vst.msk [vmem:[%s1701_s16 + $0xac] sm:$0xf] %vm1096_vm0, %v1374_v57  ;;  %v720_v60 = vadd.f32 %v1691_v3, %v719_v58  ;;  %v721_v61 = vpop.f32.mrb[37].mxu0  ;;  %v824_v62 = vadd.f32 %v1691_v3, %v823_v59  ;;  %v825_v63 = vpop.f32.mrb[37].mxu1 }
 0x163   : > { %v722_v0 = vpop.f32.mrb[38].mxu0  ;;  %v826_v1 = vpop.f32.mrb[38].mxu1 }
 0x164   : > { %v864_v2 = vmax.f32 %v720_v60, 0.0  ;;  %v723_v4 = vadd.f32 %v1691_v3, %v722_v0  ;;  %v724_v5 = vpop.f32.mrb[39].mxu0  ;;  %v890_v6 = vmax.f32 %v824_v62, 0.0  ;;  %v827_v7 = vadd.f32 %v1691_v3, %v826_v1  ;;  %v828_v8 = vpop.f32.mrb[39].mxu1 }
 0x166   : > { %v1349_v9 = vpack.c.bf16 %v864_v2, %v864_v2  ;;  %v865_v10 = vmax.f32 %v723_v4, 0.0  ;;  %v1375_v11 = vpack.c.bf16 %v890_v6, %v890_v6  ;;  %v891_v12 = vmax.f32 %v827_v7, 0.0 }
 0x168   : > { %1115 = vst.msk [vmem:[%s1701_s16 + $0x48] sm:$0xf] %vm1096_vm0, %v1349_v9  ;;  %v1350_v13 = vpack.c.bf16 %v865_v10, %v865_v10  ;;  %1141 = vst.msk [vmem:[%s1701_s16 + $0xb0] sm:$0xf] %vm1096_vm0, %v1375_v11  ;;  %v1376_v14 = vpack.c.bf16 %v891_v12, %v891_v12 }
 0x169   : > { %v727_v15 = vpop.f32.mrb[40].mxu0  ;;  %v831_v16 = vpop.f32.mrb[40].mxu1 }
 0x16a   : > { %1116 = vst.msk [vmem:[%s1701_s16 + $0x4c] sm:$0xf] %vm1096_vm0, %v1350_v13  ;;  %1142 = vst.msk [vmem:[%s1701_s16 + $0xb4] sm:$0xf] %vm1096_vm0, %v1376_v14  ;;  %v728_v17 = vadd.f32 %v1691_v3, %v727_v15  ;;  %v729_v18 = vpop.f32.mrb[41].mxu0  ;;  %v832_v19 = vadd.f32 %v1691_v3, %v831_v16  ;;  %v833_v20 = vpop.f32.mrb[41].mxu1 }
 0x16b   : > { %v730_v21 = vpop.f32.mrb[42].mxu0  ;;  %v834_v22 = vpop.f32.mrb[42].mxu1 }
 0x16c   : > { %v866_v23 = vmax.f32 %v728_v17, 0.0  ;;  %v731_v24 = vadd.f32 %v1691_v3, %v730_v21  ;;  %v732_v25 = vpop.f32.mrb[43].mxu0  ;;  %v892_v26 = vmax.f32 %v832_v19, 0.0  ;;  %v835_v27 = vadd.f32 %v1691_v3, %v834_v22  ;;  %v836_v28 = vpop.f32.mrb[43].mxu1 }
 0x16e   : > { %v1351_v29 = vpack.c.bf16 %v866_v23, %v866_v23  ;;  %v867_v30 = vmax.f32 %v731_v24, 0.0  ;;  %v1377_v31 = vpack.c.bf16 %v892_v26, %v892_v26  ;;  %v893_v32 = vmax.f32 %v835_v27, 0.0 }
 0x170   : > { %1117 = vst.msk [vmem:[%s1701_s16 + $0x50] sm:$0xf] %vm1096_vm0, %v1351_v29  ;;  %v1352_v33 = vpack.c.bf16 %v867_v30, %v867_v30  ;;  %1143 = vst.msk [vmem:[%s1701_s16 + $0xb8] sm:$0xf] %vm1096_vm0, %v1377_v31  ;;  %v1378_v34 = vpack.c.bf16 %v893_v32, %v893_v32 }
 0x171   : > { %v735_v35 = vpop.f32.mrb[44].mxu0  ;;  %v839_v36 = vpop.f32.mrb[44].mxu1 }
 0x172   : > { %1118 = vst.msk [vmem:[%s1701_s16 + $0x54] sm:$0xf] %vm1096_vm0, %v1352_v33  ;;  %1144 = vst.msk [vmem:[%s1701_s16 + $0xbc] sm:$0xf] %vm1096_vm0, %v1378_v34  ;;  %v736_v37 = vadd.f32 %v1691_v3, %v735_v35  ;;  %v737_v38 = vpop.f32.mrb[45].mxu0  ;;  %v840_v39 = vadd.f32 %v1691_v3, %v839_v36  ;;  %v841_v40 = vpop.f32.mrb[45].mxu1 }
 0x173   : > { %v738_v41 = vpop.f32.mrb[46].mxu0  ;;  %v842_v42 = vpop.f32.mrb[46].mxu1 }
 0x174   : > { %v868_v43 = vmax.f32 %v736_v37, 0.0  ;;  %v739_v44 = vadd.f32 %v1691_v3, %v738_v41  ;;  %v740_v45 = vpop.f32.mrb[47].mxu0  ;;  %v894_v46 = vmax.f32 %v840_v39, 0.0  ;;  %v843_v47 = vadd.f32 %v1691_v3, %v842_v42  ;;  %v844_v48 = vpop.f32.mrb[47].mxu1 }
 0x176   : > { %v1353_v49 = vpack.c.bf16 %v868_v43, %v868_v43  ;;  %v869_v50 = vmax.f32 %v739_v44, 0.0  ;;  %v1379_v51 = vpack.c.bf16 %v894_v46, %v894_v46  ;;  %v895_v52 = vmax.f32 %v843_v47, 0.0 }
 0x178   : > { %1119 = vst.msk [vmem:[%s1701_s16 + $0x58] sm:$0xf] %vm1096_vm0, %v1353_v49  ;;  %v1354_v53 = vpack.c.bf16 %v869_v50, %v869_v50  ;;  %1145 = vst.msk [vmem:[%s1701_s16 + $0xc0] sm:$0xf] %vm1096_vm0, %v1379_v51  ;;  %v1380_v54 = vpack.c.bf16 %v895_v52, %v895_v52 }
 0x179   : > { %v743_v55 = vpop.f32.mrb[48].mxu0 }
 0x17a   : > { %1120 = vst.msk [vmem:[%s1701_s16 + $0x5c] sm:$0xf] %vm1096_vm0, %v1354_v53  ;;  %1146 = vst.msk [vmem:[%s1701_s16 + $0xc4] sm:$0xf] %vm1096_vm0, %v1380_v54  ;;  %v744_v56 = vadd.f32 %v1691_v3, %v743_v55  ;;  %v745_v57 = vpop.f32.mrb[49].mxu0 }
 0x17b   : > { %v746_v58 = vpop.f32.mrb[50].mxu0 }
 0x17c   : > { %v870_v59 = vmax.f32 %v744_v56, 0.0  ;;  %v747_v60 = vadd.f32 %v1691_v3, %v746_v58  ;;  %v748_v61 = vpop.f32.mrb[51].mxu0 }
 0x17e   : > { %v1355_v62 = vpack.c.bf16 %v870_v59, %v870_v59  ;;  %v871_v63 = vmax.f32 %v747_v60, 0.0 }
 0x180   : > { %1121 = vst.msk [vmem:[%s1701_s16 + $0x60] sm:$0xf] %vm1096_vm0, %v1355_v62  ;;  %v1356_v0 = vpack.c.bf16 %v871_v63, %v871_v63 }
 0x182   : > { %1122 = vst.msk [vmem:[%s1701_s16 + $0x64] sm:$0xf] %vm1096_vm0, %v1356_v0 }
 0x183 PF: > { %s13_s12 = sadd.s32 1, %s1519_s12  }
 0x184   : > { %p10_p4 = scmp.ge.s32.totalorder %s13_s12, 4  }
 0x186   :  { %12 = sbr.rel (!%p10_p4) target bundleno = 1 (0x1), region = 62 }

// kernel: _lambda_.6
= control target key start
LH: loop header
LB: loop body
LE: loop exit
PB: predicated region body
PF: predicated region fallthrough
CT: control target
= control target key end

     0   :  { %vm880_vm0 = vcmask 519168   ;;  %vm901_vm1 = vcmask 516096   ;;  %s1637_s1 = inlined_call_operand.vmem [shape: bf16[512,64], index: 1, kind: input, shape index: {}]   ;;  %s1638_s0 = inlined_call_operand.vmem [shape: bf16[162,512], index: 0, kind: input, shape index: {}]   ;;  %s1639_s2 = inlined_call_operand.vmem [shape: f32[1,64], index: 2, kind: input, shape index: {}]   ;;  %s1640_s3 = inlined_call_operand.vmem [shape: bf16[162,64], index: 3, kind: output, shape index: {}]  }
   0x1   :  { %v1190_v0 = vld [vmem:[%s1637_s1 + $0x40] sm:$0xff]   ;;  %v1194_v4 = vld [vmem:[%s1637_s1 + $0x48] sm:$0xff]   ;;  %v1198_v8 = vld [vmem:[%s1637_s1 + $0x50] sm:$0xff]  }
   0x2   :  { %v1191_v1 = vld [vmem:[%s1637_s1 + $0xc0] sm:$0xff]   ;;  %1026 = vmatprep.subr.bf16.mxu0 %v1190_v0  ;;  %v1195_v5 = vld [vmem:[%s1637_s1 + $0xc8] sm:$0xff]   ;;  %v1199_v9 = vld [vmem:[%s1637_s1 + $0xd0] sm:$0xff]  }
   0x3   :  { %v1192_v2 = vld [vmem:[%s1637_s1] sm:$0xff]   ;;  %1108 = vmatprep.subr.bf16.mxu1 %v1191_v1  ;;  %v1196_v6 = vld [vmem:[%s1637_s1 + $0x8] sm:$0xff]   ;;  %v1200_v10 = vld [vmem:[%s1637_s1 + $0x10] sm:$0xff]  }
   0x4   :  { %v1193_v3 = vld [vmem:[%s1637_s1 + $0x80] sm:$0xff]   ;;  %1027 = vmatpush3.bf16.msra.mxu0 %v1192_v2  ;;  %v1197_v7 = vld [vmem:[%s1637_s1 + $0x88] sm:$0xff]   ;;  %v1201_v11 = vld [vmem:[%s1637_s1 + $0x90] sm:$0xff]  }
   0x5   :  { %1109 = vmatpush3.bf16.msra.mxu1 %v1193_v3  ;;  %1028 = vmatprep.subr.bf16.mxu0 %v1194_v4  ;;  %v1202_v12 = vld [vmem:[%s1637_s1 + $0x58] sm:$0xff]   ;;  %v1206_v16 = vld [vmem:[%s1637_s1 + $0x60] sm:$0xff]   ;;  %v1210_v20 = vld [vmem:[%s1637_s1 + $0x68] sm:$0xff]  }
   0x6   :  { %1110 = vmatprep.subr.bf16.mxu1 %v1195_v5  ;;  %v1203_v13 = vld [vmem:[%s1637_s1 + $0xd8] sm:$0xff]   ;;  %v1207_v17 = vld [vmem:[%s1637_s1 + $0xe0] sm:$0xff]   ;;  %v1211_v21 = vld [vmem:[%s1637_s1 + $0xe8] sm:$0xff]  }
   0x7   :  { %v1204_v14 = vld [vmem:[%s1637_s1 + $0x18] sm:$0xff]   ;;  %v1208_v18 = vld [vmem:[%s1637_s1 + $0x20] sm:$0xff]   ;;  %v1212_v22 = vld [vmem:[%s1637_s1 + $0x28] sm:$0xff]  }
   0x8   :  { %1029 = vmatpush3.bf16.msra.mxu0 %v1196_v6  ;;  %v1205_v15 = vld [vmem:[%s1637_s1 + $0x98] sm:$0xff]   ;;  %v1209_v19 = vld [vmem:[%s1637_s1 + $0xa0] sm:$0xff]   ;;  %v1213_v23 = vld [vmem:[%s1637_s1 + $0xa8] sm:$0xff]  }
   0x9   :  { %1111 = vmatpush3.bf16.msra.mxu1 %v1197_v7  ;;  %1030 = vmatprep.subr.bf16.mxu0 %v1198_v8  ;;  %v1214_v24 = vld [vmem:[%s1637_s1 + $0x70] sm:$0xff]   ;;  %v1218_v28 = vld [vmem:[%s1637_s1 + $0x78] sm:$0xff]   ;;  %v55_v6 = vld [vmem:[%s1638_s0 + $0x140] sm:$0x11] }
   0xa   :  { %1112 = vmatprep.subr.bf16.mxu1 %v1199_v9  ;;  %v1215_v25 = vld [vmem:[%s1637_s1 + $0xf0] sm:$0xff]   ;;  %v1219_v29 = vld [vmem:[%s1637_s1 + $0xf8] sm:$0xff]   ;;  %v56_v7 = vld [vmem:[%s1638_s0 + $0x148] sm:$0x11] }
   0xb   :  { %v1216_v26 = vld [vmem:[%s1637_s1 + $0x30] sm:$0xff]   ;;  %v1220_v30 = vld [vmem:[%s1637_s1 + $0x38] sm:$0xff]  }
   0xc   :  { %1031 = vmatpush3.bf16.msra.mxu0 %v1200_v10  ;;  %v1217_v27 = vld [vmem:[%s1637_s1 + $0xb0] sm:$0xff]   ;;  %v1221_v31 = vld [vmem:[%s1637_s1 + $0xb8] sm:$0xff]   ;;  %v949_v10 = vcombine.high %v55_v6, %v55_v6 }
   0xd   :  { %1113 = vmatpush3.bf16.msra.mxu1 %v1201_v11  ;;  %1032 = vmatprep.subr.bf16.mxu0 %v1202_v12  ;;  %v1222_v32 = vld [vmem:[%s1638_s0] ss:$16 sps:$4 sm:$0xff]   ;;  %v1224_v33 = vld [vmem:[%s1638_s0 + $0x4] ss:$16 sps:$4 sm:$0xff]   ;;  %v1225_v34 = vld [vmem:[%s1638_s0 + $0x8] ss:$16 sps:$4 sm:$0xff]   ;;  %v951_v11 = vcombine.high %v56_v7, %v56_v7  ;;  %v948_v12 = vcombine.low %v55_v6, %v55_v6 }
   0xe   :  { %1114 = vmatprep.subr.bf16.mxu1 %v1203_v13  ;;  %v1227_v35 = vld [vmem:[%s1638_s0 + $0xc] ss:$16 sps:$4 sm:$0xff]   ;;  %566 = vmatprep.mubr.bf16.mxu0 %v1224_v33  ;;  %v1228_v36 = vld [vmem:[%s1638_s0 + $0x24] ss:$16 sps:$4 sm:$0xff]   ;;  %v1232_v38 = vld [vmem:[%s1638_s0 + $0x20] ss:$16 sps:$4 sm:$0xff]   ;;  %v950_v13 = vcombine.low %v56_v7, %v56_v7 }
   0xf   :  { %686 = vmatprep.mubr.bf16.mxu1 %v1227_v35  ;;  %v1230_v37 = vld [vmem:[%s1638_s0 + $0x2c] ss:$16 sps:$4 sm:$0xff]   ;;  %v1233_v39 = vld [vmem:[%s1638_s0 + $0x28] ss:$16 sps:$4 sm:$0xff]   ;;  %v1234_v40 = vld [vmem:[%s1638_s0 + $0x44] ss:$16 sps:$4 sm:$0xff]  }
  0x10   :  { %1033 = vmatpush3.bf16.msra.mxu0 %v1204_v14  ;;  %v1236_v41 = vld [vmem:[%s1638_s0 + $0x4c] ss:$16 sps:$4 sm:$0xff]   ;;  %v1238_v42 = vld [vmem:[%s1638_s0 + $0x40] ss:$16 sps:$4 sm:$0xff]   ;;  %v1239_v43 = vld [vmem:[%s1638_s0 + $0x48] ss:$16 sps:$4 sm:$0xff]  }
  0x11   :  { %1115 = vmatpush3.bf16.msra.mxu1 %v1205_v15  ;;  %1034 = vmatprep.subr.bf16.mxu0 %v1206_v16  ;;  %v1240_v44 = vld [vmem:[%s1638_s0 + $0x64] ss:$16 sps:$4 sm:$0xff]   ;;  %v1242_v45 = vld [vmem:[%s1638_s0 + $0x6c] ss:$16 sps:$4 sm:$0xff]   ;;  %v1244_v46 = vld [vmem:[%s1638_s0 + $0x60] ss:$16 sps:$4 sm:$0xff]  }
  0x12   :  { %1116 = vmatprep.subr.bf16.mxu1 %v1207_v17  ;;  %v1245_v47 = vld [vmem:[%s1638_s0 + $0x68] ss:$16 sps:$4 sm:$0xff]   ;;  %v1246_v48 = vld [vmem:[%s1638_s0 + $0x84] ss:$16 sps:$4 sm:$0xff]   ;;  %v1248_v49 = vld [vmem:[%s1638_s0 + $0x8c] ss:$16 sps:$4 sm:$0xff]  }
  0x13   :  { %v1250_v50 = vld [vmem:[%s1638_s0 + $0x80] ss:$16 sps:$4 sm:$0xff]   ;;  %v1251_v51 = vld [vmem:[%s1638_s0 + $0x88] ss:$16 sps:$4 sm:$0xff]   ;;  %v1252_v52 = vld [vmem:[%s1638_s0 + $0xa4] ss:$16 sps:$4 sm:$0xff]  }
  0x14   :  { %1035 = vmatpush3.bf16.msra.mxu0 %v1208_v18  ;;  %v1254_v53 = vld [vmem:[%s1638_s0 + $0xac] ss:$16 sps:$4 sm:$0xff]   ;;  %v1256_v54 = vld [vmem:[%s1638_s0 + $0xa0] ss:$16 sps:$4 sm:$0xff]   ;;  %v1257_v55 = vld [vmem:[%s1638_s0 + $0xa8] ss:$16 sps:$4 sm:$0xff]  }
  0x15   :  { %1117 = vmatpush3.bf16.msra.mxu1 %v1209_v19  ;;  %1036 = vmatprep.subr.bf16.mxu0 %v1210_v20  ;;  %v1258_v56 = vld [vmem:[%s1638_s0 + $0xc4] ss:$16 sps:$4 sm:$0xff]   ;;  %v1260_v57 = vld [vmem:[%s1638_s0 + $0xcc] ss:$16 sps:$4 sm:$0xff]   ;;  %v1262_v58 = vld [vmem:[%s1638_s0 + $0xc0] ss:$16 sps:$4 sm:$0xff]  }
  0x16   :  { %1118 = vmatprep.subr.bf16.mxu1 %v1211_v21  ;;  %v1263_v59 = vld [vmem:[%s1638_s0 + $0xc8] ss:$16 sps:$4 sm:$0xff]   ;;  %v1264_v60 = vld [vmem:[%s1638_s0 + $0xe4] ss:$16 sps:$4 sm:$0xff]   ;;  %v1266_v61 = vld [vmem:[%s1638_s0 + $0xec] ss:$16 sps:$4 sm:$0xff]  }
  0x17   :  { %v1268_v62 = vld [vmem:[%s1638_s0 + $0xe0] ss:$16 sps:$4 sm:$0xff]   ;;  %v1269_v63 = vld [vmem:[%s1638_s0 + $0xe8] ss:$16 sps:$4 sm:$0xff]   ;;  %v1270_v0 = vld [vmem:[%s1638_s0 + $0x104] ss:$16 sps:$4 sm:$0xff]  }
  0x18   :  { %1037 = vmatpush3.bf16.msra.mxu0 %v1212_v22  ;;  %v1272_v1 = vld [vmem:[%s1638_s0 + $0x10c] ss:$16 sps:$4 sm:$0xff]   ;;  %v1274_v2 = vld [vmem:[%s1638_s0 + $0x100] ss:$16 sps:$4 sm:$0xff]   ;;  %v1275_v3 = vld [vmem:[%s1638_s0 + $0x108] ss:$16 sps:$4 sm:$0xff]  }
  0x19   :  { %1119 = vmatpush3.bf16.msra.mxu1 %v1213_v23  ;;  %1038 = vmatprep.subr.bf16.mxu0 %v1214_v24  ;;  %v1276_v4 = vld [vmem:[%s1638_s0 + $0x124] ss:$16 sps:$4 sm:$0xff]   ;;  %v1278_v5 = vld [vmem:[%s1638_s0 + $0x12c] ss:$16 sps:$4 sm:$0xff]   ;;  %v1280_v8 = vld [vmem:[%s1638_s0 + $0x120] ss:$16 sps:$4 sm:$0xff]  }
  0x1a   :  { %1120 = vmatprep.subr.bf16.mxu1 %v1215_v25  ;;  %v1281_v9 = vld [vmem:[%s1638_s0 + $0x128] ss:$16 sps:$4 sm:$0xff]   ;;  %v1531_v16 = vld [vmem:[%s1639_s2] ss:$0 sm:$0xff] }
  0x1c   :  { %1039 = vmatpush3.bf16.msra.mxu0 %v1216_v26 }
  0x1d   :  { %1121 = vmatpush3.bf16.msra.mxu1 %v1217_v27  ;;  %1040 = vmatprep.subr.bf16.mxu0 %v1218_v28 }
  0x1e   :  { %1122 = vmatprep.subr.bf16.mxu1 %v1219_v29 }
  0x20   :  { %1041 = vmatpush3.bf16.msra.mxu0 %v1220_v30 }
  0x21   :  { %1123 = vmatpush3.bf16.msra.mxu1 %v1221_v31 }
  0x23   :  { %567 = vmatmul.mubr.bf16.vlgmr.msra.gmra.mrb[0].mxu0 %v1222_v32 }
  0x24   :  { %687 = vmatmul.mubr.bf16.vlgmr.msra.gmra.mrb[0].mxu1 %v1225_v34  ;;  %574 = vmatprep.mubr.bf16.mxu0 %v1228_v36 }
  0x25   :  { %694 = vmatprep.mubr.bf16.mxu1 %v1230_v37 }
  0x2b   :  { %575 = vmatmul.mubr.bf16.gmra.mrb[4].mxu0 %v1232_v38 }
  0x2c   :  { %695 = vmatmul.mubr.bf16.gmra.mrb[4].mxu1 %v1233_v39  ;;  %582 = vmatprep.mubr.bf16.mxu0 %v1234_v40 }
  0x2d   :  { %702 = vmatprep.mubr.bf16.mxu1 %v1236_v41 }
  0x33   :  { %583 = vmatmul.mubr.bf16.gmra.mrb[8].mxu0 %v1238_v42 }
  0x34   :  { %703 = vmatmul.mubr.bf16.gmra.mrb[8].mxu1 %v1239_v43  ;;  %590 = vmatprep.mubr.bf16.mxu0 %v1240_v44 }
  0x35   :  { %710 = vmatprep.mubr.bf16.mxu1 %v1242_v45 }
  0x3b   :  { %591 = vmatmul.mubr.bf16.gmra.mrb[12].mxu0 %v1244_v46 }
  0x3c   :  { %711 = vmatmul.mubr.bf16.gmra.mrb[12].mxu1 %v1245_v47  ;;  %598 = vmatprep.mubr.bf16.mxu0 %v1246_v48 }
  0x3d   :  { %718 = vmatprep.mubr.bf16.mxu1 %v1248_v49 }
  0x43   :  { %599 = vmatmul.mubr.bf16.gmra.mrb[16].mxu0 %v1250_v50 }
  0x44   :  { %719 = vmatmul.mubr.bf16.gmra.mrb[16].mxu1 %v1251_v51  ;;  %606 = vmatprep.mubr.bf16.mxu0 %v1252_v52 }
  0x45   :  { %726 = vmatprep.mubr.bf16.mxu1 %v1254_v53 }
  0x4b   :  { %607 = vmatmul.mubr.bf16.gmra.mrb[20].mxu0 %v1256_v54 }
  0x4c   :  { %727 = vmatmul.mubr.bf16.gmra.mrb[20].mxu1 %v1257_v55  ;;  %614 = vmatprep.mubr.bf16.mxu0 %v1258_v56 }
  0x4d   :  { %734 = vmatprep.mubr.bf16.mxu1 %v1260_v57 }
  0x53   :  { %615 = vmatmul.mubr.bf16.gmra.mrb[24].mxu0 %v1262_v58 }
  0x54   :  { %735 = vmatmul.mubr.bf16.gmra.mrb[24].mxu1 %v1263_v59  ;;  %622 = vmatprep.mubr.bf16.mxu0 %v1264_v60 }
  0x55   :  { %742 = vmatprep.mubr.bf16.mxu1 %v1266_v61 }
  0x5b   :  { %623 = vmatmul.mubr.bf16.gmra.mrb[28].mxu0 %v1268_v62 }
  0x5c   :  { %743 = vmatmul.mubr.bf16.gmra.mrb[28].mxu1 %v1269_v63  ;;  %630 = vmatprep.mubr.bf16.mxu0 %v1270_v0 }
  0x5d   :  { %750 = vmatprep.mubr.bf16.mxu1 %v1272_v1 }
  0x63   :  { %631 = vmatmul.mubr.bf16.gmra.mrb[32].mxu0 %v1274_v2 }
  0x64   :  { %751 = vmatmul.mubr.bf16.gmra.mrb[32].mxu1 %v1275_v3  ;;  %638 = vmatprep.mubr.bf16.mxu0 %v1276_v4 }
  0x65   :  { %758 = vmatprep.mubr.bf16.mxu1 %v1278_v5 }
  0x6b   :  { %639 = vmatmul.mubr.bf16.gmra.mrb[36].mxu0 %v1280_v8 }
  0x6c   :  { %759 = vmatmul.mubr.bf16.gmra.mrb[36].mxu1 %v1281_v9  ;;  %646 = vmatprep.mubr.bf16.mxu0 %v949_v10 }
  0x6d   :  { %766 = vmatprep.mubr.bf16.mxu1 %v951_v11 }
  0x73   :  { %647 = vmatmul.mubr.bf16.gmra.mrb[40].mxu0 %v948_v12 }
  0x74   :  { %767 = vmatmul.mubr.bf16.gmra.mrb[40].mxu1 %v950_v13 }
  0xf6   :  { %v1042_v14 = vpop.f32.mrb[0].mxu0 }
  0xf7   :  { %v1124_v15 = vpop.f32.mrb[0].mxu1  ;;  %v1043_v17 = vpop.f32.mrb[1].mxu0 }
  0xf8   :  { %v1044_v18 = vadd.f32 %v1043_v17, %v1042_v14  ;;  %v1125_v19 = vpop.f32.mrb[1].mxu1  ;;  %v1045_v20 = vpop.f32.mrb[2].mxu0 }
  0xf9   :  { %v1126_v21 = vadd.f32 %v1125_v19, %v1124_v15  ;;  %v1127_v22 = vpop.f32.mrb[2].mxu1  ;;  %v1046_v23 = vpop.f32.mrb[3].mxu0 }
  0xfa   :  { %v569_v24 = vadd.f32 %v1044_v18, %v1531_v16  ;;  %v1047_v25 = vadd.f32 %v1046_v23, %v1045_v20  ;;  %v1128_v26 = vpop.f32.mrb[3].mxu1 }
  0xfb   :  { %v1129_v27 = vadd.f32 %v1128_v26, %v1127_v22 }
  0xfc   :  { %v689_v28 = vadd.f32 %v1126_v21, %v569_v24  ;;  %v572_v29 = vadd.f32 %v1047_v25, %v1531_v16 }
  0xfe   :  { %v774_v30 = vmax.f32 %v689_v28, 0.0  ;;  %v692_v31 = vadd.f32 %v1129_v27, %v572_v29  ;;  %v1048_v32 = vpop.f32.mrb[4].mxu0 }
  0xff   :  { %v1130_v33 = vpop.f32.mrb[4].mxu1  ;;  %v1049_v34 = vpop.f32.mrb[5].mxu0 }
 0x100   :  { %v1005_v35 = vpack.c.bf16 %v774_v30, %v774_v30  ;;  %v775_v36 = vmax.f32 %v692_v31, 0.0  ;;  %v1050_v37 = vadd.f32 %v1049_v34, %v1048_v32  ;;  %v1131_v38 = vpop.f32.mrb[5].mxu1  ;;  %v1051_v39 = vpop.f32.mrb[6].mxu0 }
 0x101   :  { %v1132_v40 = vadd.f32 %v1131_v38, %v1130_v33  ;;  %v1133_v41 = vpop.f32.mrb[6].mxu1  ;;  %v1052_v42 = vpop.f32.mrb[7].mxu0 }
 0x102   :  { %881 = vst.msk [vmem:[%s1640_s3] sm:$0xf] %vm880_vm0, %v1005_v35  ;;  %v1006_v43 = vpack.c.bf16 %v775_v36, %v775_v36  ;;  %v577_v44 = vadd.f32 %v1050_v37, %v1531_v16  ;;  %v1053_v45 = vadd.f32 %v1052_v42, %v1051_v39  ;;  %v1134_v46 = vpop.f32.mrb[7].mxu1 }
 0x103   :  { %v1135_v47 = vadd.f32 %v1134_v46, %v1133_v41 }
 0x104   :  { %882 = vst.msk [vmem:[%s1640_s3 + $0x4] sm:$0xf] %vm880_vm0, %v1006_v43  ;;  %v697_v48 = vadd.f32 %v1132_v40, %v577_v44  ;;  %v580_v49 = vadd.f32 %v1053_v45, %v1531_v16 }
 0x106   :  { %v776_v50 = vmax.f32 %v697_v48, 0.0  ;;  %v700_v51 = vadd.f32 %v1135_v47, %v580_v49  ;;  %v1054_v52 = vpop.f32.mrb[8].mxu0 }
 0x107   :  { %v1136_v53 = vpop.f32.mrb[8].mxu1  ;;  %v1055_v54 = vpop.f32.mrb[9].mxu0 }
 0x108   :  { %v1007_v55 = vpack.c.bf16 %v776_v50, %v776_v50  ;;  %v777_v56 = vmax.f32 %v700_v51, 0.0  ;;  %v1056_v57 = vadd.f32 %v1055_v54, %v1054_v52  ;;  %v1137_v58 = vpop.f32.mrb[9].mxu1  ;;  %v1057_v59 = vpop.f32.mrb[10].mxu0 }
 0x109   :  { %v1138_v60 = vadd.f32 %v1137_v58, %v1136_v53  ;;  %v1139_v61 = vpop.f32.mrb[10].mxu1  ;;  %v1058_v62 = vpop.f32.mrb[11].mxu0 }
 0x10a   :  { %883 = vst.msk [vmem:[%s1640_s3 + $0x8] sm:$0xf] %vm880_vm0, %v1007_v55  ;;  %v1008_v63 = vpack.c.bf16 %v777_v56, %v777_v56  ;;  %v585_v0 = vadd.f32 %v1056_v57, %v1531_v16  ;;  %v1059_v1 = vadd.f32 %v1058_v62, %v1057_v59  ;;  %v1140_v2 = vpop.f32.mrb[11].mxu1 }
 0x10b   :  { %v1141_v3 = vadd.f32 %v1140_v2, %v1139_v61 }
 0x10c   :  { %884 = vst.msk [vmem:[%s1640_s3 + $0xc] sm:$0xf] %vm880_vm0, %v1008_v63  ;;  %v705_v4 = vadd.f32 %v1138_v60, %v585_v0  ;;  %v588_v5 = vadd.f32 %v1059_v1, %v1531_v16 }
 0x10e   :  { %v778_v6 = vmax.f32 %v705_v4, 0.0  ;;  %v708_v7 = vadd.f32 %v1141_v3, %v588_v5  ;;  %v1060_v8 = vpop.f32.mrb[12].mxu0 }
 0x10f   :  { %v1142_v9 = vpop.f32.mrb[12].mxu1  ;;  %v1061_v10 = vpop.f32.mrb[13].mxu0 }
 0x110   :  { %v1009_v11 = vpack.c.bf16 %v778_v6, %v778_v6  ;;  %v779_v12 = vmax.f32 %v708_v7, 0.0  ;;  %v1062_v13 = vadd.f32 %v1061_v10, %v1060_v8  ;;  %v1143_v14 = vpop.f32.mrb[13].mxu1  ;;  %v1063_v15 = vpop.f32.mrb[14].mxu0 }
 0x111   :  { %v1144_v17 = vadd.f32 %v1143_v14, %v1142_v9  ;;  %v1145_v18 = vpop.f32.mrb[14].mxu1  ;;  %v1064_v19 = vpop.f32.mrb[15].mxu0 }
 0x112   :  { %885 = vst.msk [vmem:[%s1640_s3 + $0x10] sm:$0xf] %vm880_vm0, %v1009_v11  ;;  %v1010_v20 = vpack.c.bf16 %v779_v12, %v779_v12  ;;  %v593_v21 = vadd.f32 %v1062_v13, %v1531_v16  ;;  %v1065_v22 = vadd.f32 %v1064_v19, %v1063_v15  ;;  %v1146_v23 = vpop.f32.mrb[15].mxu1 }
 0x113   :  { %v1147_v24 = vadd.f32 %v1146_v23, %v1145_v18 }
 0x114   :  { %886 = vst.msk [vmem:[%s1640_s3 + $0x14] sm:$0xf] %vm880_vm0, %v1010_v20  ;;  %v713_v25 = vadd.f32 %v1144_v17, %v593_v21  ;;  %v596_v26 = vadd.f32 %v1065_v22, %v1531_v16 }
 0x116   :  { %v780_v27 = vmax.f32 %v713_v25, 0.0  ;;  %v716_v28 = vadd.f32 %v1147_v24, %v596_v26  ;;  %v1066_v29 = vpop.f32.mrb[16].mxu0 }
 0x117   :  { %v1148_v30 = vpop.f32.mrb[16].mxu1  ;;  %v1067_v31 = vpop.f32.mrb[17].mxu0 }
 0x118   :  { %v1011_v32 = vpack.c.bf16 %v780_v27, %v780_v27  ;;  %v781_v33 = vmax.f32 %v716_v28, 0.0  ;;  %v1068_v34 = vadd.f32 %v1067_v31, %v1066_v29  ;;  %v1149_v35 = vpop.f32.mrb[17].mxu1  ;;  %v1069_v36 = vpop.f32.mrb[18].mxu0 }
 0x119   :  { %v1150_v37 = vadd.f32 %v1149_v35, %v1148_v30  ;;  %v1151_v38 = vpop.f32.mrb[18].mxu1  ;;  %v1070_v39 = vpop.f32.mrb[19].mxu0 }
 0x11a   :  { %887 = vst.msk [vmem:[%s1640_s3 + $0x18] sm:$0xf] %vm880_vm0, %v1011_v32  ;;  %v1012_v40 = vpack.c.bf16 %v781_v33, %v781_v33  ;;  %v601_v41 = vadd.f32 %v1068_v34, %v1531_v16  ;;  %v1071_v42 = vadd.f32 %v1070_v39, %v1069_v36  ;;  %v1152_v43 = vpop.f32.mrb[19].mxu1 }
 0x11b   :  { %v1153_v44 = vadd.f32 %v1152_v43, %v1151_v38 }
 0x11c   :  { %888 = vst.msk [vmem:[%s1640_s3 + $0x1c] sm:$0xf] %vm880_vm0, %v1012_v40  ;;  %v721_v45 = vadd.f32 %v1150_v37, %v601_v41  ;;  %v604_v46 = vadd.f32 %v1071_v42, %v1531_v16 }
 0x11e   :  { %v782_v47 = vmax.f32 %v721_v45, 0.0  ;;  %v724_v48 = vadd.f32 %v1153_v44, %v604_v46  ;;  %v1072_v49 = vpop.f32.mrb[20].mxu0 }
 0x11f   :  { %v1154_v50 = vpop.f32.mrb[20].mxu1  ;;  %v1073_v51 = vpop.f32.mrb[21].mxu0 }
 0x120   :  { %v1013_v52 = vpack.c.bf16 %v782_v47, %v782_v47  ;;  %v783_v53 = vmax.f32 %v724_v48, 0.0  ;;  %v1074_v54 = vadd.f32 %v1073_v51, %v1072_v49  ;;  %v1155_v55 = vpop.f32.mrb[21].mxu1  ;;  %v1075_v56 = vpop.f32.mrb[22].mxu0 }
 0x121   :  { %v1156_v57 = vadd.f32 %v1155_v55, %v1154_v50  ;;  %v1157_v58 = vpop.f32.mrb[22].mxu1  ;;  %v1076_v59 = vpop.f32.mrb[23].mxu0 }
 0x122   :  { %889 = vst.msk [vmem:[%s1640_s3 + $0x20] sm:$0xf] %vm880_vm0, %v1013_v52  ;;  %v1014_v60 = vpack.c.bf16 %v783_v53, %v783_v53  ;;  %v609_v61 = vadd.f32 %v1074_v54, %v1531_v16  ;;  %v1077_v62 = vadd.f32 %v1076_v59, %v1075_v56  ;;  %v1158_v63 = vpop.f32.mrb[23].mxu1 }
 0x123   :  { %v1159_v0 = vadd.f32 %v1158_v63, %v1157_v58 }
 0x124   :  { %890 = vst.msk [vmem:[%s1640_s3 + $0x24] sm:$0xf] %vm880_vm0, %v1014_v60  ;;  %v729_v1 = vadd.f32 %v1156_v57, %v609_v61  ;;  %v612_v2 = vadd.f32 %v1077_v62, %v1531_v16 }
 0x126   :  { %v784_v3 = vmax.f32 %v729_v1, 0.0  ;;  %v732_v4 = vadd.f32 %v1159_v0, %v612_v2  ;;  %v1078_v5 = vpop.f32.mrb[24].mxu0 }
 0x127   :  { %v1160_v6 = vpop.f32.mrb[24].mxu1  ;;  %v1079_v7 = vpop.f32.mrb[25].mxu0 }
 0x128   :  { %v1015_v8 = vpack.c.bf16 %v784_v3, %v784_v3  ;;  %v785_v9 = vmax.f32 %v732_v4, 0.0  ;;  %v1080_v10 = vadd.f32 %v1079_v7, %v1078_v5  ;;  %v1161_v11 = vpop.f32.mrb[25].mxu1  ;;  %v1081_v12 = vpop.f32.mrb[26].mxu0 }
 0x129   :  { %v1162_v13 = vadd.f32 %v1161_v11, %v1160_v6  ;;  %v1163_v14 = vpop.f32.mrb[26].mxu1  ;;  %v1082_v15 = vpop.f32.mrb[27].mxu0 }
 0x12a   :  { %891 = vst.msk [vmem:[%s1640_s3 + $0x28] sm:$0xf] %vm880_vm0, %v1015_v8  ;;  %v1016_v17 = vpack.c.bf16 %v785_v9, %v785_v9  ;;  %v617_v18 = vadd.f32 %v1080_v10, %v1531_v16  ;;  %v1083_v19 = vadd.f32 %v1082_v15, %v1081_v12  ;;  %v1164_v20 = vpop.f32.mrb[27].mxu1 }
 0x12b   :  { %v1165_v21 = vadd.f32 %v1164_v20, %v1163_v14 }
 0x12c   :  { %892 = vst.msk [vmem:[%s1640_s3 + $0x2c] sm:$0xf] %vm880_vm0, %v1016_v17  ;;  %v737_v22 = vadd.f32 %v1162_v13, %v617_v18  ;;  %v620_v23 = vadd.f32 %v1083_v19, %v1531_v16 }
 0x12e   :  { %v786_v24 = vmax.f32 %v737_v22, 0.0  ;;  %v740_v25 = vadd.f32 %v1165_v21, %v620_v23  ;;  %v1084_v26 = vpop.f32.mrb[28].mxu0 }
 0x12f   :  { %v1166_v27 = vpop.f32.mrb[28].mxu1  ;;  %v1085_v28 = vpop.f32.mrb[29].mxu0 }
 0x130   :  { %v1017_v29 = vpack.c.bf16 %v786_v24, %v786_v24  ;;  %v787_v30 = vmax.f32 %v740_v25, 0.0  ;;  %v1086_v31 = vadd.f32 %v1085_v28, %v1084_v26  ;;  %v1167_v32 = vpop.f32.mrb[29].mxu1  ;;  %v1087_v33 = vpop.f32.mrb[30].mxu0 }
 0x131   :  { %v1168_v34 = vadd.f32 %v1167_v32, %v1166_v27  ;;  %v1169_v35 = vpop.f32.mrb[30].mxu1  ;;  %v1088_v36 = vpop.f32.mrb[31].mxu0 }
 0x132   :  { %893 = vst.msk [vmem:[%s1640_s3 + $0x30] sm:$0xf] %vm880_vm0, %v1017_v29  ;;  %v1018_v37 = vpack.c.bf16 %v787_v30, %v787_v30  ;;  %v625_v38 = vadd.f32 %v1086_v31, %v1531_v16  ;;  %v1089_v39 = vadd.f32 %v1088_v36, %v1087_v33  ;;  %v1170_v40 = vpop.f32.mrb[31].mxu1 }
 0x133   :  { %v1171_v41 = vadd.f32 %v1170_v40, %v1169_v35 }
 0x134   :  { %894 = vst.msk [vmem:[%s1640_s3 + $0x34] sm:$0xf] %vm880_vm0, %v1018_v37  ;;  %v745_v42 = vadd.f32 %v1168_v34, %v625_v38  ;;  %v628_v43 = vadd.f32 %v1089_v39, %v1531_v16 }
 0x136   :  { %v788_v44 = vmax.f32 %v745_v42, 0.0  ;;  %v748_v45 = vadd.f32 %v1171_v41, %v628_v43  ;;  %v1090_v46 = vpop.f32.mrb[32].mxu0 }
 0x137   :  { %v1172_v47 = vpop.f32.mrb[32].mxu1  ;;  %v1091_v48 = vpop.f32.mrb[33].mxu0 }
 0x138   :  { %v1019_v49 = vpack.c.bf16 %v788_v44, %v788_v44  ;;  %v789_v50 = vmax.f32 %v748_v45, 0.0  ;;  %v1092_v51 = vadd.f32 %v1091_v48, %v1090_v46  ;;  %v1173_v52 = vpop.f32.mrb[33].mxu1  ;;  %v1093_v53 = vpop.f32.mrb[34].mxu0 }
 0x139   :  { %v1174_v54 = vadd.f32 %v1173_v52, %v1172_v47  ;;  %v1175_v55 = vpop.f32.mrb[34].mxu1  ;;  %v1094_v56 = vpop.f32.mrb[35].mxu0 }
 0x13a   :  { %895 = vst.msk [vmem:[%s1640_s3 + $0x38] sm:$0xf] %vm880_vm0, %v1019_v49  ;;  %v1020_v57 = vpack.c.bf16 %v789_v50, %v789_v50  ;;  %v633_v58 = vadd.f32 %v1092_v51, %v1531_v16  ;;  %v1095_v59 = vadd.f32 %v1094_v56, %v1093_v53  ;;  %v1176_v60 = vpop.f32.mrb[35].mxu1 }
 0x13b   :  { %v1177_v61 = vadd.f32 %v1176_v60, %v1175_v55 }
 0x13c   :  { %896 = vst.msk [vmem:[%s1640_s3 + $0x3c] sm:$0xf] %vm880_vm0, %v1020_v57  ;;  %v753_v62 = vadd.f32 %v1174_v54, %v633_v58  ;;  %v636_v63 = vadd.f32 %v1095_v59, %v1531_v16 }
 0x13e   :  { %v790_v0 = vmax.f32 %v753_v62, 0.0  ;;  %v756_v1 = vadd.f32 %v1177_v61, %v636_v63  ;;  %v1096_v2 = vpop.f32.mrb[36].mxu0 }
 0x13f   :  { %v1178_v3 = vpop.f32.mrb[36].mxu1  ;;  %v1097_v4 = vpop.f32.mrb[37].mxu0 }
 0x140   :  { %v1021_v5 = vpack.c.bf16 %v790_v0, %v790_v0  ;;  %v791_v6 = vmax.f32 %v756_v1, 0.0  ;;  %v1098_v7 = vadd.f32 %v1097_v4, %v1096_v2  ;;  %v1179_v8 = vpop.f32.mrb[37].mxu1  ;;  %v1099_v9 = vpop.f32.mrb[38].mxu0 }
 0x141   :  { %v1180_v10 = vadd.f32 %v1179_v8, %v1178_v3  ;;  %v1181_v11 = vpop.f32.mrb[38].mxu1  ;;  %v1100_v12 = vpop.f32.mrb[39].mxu0 }
 0x142   :  { %897 = vst.msk [vmem:[%s1640_s3 + $0x40] sm:$0xf] %vm880_vm0, %v1021_v5  ;;  %v1022_v13 = vpack.c.bf16 %v791_v6, %v791_v6  ;;  %v641_v14 = vadd.f32 %v1098_v7, %v1531_v16  ;;  %v1101_v15 = vadd.f32 %v1100_v12, %v1099_v9  ;;  %v1182_v17 = vpop.f32.mrb[39].mxu1 }
 0x143   :  { %v1183_v18 = vadd.f32 %v1182_v17, %v1181_v11 }
 0x144   :  { %898 = vst.msk [vmem:[%s1640_s3 + $0x44] sm:$0xf] %vm880_vm0, %v1022_v13  ;;  %v761_v19 = vadd.f32 %v1180_v10, %v641_v14  ;;  %v644_v20 = vadd.f32 %v1101_v15, %v1531_v16 }
 0x146   :  { %v792_v21 = vmax.f32 %v761_v19, 0.0  ;;  %v764_v22 = vadd.f32 %v1183_v18, %v644_v20  ;;  %v1102_v23 = vpop.f32.mrb[40].mxu0 }
 0x147   :  { %v1184_v24 = vpop.f32.mrb[40].mxu1  ;;  %v1103_v25 = vpop.f32.mrb[41].mxu0 }
 0x148   :  { %v1023_v26 = vpack.c.bf16 %v792_v21, %v792_v21  ;;  %v793_v27 = vmax.f32 %v764_v22, 0.0  ;;  %v1104_v28 = vadd.f32 %v1103_v25, %v1102_v23  ;;  %v1185_v29 = vpop.f32.mrb[41].mxu1  ;;  %v1105_v30 = vpop.f32.mrb[42].mxu0 }
 0x149   :  { %v1186_v31 = vadd.f32 %v1185_v29, %v1184_v24  ;;  %v1187_v32 = vpop.f32.mrb[42].mxu1  ;;  %v1106_v33 = vpop.f32.mrb[43].mxu0 }
 0x14a   :  { %899 = vst.msk [vmem:[%s1640_s3 + $0x48] sm:$0xf] %vm880_vm0, %v1023_v26  ;;  %v1024_v34 = vpack.c.bf16 %v793_v27, %v793_v27  ;;  %v649_v35 = vadd.f32 %v1104_v28, %v1531_v16  ;;  %v1188_v36 = vpop.f32.mrb[43].mxu1 }
 0x14c   :  { %900 = vst.msk [vmem:[%s1640_s3 + $0x4c] sm:$0xf] %vm880_vm0, %v1024_v34  ;;  %v769_v37 = vadd.f32 %v1186_v31, %v649_v35 }
 0x14e   :  { %v794_v38 = vmax.f32 %v769_v37, 0.0 }
 0x150   :  { %v1025_v39 = vpack.c.bf16 %v794_v38, %v794_v38 }
 0x152   :  { %902 = vst.msk [vmem:[%s1640_s3 + $0x50] sm:$0x1] %vm901_vm1, %v1025_v39 }

// kernel: _lambda_.7
= control target key start
LH: loop header
LB: loop body
LE: loop exit
PB: predicated region body
PF: predicated region fallthrough
CT: control target
= control target key end

     0   :  { %vm822_vm0 = vcmask 519168   ;;  %vm825_vm1 = vcmask 516096   ;;  %s1362_s1 = inlined_call_operand.vmem [shape: bf16[1024,64], index: 1, kind: input, shape index: {}]   ;;  %s1363_s0 = inlined_call_operand.vmem [shape: bf16[18,1024], index: 0, kind: input, shape index: {}]   ;;  %s1364_s2 = inlined_call_operand.vmem [shape: f32[1,64], index: 2, kind: input, shape index: {}]   ;;  %s1365_s3 = inlined_call_operand.vmem [shape: bf16[18,64], index: 3, kind: output, shape index: {}]  }
   0x1   :  { %v1030_v0 = vld [vmem:[%s1362_s1 + $0x40] sm:$0xff]   ;;  %v1034_v4 = vld [vmem:[%s1362_s1 + $0x48] sm:$0xff]   ;;  %v1038_v8 = vld [vmem:[%s1362_s1 + $0x50] sm:$0xff]  }
   0x2   :  { %v1031_v1 = vld [vmem:[%s1362_s1 + $0xc0] sm:$0xff]   ;;  %918 = vmatprep.subr.bf16.mxu0 %v1030_v0  ;;  %v1035_v5 = vld [vmem:[%s1362_s1 + $0xc8] sm:$0xff]   ;;  %v1039_v9 = vld [vmem:[%s1362_s1 + $0xd0] sm:$0xff]  }
   0x3   :  { %v1032_v2 = vld [vmem:[%s1362_s1] sm:$0xff]   ;;  %946 = vmatprep.subr.bf16.mxu1 %v1031_v1  ;;  %v1036_v6 = vld [vmem:[%s1362_s1 + $0x8] sm:$0xff]   ;;  %v1040_v10 = vld [vmem:[%s1362_s1 + $0x10] sm:$0xff]  }
   0x4   :  { %v1033_v3 = vld [vmem:[%s1362_s1 + $0x80] sm:$0xff]   ;;  %919 = vmatpush3.bf16.msra.mxu0 %v1032_v2  ;;  %v1037_v7 = vld [vmem:[%s1362_s1 + $0x88] sm:$0xff]   ;;  %v1041_v11 = vld [vmem:[%s1362_s1 + $0x90] sm:$0xff]  }
   0x5   :  { %947 = vmatpush3.bf16.msra.mxu1 %v1033_v3  ;;  %920 = vmatprep.subr.bf16.mxu0 %v1034_v4  ;;  %v1042_v12 = vld [vmem:[%s1362_s1 + $0x58] sm:$0xff]   ;;  %v1046_v16 = vld [vmem:[%s1362_s1 + $0x60] sm:$0xff]   ;;  %v1050_v20 = vld [vmem:[%s1362_s1 + $0x68] sm:$0xff]  }
   0x6   :  { %948 = vmatprep.subr.bf16.mxu1 %v1035_v5  ;;  %v1043_v13 = vld [vmem:[%s1362_s1 + $0xd8] sm:$0xff]   ;;  %v1047_v17 = vld [vmem:[%s1362_s1 + $0xe0] sm:$0xff]   ;;  %v1051_v21 = vld [vmem:[%s1362_s1 + $0xe8] sm:$0xff]  }
   0x7   :  { %v1044_v14 = vld [vmem:[%s1362_s1 + $0x18] sm:$0xff]   ;;  %v1048_v18 = vld [vmem:[%s1362_s1 + $0x20] sm:$0xff]   ;;  %v1052_v22 = vld [vmem:[%s1362_s1 + $0x28] sm:$0xff]  }
   0x8   :  { %921 = vmatpush3.bf16.msra.mxu0 %v1036_v6  ;;  %v1045_v15 = vld [vmem:[%s1362_s1 + $0x98] sm:$0xff]   ;;  %v1049_v19 = vld [vmem:[%s1362_s1 + $0xa0] sm:$0xff]   ;;  %v1053_v23 = vld [vmem:[%s1362_s1 + $0xa8] sm:$0xff]  }
   0x9   :  { %949 = vmatpush3.bf16.msra.mxu1 %v1037_v7  ;;  %922 = vmatprep.subr.bf16.mxu0 %v1038_v8  ;;  %v1054_v24 = vld [vmem:[%s1362_s1 + $0x70] sm:$0xff]   ;;  %v1058_v28 = vld [vmem:[%s1362_s1 + $0x78] sm:$0xff]   ;;  %v15_v32 = vld [vmem:[%s1363_s0] sm:$0xff] }
   0xa   :  { %950 = vmatprep.subr.bf16.mxu1 %v1039_v9  ;;  %v1055_v25 = vld [vmem:[%s1362_s1 + $0xf0] sm:$0xff]   ;;  %v1059_v29 = vld [vmem:[%s1362_s1 + $0xf8] sm:$0xff]   ;;  %v19_v33 = vld [vmem:[%s1363_s0 + $0x20] sm:$0xff] }
   0xb   :  { %v1056_v26 = vld [vmem:[%s1362_s1 + $0x30] sm:$0xff]   ;;  %v1060_v30 = vld [vmem:[%s1362_s1 + $0x38] sm:$0xff]   ;;  %v16_v34 = vld [vmem:[%s1363_s0 + $0x8] sm:$0xff]  ;;  %v832_v35 = vcombine.low %v15_v32, %v19_v33  ;;  %v833_v36 = vcombine.high %v15_v32, %v19_v33 }
   0xc   :  { %923 = vmatpush3.bf16.msra.mxu0 %v1040_v10  ;;  %v1057_v27 = vld [vmem:[%s1362_s1 + $0xb0] sm:$0xff]   ;;  %v1061_v31 = vld [vmem:[%s1362_s1 + $0xb8] sm:$0xff]   ;;  %v20_v37 = vld [vmem:[%s1363_s0 + $0x28] sm:$0xff] }
   0xd   :  { %951 = vmatpush3.bf16.msra.mxu1 %v1041_v11  ;;  %924 = vmatprep.subr.bf16.mxu0 %v1042_v12  ;;  %v834_v38 = vcombine.low %v16_v34, %v20_v37  ;;  %v835_v39 = vcombine.high %v16_v34, %v20_v37  ;;  %v1062_v40 = vld [vmem:[%s1362_s1 + $0x140] sm:$0xff]   ;;  %v1066_v44 = vld [vmem:[%s1362_s1 + $0x148] sm:$0xff]   ;;  %v1070_v48 = vld [vmem:[%s1362_s1 + $0x150] sm:$0xff]  }
   0xe   :  { %952 = vmatprep.subr.bf16.mxu1 %v1043_v13  ;;  %646 = vmatprep.mubr.bf16.mxu0 %v833_v36  ;;  %v1063_v41 = vld [vmem:[%s1362_s1 + $0x1c0] sm:$0xff]   ;;  %v1067_v45 = vld [vmem:[%s1362_s1 + $0x1c8] sm:$0xff]   ;;  %v1071_v49 = vld [vmem:[%s1362_s1 + $0x1d0] sm:$0xff]  }
   0xf   :  { %694 = vmatprep.mubr.bf16.mxu1 %v835_v39  ;;  %v1064_v42 = vld [vmem:[%s1362_s1 + $0x100] sm:$0xff]   ;;  %v1068_v46 = vld [vmem:[%s1362_s1 + $0x108] sm:$0xff]   ;;  %v1072_v50 = vld [vmem:[%s1362_s1 + $0x110] sm:$0xff]  }
  0x10   :  { %925 = vmatpush3.bf16.msra.mxu0 %v1044_v14  ;;  %v1065_v43 = vld [vmem:[%s1362_s1 + $0x180] sm:$0xff]   ;;  %v1069_v47 = vld [vmem:[%s1362_s1 + $0x188] sm:$0xff]   ;;  %v1073_v51 = vld [vmem:[%s1362_s1 + $0x190] sm:$0xff]  }
  0x11   :  { %953 = vmatpush3.bf16.msra.mxu1 %v1045_v15  ;;  %926 = vmatprep.subr.bf16.mxu0 %v1046_v16  ;;  %v1074_v52 = vld [vmem:[%s1362_s1 + $0x158] sm:$0xff]   ;;  %v1078_v56 = vld [vmem:[%s1362_s1 + $0x160] sm:$0xff]   ;;  %v1083_v62 = vld [vmem:[%s1362_s1 + $0x168] sm:$0xff]  }
  0x12   :  { %954 = vmatprep.subr.bf16.mxu1 %v1047_v17  ;;  %v1075_v53 = vld [vmem:[%s1362_s1 + $0x1d8] sm:$0xff]   ;;  %v1079_v57 = vld [vmem:[%s1362_s1 + $0x1e0] sm:$0xff]   ;;  %v1084_v0 = vld [vmem:[%s1362_s1 + $0x1e8] sm:$0xff]  }
  0x13   :  { %v1076_v54 = vld [vmem:[%s1362_s1 + $0x118] sm:$0xff]   ;;  %v1080_v58 = vld [vmem:[%s1362_s1 + $0x120] sm:$0xff]   ;;  %v1086_v1 = vld [vmem:[%s1362_s1 + $0x128] sm:$0xff]  }
  0x14   :  { %927 = vmatpush3.bf16.msra.mxu0 %v1048_v18  ;;  %v1077_v55 = vld [vmem:[%s1362_s1 + $0x198] sm:$0xff]   ;;  %v1081_v59 = vld [vmem:[%s1362_s1 + $0x1a0] sm:$0xff]   ;;  %v1087_v2 = vld [vmem:[%s1362_s1 + $0x1a8] sm:$0xff]  }
  0x15   :  { %955 = vmatpush3.bf16.msra.mxu1 %v1049_v19  ;;  %928 = vmatprep.subr.bf16.mxu0 %v1050_v20  ;;  %v23_v60 = vld [vmem:[%s1363_s0 + $0x40] sm:$0x11]  ;;  %v24_v3 = vld [vmem:[%s1363_s0 + $0x48] sm:$0x11]  ;;  %v1090_v6 = vld [vmem:[%s1362_s1 + $0x170] sm:$0xff]  }
  0x16   :  { %956 = vmatprep.subr.bf16.mxu1 %v1051_v21  ;;  %v841_v61 = vcombine.high %v23_v60, %v23_v60  ;;  %v840_v63 = vcombine.low %v23_v60, %v23_v60  ;;  %v843_v4 = vcombine.high %v24_v3, %v24_v3  ;;  %v842_v5 = vcombine.low %v24_v3, %v24_v3  ;;  %v1091_v7 = vld [vmem:[%s1362_s1 + $0x1f0] sm:$0xff]   ;;  %v1094_v10 = vld [vmem:[%s1362_s1 + $0x178] sm:$0xff]  }
  0x17   :  { %v1092_v8 = vld [vmem:[%s1362_s1 + $0x130] sm:$0xff]   ;;  %v1095_v11 = vld [vmem:[%s1362_s1 + $0x1f8] sm:$0xff]  }
  0x18   :  { %929 = vmatpush3.bf16.msra.mxu0 %v1052_v22  ;;  %v1093_v9 = vld [vmem:[%s1362_s1 + $0x1b0] sm:$0xff]   ;;  %v1096_v12 = vld [vmem:[%s1362_s1 + $0x138] sm:$0xff]  }
  0x19   :  { %957 = vmatpush3.bf16.msra.mxu1 %v1053_v23  ;;  %930 = vmatprep.subr.bf16.mxu0 %v1054_v24  ;;  %v1097_v13 = vld [vmem:[%s1362_s1 + $0x1b8] sm:$0xff]   ;;  %v17_v14 = vld [vmem:[%s1363_s0 + $0x10] sm:$0xff] }
  0x1a   :  { %958 = vmatprep.subr.bf16.mxu1 %v1055_v25  ;;  %v21_v15 = vld [vmem:[%s1363_s0 + $0x30] sm:$0xff]  ;;  %v18_v16 = vld [vmem:[%s1363_s0 + $0x18] sm:$0xff] }
  0x1b   :  { %v836_v17 = vcombine.low %v17_v14, %v21_v15  ;;  %v837_v18 = vcombine.high %v17_v14, %v21_v15  ;;  %v22_v19 = vld [vmem:[%s1363_s0 + $0x38] sm:$0xff]  ;;  %v25_v20 = vld [vmem:[%s1363_s0 + $0x50] sm:$0x11] }
  0x1c   :  { %931 = vmatpush3.bf16.msra.mxu0 %v1056_v26  ;;  %v26_v21 = vld [vmem:[%s1363_s0 + $0x58] sm:$0x11]  ;;  %v838_v22 = vcombine.low %v18_v16, %v22_v19  ;;  %v839_v23 = vcombine.high %v18_v16, %v22_v19  ;;  %v845_v24 = vcombine.high %v25_v20, %v25_v20  ;;  %v844_v26 = vcombine.low %v25_v20, %v25_v20 }
  0x1d   :  { %959 = vmatpush3.bf16.msra.mxu1 %v1057_v27  ;;  %932 = vmatprep.subr.bf16.mxu0 %v1058_v28  ;;  %v847_v25 = vcombine.high %v26_v21, %v26_v21  ;;  %v846_v27 = vcombine.low %v26_v21, %v26_v21 }
  0x1e   :  { %960 = vmatprep.subr.bf16.mxu1 %v1059_v29 }
  0x20   :  { %933 = vmatpush3.bf16.msra.mxu0 %v1060_v30  ;;  %v831_v30 = vld [vmem:[%s1364_s2] ss:$0 sm:$0xff] }
  0x21   :  { %961 = vmatpush3.bf16.msra.mxu1 %v1061_v31  ;;  %974 = vmatprep.subr.bf16.mxu0 %v1062_v40 }
  0x22   :  { %1002 = vmatprep.subr.bf16.mxu1 %v1063_v41 }
  0x23   :  { %647 = vmatmul.mubr.bf16.vlgmr.msra.gmra.mrb[0].mxu0 %v832_v35 }
  0x24   :  { %695 = vmatmul.mubr.bf16.vlgmr.msra.gmra.mrb[0].mxu1 %v834_v38  ;;  %975 = vmatpush3.bf16.msra.mxu0 %v1064_v42 }
  0x25   :  { %1003 = vmatpush3.bf16.msra.mxu1 %v1065_v43  ;;  %976 = vmatprep.subr.bf16.mxu0 %v1066_v44 }
  0x26   :  { %1004 = vmatprep.subr.bf16.mxu1 %v1067_v45  ;;  %654 = vmatprep.mubr.bf16.mxu0 %v841_v61 }
  0x27   :  { %702 = vmatprep.mubr.bf16.mxu1 %v843_v4 }
  0x28   :  { %977 = vmatpush3.bf16.msra.mxu0 %v1068_v46 }
  0x29   :  { %1005 = vmatpush3.bf16.msra.mxu1 %v1069_v47  ;;  %978 = vmatprep.subr.bf16.mxu0 %v1070_v48 }
  0x2a   :  { %1006 = vmatprep.subr.bf16.mxu1 %v1071_v49 }
  0x2b   :  { %655 = vmatmul.mubr.bf16.gmra.mrb[4].mxu0 %v840_v63 }
  0x2c   :  { %979 = vmatpush3.bf16.msra.mxu0 %v1072_v50  ;;  %703 = vmatmul.mubr.bf16.gmra.mrb[4].mxu1 %v842_v5 }
  0x2d   :  { %1007 = vmatpush3.bf16.msra.mxu1 %v1073_v51  ;;  %980 = vmatprep.subr.bf16.mxu0 %v1074_v52 }
  0x2e   :  { %1008 = vmatprep.subr.bf16.mxu1 %v1075_v53  ;;  %742 = vmatprep.mubr.bf16.mxu0 %v837_v18 }
  0x2f   :  { %790 = vmatprep.mubr.bf16.mxu1 %v839_v23 }
  0x30   :  { %981 = vmatpush3.bf16.msra.mxu0 %v1076_v54 }
  0x31   :  { %1009 = vmatpush3.bf16.msra.mxu1 %v1077_v55  ;;  %982 = vmatprep.subr.bf16.mxu0 %v1078_v56 }
  0x32   :  { %1010 = vmatprep.subr.bf16.mxu1 %v1079_v57 }
  0x34   :  { %983 = vmatpush3.bf16.msra.mxu0 %v1080_v58 }
  0x35   :  { %1011 = vmatpush3.bf16.msra.mxu1 %v1081_v59  ;;  %984 = vmatprep.subr.bf16.mxu0 %v1083_v62 }
  0x36   :  { %1012 = vmatprep.subr.bf16.mxu1 %v1084_v0 }
  0x38   :  { %985 = vmatpush3.bf16.msra.mxu0 %v1086_v1 }
  0x39   :  { %1013 = vmatpush3.bf16.msra.mxu1 %v1087_v2  ;;  %986 = vmatprep.subr.bf16.mxu0 %v1090_v6 }
  0x3a   :  { %1014 = vmatprep.subr.bf16.mxu1 %v1091_v7 }
  0x3c   :  { %987 = vmatpush3.bf16.msra.mxu0 %v1092_v8 }
  0x3d   :  { %1015 = vmatpush3.bf16.msra.mxu1 %v1093_v9  ;;  %988 = vmatprep.subr.bf16.mxu0 %v1094_v10 }
  0x3e   :  { %1016 = vmatprep.subr.bf16.mxu1 %v1095_v11 }
  0x40   :  { %989 = vmatpush3.bf16.msra.mxu0 %v1096_v12 }
  0x41   :  { %1017 = vmatpush3.bf16.msra.mxu1 %v1097_v13 }
  0x43   :  { %743 = vmatmul.mubr.bf16.vlgmr.msra.gmra.mrb[8].mxu0 %v836_v17 }
  0x44   :  { %791 = vmatmul.mubr.bf16.vlgmr.msra.gmra.mrb[8].mxu1 %v838_v22  ;;  %750 = vmatprep.mubr.bf16.mxu0 %v845_v24 }
  0x45   :  { %798 = vmatprep.mubr.bf16.mxu1 %v847_v25 }
  0x4b   :  { %751 = vmatmul.mubr.bf16.gmra.mrb[12].mxu0 %v844_v26 }
  0x4c   :  { %799 = vmatmul.mubr.bf16.gmra.mrb[12].mxu1 %v846_v27 }
  0xf6   :  { %v934_v28 = vpop.f32.mrb[0].mxu0 }
  0xf7   :  { %v962_v29 = vpop.f32.mrb[0].mxu1  ;;  %v935_v31 = vpop.f32.mrb[1].mxu0 }
  0xf8   :  { %v936_v32 = vadd.f32 %v935_v31, %v934_v28  ;;  %v963_v33 = vpop.f32.mrb[1].mxu1  ;;  %v937_v34 = vpop.f32.mrb[2].mxu0 }
  0xf9   :  { %v964_v35 = vadd.f32 %v963_v33, %v962_v29  ;;  %v965_v36 = vpop.f32.mrb[2].mxu1  ;;  %v938_v37 = vpop.f32.mrb[3].mxu0 }
  0xfa   :  { %v649_v38 = vadd.f32 %v936_v32, %v831_v30  ;;  %v939_v39 = vadd.f32 %v938_v37, %v937_v34  ;;  %v966_v40 = vpop.f32.mrb[3].mxu1 }
  0xfb   :  { %v967_v41 = vadd.f32 %v966_v40, %v965_v36 }
  0xfc   :  { %v697_v42 = vadd.f32 %v964_v35, %v649_v38  ;;  %v652_v43 = vadd.f32 %v939_v39, %v831_v30 }
  0xfe   :  { %v700_v44 = vadd.f32 %v967_v41, %v652_v43  ;;  %v940_v45 = vpop.f32.mrb[4].mxu0 }
  0xff   :  { %v941_v46 = vpop.f32.mrb[5].mxu0  ;;  %v968_v51 = vpop.f32.mrb[4].mxu1 }
 0x100   :  { %v942_v47 = vadd.f32 %v941_v46, %v940_v45  ;;  %v943_v48 = vpop.f32.mrb[6].mxu0  ;;  %v969_v52 = vpop.f32.mrb[5].mxu1 }
 0x101   :  { %v944_v49 = vpop.f32.mrb[7].mxu0  ;;  %v970_v53 = vadd.f32 %v969_v52, %v968_v51  ;;  %v971_v54 = vpop.f32.mrb[6].mxu1 }
 0x102   :  { %v657_v50 = vadd.f32 %v942_v47, %v831_v30  ;;  %v972_v55 = vpop.f32.mrb[7].mxu1 }
 0x104   :  { %v705_v56 = vadd.f32 %v970_v53, %v657_v50 }
 0x116   :  { %v990_v57 = vpop.f32.mrb[8].mxu0 }
 0x117   :  { %v1018_v58 = vpop.f32.mrb[8].mxu1  ;;  %v991_v59 = vpop.f32.mrb[9].mxu0 }
 0x118   :  { %v992_v60 = vadd.f32 %v991_v59, %v990_v57  ;;  %v1019_v61 = vpop.f32.mrb[9].mxu1  ;;  %v993_v62 = vpop.f32.mrb[10].mxu0 }
 0x119   :  { %v1020_v63 = vadd.f32 %v1019_v61, %v1018_v58  ;;  %v1021_v0 = vpop.f32.mrb[10].mxu1  ;;  %v994_v1 = vpop.f32.mrb[11].mxu0 }
 0x11a   :  { %v745_v2 = vadd.f32 %v992_v60, %v697_v42  ;;  %v995_v3 = vadd.f32 %v994_v1, %v993_v62  ;;  %v1022_v4 = vpop.f32.mrb[11].mxu1 }
 0x11b   :  { %v1023_v5 = vadd.f32 %v1022_v4, %v1021_v0 }
 0x11c   :  { %v793_v6 = vadd.f32 %v1020_v63, %v745_v2  ;;  %v748_v7 = vadd.f32 %v995_v3, %v700_v44 }
 0x11e   :  { %v806_v8 = vmax.f32 %v793_v6, 0.0  ;;  %v796_v9 = vadd.f32 %v1023_v5, %v748_v7  ;;  %v996_v10 = vpop.f32.mrb[12].mxu0 }
 0x11f   :  { %v1024_v11 = vpop.f32.mrb[12].mxu1  ;;  %v997_v12 = vpop.f32.mrb[13].mxu0 }
 0x120   :  { %v915_v13 = vpack.c.bf16 %v806_v8, %v806_v8  ;;  %v807_v14 = vmax.f32 %v796_v9, 0.0  ;;  %v998_v15 = vadd.f32 %v997_v12, %v996_v10  ;;  %v1025_v16 = vpop.f32.mrb[13].mxu1  ;;  %v999_v17 = vpop.f32.mrb[14].mxu0 }
 0x121   :  { %v1026_v18 = vadd.f32 %v1025_v16, %v1024_v11  ;;  %v1027_v19 = vpop.f32.mrb[14].mxu1  ;;  %v1000_v20 = vpop.f32.mrb[15].mxu0 }
 0x122   :  { %823 = vst.msk [vmem:[%s1365_s3] sm:$0xf] %vm822_vm0, %v915_v13  ;;  %v916_v21 = vpack.c.bf16 %v807_v14, %v807_v14  ;;  %v753_v22 = vadd.f32 %v998_v15, %v705_v56  ;;  %v1028_v23 = vpop.f32.mrb[15].mxu1 }
 0x124   :  { %824 = vst.msk [vmem:[%s1365_s3 + $0x4] sm:$0xf] %vm822_vm0, %v916_v21  ;;  %v801_v24 = vadd.f32 %v1026_v18, %v753_v22 }
 0x126   :  { %v808_v25 = vmax.f32 %v801_v24, 0.0 }
 0x128   :  { %v917_v26 = vpack.c.bf16 %v808_v25, %v808_v25 }
 0x12a   :  { %826 = vst.msk [vmem:[%s1365_s3 + $0x8] sm:$0x1] %vm825_vm1, %v917_v26 }

// kernel: _lambda_.8
= control target key start
LH: loop header
LB: loop body
LE: loop exit
PB: predicated region body
PF: predicated region fallthrough
CT: control target
= control target key end

     0   :  { %v626_v21 = vmov 1966171168   ;;  %v100_v23 = vlaneseq  ;;  %v627_v40 = vmov 0.0   ;;  %vm628_vm0 = vmmov 0   ;;  %s766_s1 = inlined_call_operand.vmem [shape: bf16[576,64], index: 1, kind: input, shape index: {}]   ;;  %s767_s0 = inlined_call_operand.vmem [shape: bf16[2,576], index: 0, kind: input, shape index: {}]   ;;  %s768_s2 = inlined_call_operand.vmem [shape: f32[1,64], index: 2, kind: input, shape index: {}]   ;;  %s769_s3 = inlined_call_operand.vmem [shape: bf16[2,64], index: 3, kind: output, shape index: {}]  }
   0x1   :  { %v589_v0 = vld [vmem:[%s766_s1 + $0x40] sm:$0xff]   ;;  %v593_v4 = vld [vmem:[%s766_s1 + $0x48] sm:$0xff]   ;;  %v597_v8 = vld [vmem:[%s766_s1 + $0x50] sm:$0xff]   ;;  %v98_v22 = vunpack.c.l.s4 %v626_v21  ;;  %vm355_vm1 = vcmask 523264   ;;  %vm481_vm2 = vcmask 516096  }
   0x2   :  { %v590_v1 = vld [vmem:[%s766_s1] sm:$0xff]   ;;  %525 = vmatprep.subr.bf16.mxu0 %v589_v0  ;;  %v594_v5 = vld [vmem:[%s766_s1 + $0x8] sm:$0xff]   ;;  %v598_v9 = vld [vmem:[%s766_s1 + $0x10] sm:$0xff]   ;;  %v101_v29 = vshrl.u32 %v100_v23, 7 }
   0x3   :  { %v591_v2 = vld [vmem:[%s766_s1 + $0xc0] sm:$0xff]   ;;  %526 = vmatpush3.bf16.msra.mxu0 %v590_v1  ;;  %v595_v6 = vld [vmem:[%s766_s1 + $0xc8] sm:$0xff]   ;;  %v599_v10 = vld [vmem:[%s766_s1 + $0xd0] sm:$0xff]   ;;  %v99_v28 = vunpack.c.0.s8 %v98_v22 }
   0x4   :  { %v592_v3 = vld [vmem:[%s766_s1 + $0x80] sm:$0xff]   ;;  %547 = vmatprep.subr.bf16.mxu1 %v591_v2  ;;  %527 = vmatprep.subr.bf16.mxu0 %v593_v4  ;;  %v596_v7 = vld [vmem:[%s766_s1 + $0x88] sm:$0xff]   ;;  %v600_v11 = vld [vmem:[%s766_s1 + $0x90] sm:$0xff]  }
   0x5   :  { %548 = vmatpush3.bf16.msra.mxu1 %v592_v3  ;;  %v601_v12 = vld [vmem:[%s766_s1 + $0x58] sm:$0xff]   ;;  %v605_v16 = vld [vmem:[%s766_s1 + $0x60] sm:$0xff]   ;;  %v609_v20 = vld [vmem:[%s766_s1 + $0x68] sm:$0xff]   ;;  %v102_v34 = vsub.s32 %v99_v28, %v101_v29 }
   0x6   :  { %549 = vmatprep.subr.bf16.mxu1 %v595_v6  ;;  %v602_v13 = vld [vmem:[%s766_s1 + $0x18] sm:$0xff]   ;;  %v606_v17 = vld [vmem:[%s766_s1 + $0x20] sm:$0xff]   ;;  %v610_v24 = vld [vmem:[%s766_s1 + $0x28] sm:$0xff]  }
   0x7   :  { %528 = vmatpush3.bf16.msra.mxu0 %v594_v5  ;;  %v603_v14 = vld [vmem:[%s766_s1 + $0xd8] sm:$0xff]   ;;  %v607_v18 = vld [vmem:[%s766_s1 + $0xe0] sm:$0xff]   ;;  %v611_v25 = vld [vmem:[%s766_s1 + $0xe8] sm:$0xff]  }
   0x8   :  { %529 = vmatprep.subr.bf16.mxu0 %v597_v8  ;;  %v604_v15 = vld [vmem:[%s766_s1 + $0x98] sm:$0xff]   ;;  %v608_v19 = vld [vmem:[%s766_s1 + $0xa0] sm:$0xff]   ;;  %v612_v26 = vld [vmem:[%s766_s1 + $0xa8] sm:$0xff]  }
   0x9   :  { %550 = vmatpush3.bf16.msra.mxu1 %v596_v7  ;;  %v613_v27 = vld [vmem:[%s766_s1 + $0x70] sm:$0xff]   ;;  %v617_v33 = vld [vmem:[%s766_s1 + $0x78] sm:$0xff]   ;;  %v15_v37 = vld [vmem:[%s767_s0] sm:$0x1f] }
   0xa   :  { %551 = vmatprep.subr.bf16.mxu1 %v599_v10  ;;  %v614_v30 = vld [vmem:[%s766_s1 + $0x30] sm:$0xff]   ;;  %v618_v35 = vld [vmem:[%s766_s1 + $0x38] sm:$0xff]   ;;  %v103_v38 = vrot.slane %v15_v37, %v102_v34  ;;  %v622_v44 = vld [vmem:[%s766_s1 + $0x100] sm:$0xff]   ;;  %v96_v48 = vcombine.high %v15_v37, %v15_v37 }
   0xb   :  { %530 = vmatpush3.bf16.msra.mxu0 %v598_v9  ;;  %v615_v31 = vld [vmem:[%s766_s1 + $0xf0] sm:$0xff]   ;;  %v619_v36 = vld [vmem:[%s766_s1 + $0xf8] sm:$0xff]   ;;  %v623_v47 = vld [vmem:[%s766_s1 + $0x108] sm:$0xff]  }
   0xc   :  { %531 = vmatprep.subr.bf16.mxu0 %v601_v12  ;;  %v616_v32 = vld [vmem:[%s766_s1 + $0xb0] sm:$0xff]   ;;  %v621_v39 = vld [vmem:[%s766_s1 + $0xb8] sm:$0xff]   ;;  %v111_v41 = vcombine.high %v103_v38, %v103_v38  ;;  %v118_v42 = vrot.slane %v103_v38, %v102_v34  ;;  %v110_v50 = vrot.slane %v96_v48, %v102_v34  ;;  %v487_v54 = vld [vmem:[%s768_s2] ss:$0 sm:$0xff] }
   0xd   :  { %552 = vmatpush3.bf16.msra.mxu1 %v600_v11  ;;  %v624_v49 = vld [vmem:[%s766_s1 + $0x110] sm:$0xff]   ;;  %v625_v51 = vld [vmem:[%s766_s1 + $0x118] sm:$0xff]  }
   0xe   :  { %553 = vmatprep.subr.bf16.mxu1 %v603_v14  ;;  %v132_v43 = vrot.slane %v111_v41, %v102_v34  ;;  %v133_v45 = vcombine.high %v118_v42, %v118_v42  ;;  %v125_v52 = vrot.slane %v110_v50, %v102_v34 }
   0xf   :  { %532 = vmatpush3.bf16.msra.mxu0 %v602_v13 }
  0x10   :  { %533 = vmatprep.subr.bf16.mxu0 %v605_v16  ;;  %391 = vmatprep.mubr.bf16.mxu0 %v132_v43  ;;  %v134_v46 = vcombine.high %v132_v43, %v132_v43 }
  0x11   :  { %554 = vmatpush3.bf16.msra.mxu1 %v604_v15 }
  0x12   :  { %555 = vmatprep.subr.bf16.mxu1 %v607_v18  ;;  %431 = vmatprep.mubr.bf16.mxu1 %v134_v46 }
  0x13   :  { %534 = vmatpush3.bf16.msra.mxu0 %v606_v17 }
  0x14   :  { %535 = vmatprep.subr.bf16.mxu0 %v609_v20 }
  0x15   :  { %556 = vmatpush3.bf16.msra.mxu1 %v608_v19 }
  0x16   :  { %557 = vmatprep.subr.bf16.mxu1 %v611_v25 }
  0x17   :  { %536 = vmatpush3.bf16.msra.mxu0 %v610_v24 }
  0x18   :  { %537 = vmatprep.subr.bf16.mxu0 %v613_v27 }
  0x19   :  { %558 = vmatpush3.bf16.msra.mxu1 %v612_v26 }
  0x1a   :  { %559 = vmatprep.subr.bf16.mxu1 %v615_v31 }
  0x1b   :  { %538 = vmatpush3.bf16.msra.mxu0 %v614_v30 }
  0x1c   :  { %539 = vmatprep.subr.bf16.mxu0 %v617_v33 }
  0x1d   :  { %560 = vmatpush3.bf16.msra.mxu1 %v616_v32 }
  0x1e   :  { %561 = vmatprep.subr.bf16.mxu1 %v619_v36 }
  0x1f   :  { %540 = vmatpush3.bf16.msra.mxu0 %v618_v35 }
  0x20   :  { %574 = vmatprep.subr.bf16.mxu0 %v627_v40 }
  0x21   :  { %562 = vmatpush3.bf16.msra.mxu1 %v621_v39 }
  0x22   :  { %392 = vmatmul.mubr.bf16.vlgmr.msra.gmra.mrb[0].mxu0 %v118_v42 }
  0x23   :  { %575 = vmatpush3.bf16.msra.mxu0 %v622_v44  ;;  %582 = vmatprep.mubr.msk.bf16.mxu0 %vm628_vm0, %v627_v40 }
  0x24   :  { %432 = vmatmul.mubr.bf16.vlgmr.msra.gmra.mrb[0].mxu1 %v133_v45  ;;  %576 = vmatprep.subr.bf16.mxu0 %v627_v40 }
  0x27   :  { %577 = vmatpush3.bf16.msra.mxu0 %v623_v47 }
  0x28   :  { %578 = vmatprep.subr.bf16.mxu0 %v627_v40 }
  0x2b   :  { %579 = vmatpush3.bf16.msra.mxu0 %v624_v49 }
  0x2c   :  { %580 = vmatprep.subr.bf16.mxu0 %v627_v40 }
  0x2f   :  { %581 = vmatpush3.bf16.msra.mxu0 %v625_v51 }
  0x32   :  { %583 = vmatmul.mubr.msk.bf16.vlgmr.msra.gmra.mrb[4].mxu0 %vm355_vm1, %v125_v52 }
  0xf5   :  { %v541_v53 = vpop.f32.mrb[0].mxu0 }
  0xf6   :  { %v542_v55 = vpop.f32.mrb[1].mxu0 }
  0xf7   :  { %v543_v56 = vadd.f32 %v542_v55, %v541_v53  ;;  %v544_v57 = vpop.f32.mrb[2].mxu0  ;;  %v563_v58 = vpop.f32.mrb[0].mxu1 }
  0xf8   :  { %v545_v59 = vpop.f32.mrb[3].mxu0  ;;  %v564_v60 = vpop.f32.mrb[1].mxu1 }
  0xf9   :  { %v394_v61 = vadd.f32 %v543_v56, %v487_v54  ;;  %v565_v62 = vadd.f32 %v564_v60, %v563_v58  ;;  %v566_v63 = vpop.f32.mrb[2].mxu1 }
  0xfa   :  { %v567_v0 = vpop.f32.mrb[3].mxu1 }
  0xfb   :  { %v434_v1 = vadd.f32 %v565_v62, %v394_v61 }
 0x105   :  { %v473_v2 = vpop.f32.mrb[4].mxu0 }
 0x106   :  { %v474_v3 = vadd.f32 %v473_v2, %v434_v1  ;;  %v584_v4 = vpop.f32.mrb[5].mxu0 }
 0x107   :  { %v476_v5 = vpop.f32.mrb[6].mxu0 }
 0x108   :  { %v479_v6 = vmax.f32 %v474_v3, 0.0  ;;  %v585_v7 = vpop.f32.mrb[7].mxu0 }
 0x10a   :  { %v480_v8 = vpack.c.bf16 %v479_v6, %v479_v6 }
 0x10c   :  { %482 = vst.msk [vmem:[%s769_s3] sm:$0x1] %vm481_vm2, %v480_v8 }

// kernel: _lambda_.9
= control target key start
LH: loop header
LB: loop body
LE: loop exit
PB: predicated region body
PF: predicated region fallthrough
CT: control target
= control target key end

     0   :  { %v2093_v2 = vmov 0   ;;  %vm217_vm0 = vcmask 523264   ;;  %s2728_s0 = inlined_call_operand.vmem [shape: bf16[2,64], index: 0, kind: input, shape index: {}]   ;;  %s2729_s1 = inlined_call_operand.vmem [shape: f32[2,256], index: 1, kind: input, shape index: {}]   ;;  %s2730_s2 = inlined_call_operand.vmem [shape: bf16[64,768], index: 2, kind: input, shape index: {}]   ;;  %s2731_s3 = inlined_call_operand.vmem [shape: bf16[256,768], index: 3, kind: input, shape index: {}]   ;;  %s2732_s4 = inlined_call_operand.vmem [shape: f32[1,768], index: 4, kind: input, shape index: {}, may-alias: {4,5}]   ;;  %s2733_s5 = inlined_call_operand.vmem [shape: f32[1,768], index: 5, kind: input, shape index: {}, may-alias: {4,5}]   ;;  %s2734_s6 = inlined_call_operand.vmem [shape: bf16[256,256], index: 6, kind: input, shape index: {}]   ;;  %s2735_s7 = inlined_call_operand.vmem [shape: f32[1,256], index: 7, kind: input, shape index: {}]   ;;  %s2736_s8 = inlined_call_operand.vmem [shape: bf16[256,128], index: 8, kind: input, shape index: {}]   ;;  %s2737_s9 = inlined_call_operand.vmem [shape: f32[1,128], index: 9, kind: input, shape index: {}]   ;;  %s2738_s10 = inlined_call_operand.hbm [shape: f32[2,256], index: 10, kind: output, shape index: {0}]   ;;  %s2739_s11 = inlined_call_operand.vmem [shape: f32[2,128], index: 11, kind: output, shape index: {1}]  }
   0x1   :  { %v1805_v0 = vld [vmem:[%s2730_s2 + $0x4] ss:$24 sps:$4 sm:$0xff]   ;;  %253 = vmatprep.mubr.bf16.mxu0 %v2093_v2  ;;  %294 = vmatprep.mubr.bf16.mxu1 %v2093_v2  ;;  %v1809_v3 = vld [vmem:[%s2730_s2] ss:$24 sps:$4 sm:$0xff]   ;;  %v1811_v5 = vld [vmem:[%s2730_s2 + $0x34] ss:$24 sps:$4 sm:$0xff]  }
   0x2   :  { %v1807_v1 = vld [vmem:[%s2730_s2 + $0xc] ss:$24 sps:$4 sm:$0xff]   ;;  %221 = vmatprep.subr.bf16.mxu0 %v1805_v0  ;;  %v1810_v4 = vld [vmem:[%s2730_s2 + $0x8] ss:$24 sps:$4 sm:$0xff]   ;;  %v1813_v6 = vld [vmem:[%s2730_s2 + $0x3c] ss:$24 sps:$4 sm:$0xff]  }
   0x3   :  { %262 = vmatprep.subr.bf16.mxu1 %v1807_v1  ;;  %222 = vmatpush1.bf16.msra.mxu0 %v1809_v3  ;;  %v1815_v7 = vld [vmem:[%s2730_s2 + $0x30] ss:$24 sps:$4 sm:$0xff]   ;;  %v1817_v9 = vld [vmem:[%s2730_s2 + $0x64] ss:$24 sps:$4 sm:$0xff]   ;;  %v1821_v11 = vld [vmem:[%s2730_s2 + $0x60] ss:$24 sps:$4 sm:$0xff]  }
   0x4   :  { %263 = vmatpush1.bf16.msra.mxu1 %v1810_v4  ;;  %223 = vmatprep.subr.bf16.mxu0 %v1811_v5  ;;  %v1816_v8 = vld [vmem:[%s2730_s2 + $0x38] ss:$24 sps:$4 sm:$0xff]   ;;  %v1819_v10 = vld [vmem:[%s2730_s2 + $0x6c] ss:$24 sps:$4 sm:$0xff]   ;;  %v1822_v12 = vld [vmem:[%s2730_s2 + $0x68] ss:$24 sps:$4 sm:$0xff]  }
   0x5   :  { %264 = vmatprep.subr.bf16.mxu1 %v1813_v6  ;;  %v1823_v13 = vld [vmem:[%s2730_s2 + $0x94] ss:$24 sps:$4 sm:$0xff]   ;;  %v1827_v15 = vld [vmem:[%s2730_s2 + $0x90] ss:$24 sps:$4 sm:$0xff]   ;;  %v39_v21 = vld [vmem:[%s2728_s0] sm:$0x1] }
   0x6   :  { %v1825_v14 = vld [vmem:[%s2730_s2 + $0x9c] ss:$24 sps:$4 sm:$0xff]   ;;  %v1828_v16 = vld [vmem:[%s2730_s2 + $0x98] ss:$24 sps:$4 sm:$0xff]   ;;  %v1834_v18 = vld [vmem:[%s2731_s3 + $0xc] ss:$24 sps:$4 sm:$0xff]  }
   0x7   :  { %224 = vmatpush1.bf16.msra.mxu0 %v1815_v7  ;;  %v1831_v17 = vld [vmem:[%s2730_s2 + $0x14] ss:$24 sps:$4 sm:$0xff]   ;;  %v1829_v19 = vld [vmem:[%s2730_s2 + $0x10] ss:$24 sps:$4 sm:$0xff]   ;;  %v1837_v22 = vld [vmem:[%s2730_s2 + $0x44] ss:$24 sps:$4 sm:$0xff]  }
   0x8   :  { %265 = vmatpush1.bf16.msra.mxu1 %v1816_v8  ;;  %225 = vmatprep.subr.bf16.mxu0 %v1817_v9  ;;  %v1832_v20 = vld [vmem:[%s2731_s3 + $0x8] ss:$24 sps:$4 sm:$0xff]   ;;  %v1840_v23 = vld [vmem:[%s2731_s3 + $0x3c] ss:$24 sps:$4 sm:$0xff]   ;;  %v1838_v25 = vld [vmem:[%s2731_s3 + $0x38] ss:$24 sps:$4 sm:$0xff]  }
   0x9   :  { %266 = vmatprep.subr.bf16.mxu1 %v1819_v10  ;;  %v1835_v24 = vld [vmem:[%s2730_s2 + $0x40] ss:$24 sps:$4 sm:$0xff]   ;;  %v1843_v26 = vld [vmem:[%s2730_s2 + $0x74] ss:$24 sps:$4 sm:$0xff]   ;;  %v1841_v28 = vld [vmem:[%s2730_s2 + $0x70] ss:$24 sps:$4 sm:$0xff]  }
   0xa   :  { %v1846_v27 = vld [vmem:[%s2731_s3 + $0x6c] ss:$24 sps:$4 sm:$0xff]   ;;  %v1844_v29 = vld [vmem:[%s2731_s3 + $0x68] ss:$24 sps:$4 sm:$0xff]   ;;  %v1852_v31 = vld [vmem:[%s2731_s3 + $0x9c] ss:$24 sps:$4 sm:$0xff]  }
   0xb   :  { %226 = vmatpush1.bf16.msra.mxu0 %v1821_v11  ;;  %v1849_v30 = vld [vmem:[%s2730_s2 + $0xa4] ss:$24 sps:$4 sm:$0xff]   ;;  %v1847_v32 = vld [vmem:[%s2730_s2 + $0xa0] ss:$24 sps:$4 sm:$0xff]   ;;  %v1861_v38 = vld [vmem:[%s2731_s3 + $0x34] ss:$24 sps:$4 sm:$0xff]  }
   0xc   :  { %267 = vmatpush1.bf16.msra.mxu1 %v1822_v12  ;;  %227 = vmatprep.subr.bf16.mxu0 %v1823_v13  ;;  %v1850_v33 = vld [vmem:[%s2731_s3 + $0x98] ss:$24 sps:$4 sm:$0xff]   ;;  %v1855_v34 = vld [vmem:[%s2731_s3 + $0x4] ss:$24 sps:$4 sm:$0xff]   ;;  %v1856_v37 = vld [vmem:[%s2731_s3 + $0xc8] ss:$24 sps:$4 sm:$0xff]  }
   0xd   :  { %268 = vmatprep.subr.bf16.mxu1 %v1825_v14  ;;  %v1858_v35 = vld [vmem:[%s2731_s3 + $0xcc] ss:$24 sps:$4 sm:$0xff]   ;;  %v1853_v36 = vld [vmem:[%s2731_s3] ss:$24 sps:$4 sm:$0xff]   ;;  %v1864_v39 = vld [vmem:[%s2731_s3 + $0xfc] ss:$24 sps:$4 sm:$0xff]  }
   0xe   :  { %v1859_v40 = vld [vmem:[%s2731_s3 + $0x30] ss:$24 sps:$4 sm:$0xff]   ;;  %v1867_v42 = vld [vmem:[%s2731_s3 + $0x64] ss:$24 sps:$4 sm:$0xff]   ;;  %v1865_v44 = vld [vmem:[%s2731_s3 + $0x60] ss:$24 sps:$4 sm:$0xff]  }
   0xf   :  { %228 = vmatpush1.bf16.msra.mxu0 %v1827_v15  ;;  %v1862_v41 = vld [vmem:[%s2731_s3 + $0xf8] ss:$24 sps:$4 sm:$0xff]   ;;  %v1870_v43 = vld [vmem:[%s2731_s3 + $0x12c] ss:$24 sps:$4 sm:$0xff]   ;;  %v1868_v45 = vld [vmem:[%s2731_s3 + $0x128] ss:$24 sps:$4 sm:$0xff]  }
  0x10   :  { %269 = vmatpush1.bf16.msra.mxu1 %v1828_v16  ;;  %303 = vmatprep.subr.bf16.mxu0 %v1831_v17  ;;  %v1873_v46 = vld [vmem:[%s2731_s3 + $0x94] ss:$24 sps:$4 sm:$0xff]   ;;  %v1871_v48 = vld [vmem:[%s2731_s3 + $0x90] ss:$24 sps:$4 sm:$0xff]   ;;  %v1879_v50 = vld [vmem:[%s2731_s3 + $0xc4] ss:$24 sps:$4 sm:$0xff]  }
  0x11   :  { %1006 = vmatprep.subr.bf16.mxu1 %v1834_v18  ;;  %v1876_v47 = vld [vmem:[%s2731_s3 + $0x15c] ss:$24 sps:$4 sm:$0xff]   ;;  %v1874_v49 = vld [vmem:[%s2731_s3 + $0x158] ss:$24 sps:$4 sm:$0xff]   ;;  %v1882_v51 = vld [vmem:[%s2731_s3 + $0x18c] ss:$24 sps:$4 sm:$0xff]  }
  0x12   :  { %1611 = vmatmul.mubr.msk.bf16.vlgmr.msra.gmra.mrb[0].mxu0 %vm217_vm0, %v39_v21  ;;  %v1877_v52 = vld [vmem:[%s2731_s3 + $0xc0] ss:$24 sps:$4 sm:$0xff]   ;;  %v1885_v54 = vld [vmem:[%s2731_s3 + $0xf4] ss:$24 sps:$4 sm:$0xff]   ;;  %v1883_v56 = vld [vmem:[%s2731_s3 + $0xf0] ss:$24 sps:$4 sm:$0xff]  }
  0x13   :  { %1612 = vmatmul.mubr.msk.bf16.vlgmr.msra.gmra.mrb[0].mxu1 %vm217_vm0, %v39_v21  ;;  %304 = vmatpush1.bf16.msra.mxu0 %v1829_v19  ;;  %v1880_v53 = vld [vmem:[%s2731_s3 + $0x188] ss:$24 sps:$4 sm:$0xff]   ;;  %v1888_v55 = vld [vmem:[%s2731_s3 + $0x1bc] ss:$24 sps:$4 sm:$0xff]   ;;  %v1886_v57 = vld [vmem:[%s2731_s3 + $0x1b8] ss:$24 sps:$4 sm:$0xff]  }
  0x14   :  { %1007 = vmatpush1.bf16.msra.mxu1 %v1832_v20  ;;  %305 = vmatprep.subr.bf16.mxu0 %v1837_v22  ;;  %v1891_v58 = vld [vmem:[%s2731_s3 + $0x124] ss:$24 sps:$4 sm:$0xff]   ;;  %v2338_v60 = vld.sshfl [vmem:[%s2729_s1] sm:$0x33 pattern:$0x76325410] }
  0x15   :  { %1008 = vmatprep.subr.bf16.mxu1 %v1840_v23  ;;  %335 = vmatprep.mubr.bf16.mxu0 %v2093_v2  ;;  %v1894_v59 = vld [vmem:[%s2731_s3 + $0x1ec] ss:$24 sps:$4 sm:$0xff]   ;;  %v2342_v61 = vcombine.high %v2338_v60, %v2338_v60  ;;  %v1889_v62 = vld [vmem:[%s2731_s3 + $0x120] ss:$24 sps:$4 sm:$0xff]   ;;  %v1900_v1 = vld [vmem:[%s2731_s3 + $0x21c] ss:$24 sps:$4 sm:$0xff]  }
  0x16   :  { %v1892_v63 = vld [vmem:[%s2731_s3 + $0x1e8] ss:$24 sps:$4 sm:$0xff]   ;;  %v1897_v0 = vld [vmem:[%s2731_s3 + $0x154] ss:$24 sps:$4 sm:$0xff]   ;;  %v1898_v4 = vld [vmem:[%s2731_s3 + $0x218] ss:$24 sps:$4 sm:$0xff]  }
  0x17   :  { %306 = vmatpush1.bf16.msra.mxu0 %v1835_v24  ;;  %v356_v2 = vpack.c.bf16 %v2342_v61, %v2342_v61  ;;  %v1895_v3 = vld [vmem:[%s2731_s3 + $0x150] ss:$24 sps:$4 sm:$0xff]   ;;  %v1903_v5 = vld [vmem:[%s2731_s3 + $0x184] ss:$24 sps:$4 sm:$0xff]   ;;  %v1901_v7 = vld [vmem:[%s2731_s3 + $0x180] ss:$24 sps:$4 sm:$0xff]   ;;  %v2423_v24 = vpack.c.bf16 %v2338_v60, %v2338_v60 }
  0x18   :  { %1009 = vmatpush1.bf16.msra.mxu1 %v1838_v25  ;;  %307 = vmatprep.subr.bf16.mxu0 %v1843_v26  ;;  %v1906_v6 = vld [vmem:[%s2731_s3 + $0x24c] ss:$24 sps:$4 sm:$0xff]   ;;  %v1904_v8 = vld [vmem:[%s2731_s3 + $0x248] ss:$24 sps:$4 sm:$0xff]   ;;  %v1912_v10 = vld [vmem:[%s2731_s3 + $0x27c] ss:$24 sps:$4 sm:$0xff]  }
  0x19   :  { %1010 = vmatprep.subr.bf16.mxu1 %v1846_v27  ;;  %1038 = vmatprep.mubr.bf16.mxu1 %v356_v2  ;;  %v1909_v9 = vld [vmem:[%s2731_s3 + $0x1b4] ss:$24 sps:$4 sm:$0xff]   ;;  %v1907_v11 = vld [vmem:[%s2731_s3 + $0x1b0] ss:$24 sps:$4 sm:$0xff]   ;;  %v1915_v13 = vld [vmem:[%s2731_s3 + $0x1e4] ss:$24 sps:$4 sm:$0xff]  }
  0x1a   :  { %v1910_v12 = vld [vmem:[%s2731_s3 + $0x278] ss:$24 sps:$4 sm:$0xff]   ;;  %v1918_v14 = vld [vmem:[%s2731_s3 + $0x2ac] ss:$24 sps:$4 sm:$0xff]   ;;  %v1916_v16 = vld [vmem:[%s2731_s3 + $0x2a8] ss:$24 sps:$4 sm:$0xff]  }
  0x1b   :  { %308 = vmatpush1.bf16.msra.mxu0 %v1841_v28  ;;  %v1913_v15 = vld [vmem:[%s2731_s3 + $0x1e0] ss:$24 sps:$4 sm:$0xff]   ;;  %v1921_v17 = vld [vmem:[%s2731_s3 + $0x214] ss:$24 sps:$4 sm:$0xff]   ;;  %v1919_v19 = vld [vmem:[%s2731_s3 + $0x210] ss:$24 sps:$4 sm:$0xff]  }
  0x1c   :  { %1011 = vmatpush1.bf16.msra.mxu1 %v1844_v29  ;;  %309 = vmatprep.subr.bf16.mxu0 %v1849_v30  ;;  %v1924_v18 = vld [vmem:[%s2731_s3 + $0x2dc] ss:$24 sps:$4 sm:$0xff]   ;;  %v1922_v20 = vld [vmem:[%s2731_s3 + $0x2d8] ss:$24 sps:$4 sm:$0xff]  }
  0x1d   :  { %1012 = vmatprep.subr.bf16.mxu1 %v1852_v31  ;;  %v1930_v22 = vld [vmem:[%s2731_s3 + $0x14] ss:$24 sps:$4 sm:$0xff]   ;;  %v1925_v23 = vld [vmem:[%s2731_s3 + $0x240] ss:$24 sps:$4 sm:$0xff]   ;;  %v1928_v25 = vld [vmem:[%s2731_s3 + $0x10] ss:$24 sps:$4 sm:$0xff]  }
  0x1e   :  { %v1933_v26 = vld [vmem:[%s2731_s3 + $0x274] ss:$24 sps:$4 sm:$0xff]   ;;  %v1936_v27 = vld [vmem:[%s2731_s3 + $0x44] ss:$24 sps:$4 sm:$0xff]   ;;  %v1931_v28 = vld [vmem:[%s2731_s3 + $0x270] ss:$24 sps:$4 sm:$0xff]  }
  0x1f   :  { %310 = vmatpush1.bf16.msra.mxu0 %v1847_v32  ;;  %v1934_v29 = vld [vmem:[%s2731_s3 + $0x40] ss:$24 sps:$4 sm:$0xff]   ;;  %v1939_v30 = vld [vmem:[%s2731_s3 + $0x2a4] ss:$24 sps:$4 sm:$0xff]   ;;  %v1942_v31 = vld [vmem:[%s2731_s3 + $0x74] ss:$24 sps:$4 sm:$0xff]  }
  0x20   :  { %1013 = vmatpush1.bf16.msra.mxu1 %v1850_v33  ;;  %965 = vmatprep.subr.bf16.mxu0 %v1855_v34  ;;  %v1937_v32 = vld [vmem:[%s2731_s3 + $0x2a0] ss:$24 sps:$4 sm:$0xff]   ;;  %v1940_v33 = vld [vmem:[%s2731_s3 + $0x70] ss:$24 sps:$4 sm:$0xff]   ;;  %v1945_v34 = vld [vmem:[%s2731_s3 + $0x2d4] ss:$24 sps:$4 sm:$0xff]  }
  0x21   :  { %1014 = vmatprep.subr.bf16.mxu1 %v1858_v35  ;;  %v1948_v35 = vld [vmem:[%s2731_s3 + $0xa4] ss:$24 sps:$4 sm:$0xff]  }
  0x22   :  { %1613 = vmatmul.mubr.msk.bf16.vlgmr.msra.gmra.mrb[4].mxu0 %vm217_vm0, %v39_v21  ;;  %v1927_v21 = vld [vmem:[%s2731_s3 + $0x244] ss:$24 sps:$4 sm:$0xff]  }
  0x23   :  { %966 = vmatpush1.bf16.msra.mxu0 %v1853_v36  ;;  %997 = vmatprep.mubr.bf16.mxu0 %v356_v2  ;;  %v1943_v36 = vld [vmem:[%s2731_s3 + $0x2d0] ss:$24 sps:$4 sm:$0xff]  }
  0x24   :  { %1015 = vmatpush1.bf16.msra.mxu1 %v1856_v37  ;;  %967 = vmatprep.subr.bf16.mxu0 %v1861_v38  ;;  %v1946_v37 = vld [vmem:[%s2731_s3 + $0xa0] ss:$24 sps:$4 sm:$0xff]   ;;  %v1951_v38 = vld [vmem:[%s2731_s3 + $0xd4] ss:$24 sps:$4 sm:$0xff]  }
  0x25   :  { %1016 = vmatprep.subr.bf16.mxu1 %v1864_v39  ;;  %v1949_v39 = vld [vmem:[%s2731_s3 + $0xd0] ss:$24 sps:$4 sm:$0xff]  }
  0x27   :  { %968 = vmatpush1.bf16.msra.mxu0 %v1859_v40  ;;  %v1954_v40 = vld [vmem:[%s2731_s3 + $0x104] ss:$24 sps:$4 sm:$0xff]  }
  0x28   :  { %1017 = vmatpush1.bf16.msra.mxu1 %v1862_v41  ;;  %969 = vmatprep.subr.bf16.mxu0 %v1867_v42  ;;  %v1952_v41 = vld [vmem:[%s2731_s3 + $0x100] ss:$24 sps:$4 sm:$0xff]   ;;  %v1957_v42 = vld [vmem:[%s2731_s3 + $0x134] ss:$24 sps:$4 sm:$0xff]  }
  0x29   :  { %1018 = vmatprep.subr.bf16.mxu1 %v1870_v43 }
  0x2b   :  { %970 = vmatpush1.bf16.msra.mxu0 %v1865_v44 }
  0x2c   :  { %1019 = vmatpush1.bf16.msra.mxu1 %v1868_v45  ;;  %971 = vmatprep.subr.bf16.mxu0 %v1873_v46 }
  0x2d   :  { %1020 = vmatprep.subr.bf16.mxu1 %v1876_v47 }
  0x2f   :  { %972 = vmatpush1.bf16.msra.mxu0 %v1871_v48 }
  0x30   :  { %1021 = vmatpush1.bf16.msra.mxu1 %v1874_v49  ;;  %973 = vmatprep.subr.bf16.mxu0 %v1879_v50 }
  0x31   :  { %1022 = vmatprep.subr.bf16.mxu1 %v1882_v51 }
  0x33   :  { %974 = vmatpush1.bf16.msra.mxu0 %v1877_v52 }
  0x34   :  { %1023 = vmatpush1.bf16.msra.mxu1 %v1880_v53  ;;  %975 = vmatprep.subr.bf16.mxu0 %v1885_v54 }
  0x35   :  { %1024 = vmatprep.subr.bf16.mxu1 %v1888_v55 }
  0x37   :  { %976 = vmatpush1.bf16.msra.mxu0 %v1883_v56 }
  0x38   :  { %1025 = vmatpush1.bf16.msra.mxu1 %v1886_v57  ;;  %977 = vmatprep.subr.bf16.mxu0 %v1891_v58 }
  0x39   :  { %1026 = vmatprep.subr.bf16.mxu1 %v1894_v59 }
  0x3b   :  { %978 = vmatpush1.bf16.msra.mxu0 %v1889_v62 }
  0x3c   :  { %1027 = vmatpush1.bf16.msra.mxu1 %v1892_v63  ;;  %979 = vmatprep.subr.bf16.mxu0 %v1897_v0 }
  0x3d   :  { %1028 = vmatprep.subr.bf16.mxu1 %v1900_v1 }
  0x3f   :  { %980 = vmatpush1.bf16.msra.mxu0 %v1895_v3 }
  0x40   :  { %1029 = vmatpush1.bf16.msra.mxu1 %v1898_v4  ;;  %981 = vmatprep.subr.bf16.mxu0 %v1903_v5 }
  0x41   :  { %1030 = vmatprep.subr.bf16.mxu1 %v1906_v6 }
  0x43   :  { %982 = vmatpush1.bf16.msra.mxu0 %v1901_v7 }
  0x44   :  { %1031 = vmatpush1.bf16.msra.mxu1 %v1904_v8  ;;  %983 = vmatprep.subr.bf16.mxu0 %v1909_v9 }
  0x45   :  { %1032 = vmatprep.subr.bf16.mxu1 %v1912_v10 }
  0x47   :  { %984 = vmatpush1.bf16.msra.mxu0 %v1907_v11 }
  0x48   :  { %1033 = vmatpush1.bf16.msra.mxu1 %v1910_v12  ;;  %985 = vmatprep.subr.bf16.mxu0 %v1915_v13 }
  0x49   :  { %1034 = vmatprep.subr.bf16.mxu1 %v1918_v14 }
  0x4b   :  { %986 = vmatpush1.bf16.msra.mxu0 %v1913_v15 }
  0x4c   :  { %1035 = vmatpush1.bf16.msra.mxu1 %v1916_v16  ;;  %987 = vmatprep.subr.bf16.mxu0 %v1921_v17 }
  0x4d   :  { %1036 = vmatprep.subr.bf16.mxu1 %v1924_v18 }
  0x4f   :  { %988 = vmatpush1.bf16.msra.mxu0 %v1919_v19 }
  0x50   :  { %1037 = vmatpush1.bf16.msra.mxu1 %v1922_v20  ;;  %989 = vmatprep.subr.bf16.mxu0 %v1927_v21 }
  0x51   :  { %1047 = vmatprep.subr.bf16.mxu1 %v1930_v22 }
  0x53   :  { %1039 = vmatmul.mubr.bf16.vlgmr.msra.gmra.mrb[0].mxu1 %v2423_v24  ;;  %990 = vmatpush1.bf16.msra.mxu0 %v1925_v23 }
  0x54   :  { %1048 = vmatpush1.bf16.msra.mxu1 %v1928_v25  ;;  %991 = vmatprep.subr.bf16.mxu0 %v1933_v26 }
  0x55   :  { %1049 = vmatprep.subr.bf16.mxu1 %v1936_v27  ;;  %1079 = vmatprep.mubr.bf16.mxu1 %v356_v2 }
  0x57   :  { %992 = vmatpush1.bf16.msra.mxu0 %v1931_v28 }
  0x58   :  { %1050 = vmatpush1.bf16.msra.mxu1 %v1934_v29  ;;  %993 = vmatprep.subr.bf16.mxu0 %v1939_v30 }
  0x59   :  { %1051 = vmatprep.subr.bf16.mxu1 %v1942_v31 }
  0x5b   :  { %994 = vmatpush1.bf16.msra.mxu0 %v1937_v32 }
  0x5c   :  { %1052 = vmatpush1.bf16.msra.mxu1 %v1940_v33  ;;  %995 = vmatprep.subr.bf16.mxu0 %v1945_v34 }
  0x5d   :  { %1053 = vmatprep.subr.bf16.mxu1 %v1948_v35 }
  0x5f   :  { %996 = vmatpush1.bf16.msra.mxu0 %v1943_v36 }
  0x60   :  { %1054 = vmatpush1.bf16.msra.mxu1 %v1946_v37 }
  0x61   :  { %1055 = vmatprep.subr.bf16.mxu1 %v1951_v38 }
  0x62   :  { %998 = vmatmul.mubr.bf16.vlgmr.msra.gmra.mrb[0].mxu0 %v2423_v24 }
  0x64   :  { %1056 = vmatpush1.bf16.msra.mxu1 %v1949_v39 }
  0x65   :  { %1057 = vmatprep.subr.bf16.mxu1 %v1954_v40 }
  0x66   :  { %17 = vsyncpa [#allocation3], 0  ;;  %v1955_v43 = vld [vmem:[%s2731_s3 + $0x130] ss:$24 sps:$4 sm:$0xff]   ;;  %v1960_v44 = vld [vmem:[%s2731_s3 + $0x164] ss:$24 sps:$4 sm:$0xff]  }
  0x67   :  { %v1958_v45 = vld [vmem:[%s2731_s3 + $0x160] ss:$24 sps:$4 sm:$0xff]   ;;  %v1963_v46 = vld [vmem:[%s2731_s3 + $0x194] ss:$24 sps:$4 sm:$0xff]   ;;  %v1961_v47 = vld [vmem:[%s2731_s3 + $0x190] ss:$24 sps:$4 sm:$0xff]  }
  0x68   :  { %1058 = vmatpush1.bf16.msra.mxu1 %v1952_v41  ;;  %v1966_v48 = vld [vmem:[%s2731_s3 + $0x1c4] ss:$24 sps:$4 sm:$0xff]   ;;  %v1964_v49 = vld [vmem:[%s2731_s3 + $0x1c0] ss:$24 sps:$4 sm:$0xff]   ;;  %v1969_v50 = vld [vmem:[%s2731_s3 + $0x1f4] ss:$24 sps:$4 sm:$0xff]  }
  0x69   :  { %1059 = vmatprep.subr.bf16.mxu1 %v1957_v42  ;;  %v1967_v51 = vld [vmem:[%s2731_s3 + $0x1f0] ss:$24 sps:$4 sm:$0xff]   ;;  %v1972_v52 = vld [vmem:[%s2731_s3 + $0x224] ss:$24 sps:$4 sm:$0xff]   ;;  %v1970_v53 = vld [vmem:[%s2731_s3 + $0x220] ss:$24 sps:$4 sm:$0xff]  }
  0x6a   :  { %v1975_v54 = vld [vmem:[%s2731_s3 + $0x254] ss:$24 sps:$4 sm:$0xff]   ;;  %v1973_v55 = vld [vmem:[%s2731_s3 + $0x250] ss:$24 sps:$4 sm:$0xff]   ;;  %v1978_v56 = vld [vmem:[%s2731_s3 + $0x284] ss:$24 sps:$4 sm:$0xff]  }
  0x6b   :  { %v1976_v57 = vld [vmem:[%s2731_s3 + $0x280] ss:$24 sps:$4 sm:$0xff]   ;;  %v1981_v58 = vld [vmem:[%s2731_s3 + $0x2b4] ss:$24 sps:$4 sm:$0xff]   ;;  %v1979_v59 = vld [vmem:[%s2731_s3 + $0x2b0] ss:$24 sps:$4 sm:$0xff]  }
  0x6c   :  { %1060 = vmatpush1.bf16.msra.mxu1 %v1955_v43  ;;  %v1984_v62 = vld [vmem:[%s2731_s3 + $0x2e4] ss:$24 sps:$4 sm:$0xff]   ;;  %v1982_v63 = vld [vmem:[%s2731_s3 + $0x2e0] ss:$24 sps:$4 sm:$0xff]   ;;  %v2035_v38 = vld [vmem:[%s2736_s8 + $0x48] sm:$0xff]  }
  0x6d   :  { %1061 = vmatprep.subr.bf16.mxu1 %v1960_v44  ;;  %v1987_v0 = vld [vmem:[%s2734_s6 + $0x4] ss:$8 sps:$4 sm:$0xff]   ;;  %v1985_v1 = vld [vmem:[%s2734_s6] ss:$8 sps:$4 sm:$0xff]   ;;  %v1990_v2 = vld [vmem:[%s2734_s6 + $0x14] ss:$8 sps:$4 sm:$0xff]  }
  0x6e   :  { %1348 = vmatprep.subr.bf16.mxu0 %v1987_v0  ;;  %v1988_v3 = vld [vmem:[%s2734_s6 + $0x10] ss:$8 sps:$4 sm:$0xff]   ;;  %v1993_v4 = vld [vmem:[%s2734_s6 + $0x24] ss:$8 sps:$4 sm:$0xff]   ;;  %v1991_v5 = vld [vmem:[%s2734_s6 + $0x20] ss:$8 sps:$4 sm:$0xff]  }
  0x6f   :  { %1349 = vmatpush1.bf16.msra.mxu0 %v1985_v1  ;;  %v1994_v6 = vld [vmem:[%s2734_s6 + $0x30] ss:$8 sps:$4 sm:$0xff]   ;;  %v1996_v7 = vld [vmem:[%s2734_s6 + $0x34] ss:$8 sps:$4 sm:$0xff]   ;;  %v1999_v8 = vld [vmem:[%s2734_s6 + $0x44] ss:$8 sps:$4 sm:$0xff]  }
  0x70   :  { %1062 = vmatpush1.bf16.msra.mxu1 %v1958_v45  ;;  %1350 = vmatprep.subr.bf16.mxu0 %v1990_v2  ;;  %v1997_v9 = vld [vmem:[%s2734_s6 + $0x40] ss:$8 sps:$4 sm:$0xff]   ;;  %v2002_v10 = vld [vmem:[%s2734_s6 + $0x54] ss:$8 sps:$4 sm:$0xff]   ;;  %v2000_v11 = vld [vmem:[%s2734_s6 + $0x50] ss:$8 sps:$4 sm:$0xff]  }
  0x71   :  { %1063 = vmatprep.subr.bf16.mxu1 %v1963_v46  ;;  %v2005_v12 = vld [vmem:[%s2734_s6 + $0x64] ss:$8 sps:$4 sm:$0xff]   ;;  %v2003_v13 = vld [vmem:[%s2734_s6 + $0x60] ss:$8 sps:$4 sm:$0xff]   ;;  %v2008_v14 = vld [vmem:[%s2734_s6 + $0x74] ss:$8 sps:$4 sm:$0xff]  }
  0x72   :  { %v2006_v15 = vld [vmem:[%s2734_s6 + $0x70] ss:$8 sps:$4 sm:$0xff]   ;;  %v2011_v16 = vld [vmem:[%s2734_s6 + $0x84] ss:$8 sps:$4 sm:$0xff]   ;;  %v2009_v17 = vld [vmem:[%s2734_s6 + $0x80] ss:$8 sps:$4 sm:$0xff]  }
  0x73   :  { %1351 = vmatpush1.bf16.msra.mxu0 %v1988_v3  ;;  %v2014_v18 = vld [vmem:[%s2734_s6 + $0x94] ss:$8 sps:$4 sm:$0xff]   ;;  %v2012_v19 = vld [vmem:[%s2734_s6 + $0x90] ss:$8 sps:$4 sm:$0xff]   ;;  %v2017_v20 = vld [vmem:[%s2734_s6 + $0xa4] ss:$8 sps:$4 sm:$0xff]  }
  0x74   :  { %1064 = vmatpush1.bf16.msra.mxu1 %v1961_v47  ;;  %1352 = vmatprep.subr.bf16.mxu0 %v1993_v4  ;;  %v2015_v21 = vld [vmem:[%s2734_s6 + $0xa0] ss:$8 sps:$4 sm:$0xff]   ;;  %v2020_v22 = vld [vmem:[%s2734_s6 + $0xb4] ss:$8 sps:$4 sm:$0xff]   ;;  %v2018_v23 = vld [vmem:[%s2734_s6 + $0xb0] ss:$8 sps:$4 sm:$0xff]  }
  0x75   :  { %1065 = vmatprep.subr.bf16.mxu1 %v1966_v48  ;;  %v2023_v25 = vld [vmem:[%s2734_s6 + $0xc4] ss:$8 sps:$4 sm:$0xff]   ;;  %v2026_v26 = vld [vmem:[%s2734_s6 + $0xd4] ss:$8 sps:$4 sm:$0xff]   ;;  %v2024_v27 = vld [vmem:[%s2734_s6 + $0xd0] ss:$8 sps:$4 sm:$0xff]  }
  0x76   :  { %v2029_v28 = vld [vmem:[%s2734_s6 + $0xe4] ss:$8 sps:$4 sm:$0xff]   ;;  %v2027_v29 = vld [vmem:[%s2734_s6 + $0xe0] ss:$8 sps:$4 sm:$0xff]   ;;  %v2032_v31 = vld [vmem:[%s2734_s6 + $0xf4] ss:$8 sps:$4 sm:$0xff]  }
  0x77   :  { %1353 = vmatpush1.bf16.msra.mxu0 %v1991_v5  ;;  %v2030_v35 = vld [vmem:[%s2734_s6 + $0xf0] ss:$8 sps:$4 sm:$0xff]   ;;  %v2033_v36 = vld [vmem:[%s2736_s8 + $0x40] sm:$0xff]   ;;  %v2036_v39 = vld [vmem:[%s2736_s8 + $0x8] sm:$0xff]  }
  0x78   :  { %1066 = vmatpush1.bf16.msra.mxu1 %v1964_v49  ;;  %1354 = vmatprep.subr.bf16.mxu0 %v1996_v7  ;;  %v2034_v37 = vld [vmem:[%s2736_s8] sm:$0xff]   ;;  %v2037_v40 = vld [vmem:[%s2736_s8 + $0x50] sm:$0xff]   ;;  %v2039_v42 = vld [vmem:[%s2736_s8 + $0x58] sm:$0xff]  }
  0x79   :  { %1067 = vmatprep.subr.bf16.mxu1 %v1969_v50  ;;  %v2038_v41 = vld [vmem:[%s2736_s8 + $0x10] sm:$0xff]   ;;  %v2040_v43 = vld [vmem:[%s2736_s8 + $0x18] sm:$0xff]   ;;  %v2041_v44 = vld [vmem:[%s2736_s8 + $0x60] sm:$0xff]  }
  0x7a   :  { %v2042_v45 = vld [vmem:[%s2736_s8 + $0x20] sm:$0xff]   ;;  %v2043_v46 = vld [vmem:[%s2736_s8 + $0x68] sm:$0xff]  }
  0x7b   :  { %1355 = vmatpush1.bf16.msra.mxu0 %v1994_v6  ;;  %v2044_v47 = vld [vmem:[%s2736_s8 + $0x28] sm:$0xff]  }
  0x7c   :  { %1068 = vmatpush1.bf16.msra.mxu1 %v1967_v51  ;;  %1356 = vmatprep.subr.bf16.mxu0 %v1999_v8 }
  0x7d   :  { %1069 = vmatprep.subr.bf16.mxu1 %v1972_v52  ;;  %v67_v52 = vlaneseq }
  0x7f   :  { %1357 = vmatpush1.bf16.msra.mxu0 %v1997_v9 }
  0x80   :  { %1070 = vmatpush1.bf16.msra.mxu1 %v1970_v53  ;;  %1358 = vmatprep.subr.bf16.mxu0 %v2002_v10 }
  0x81   :  { %1071 = vmatprep.subr.bf16.mxu1 %v1975_v54  ;;  %v68_v54 = vshrl.u32 %v67_v52, 7 }
  0x83   :  { %1359 = vmatpush1.bf16.msra.mxu0 %v2000_v11  ;;  %v77_v6 = vsub.s32 2, %v68_v54  ;;  %v81_v7 = vsub.s32 3, %v68_v54 }
  0x84   :  { %1072 = vmatpush1.bf16.msra.mxu1 %v1973_v55  ;;  %1360 = vmatprep.subr.bf16.mxu0 %v2005_v12 }
  0x85   :  { %1073 = vmatprep.subr.bf16.mxu1 %v1978_v56 }
  0x87   :  { %1361 = vmatpush1.bf16.msra.mxu0 %v2003_v13 }
  0x88   :  { %1074 = vmatpush1.bf16.msra.mxu1 %v1976_v57  ;;  %1362 = vmatprep.subr.bf16.mxu0 %v2008_v14  ;;  %v2675_v57 = vsub.s32 0, %v68_v54 }
  0x89   :  { %1075 = vmatprep.subr.bf16.mxu1 %v1981_v58 }
  0x8b   :  { %1363 = vmatpush1.bf16.msra.mxu0 %v2006_v15 }
  0x8c   :  { %1076 = vmatpush1.bf16.msra.mxu1 %v1979_v59  ;;  %1364 = vmatprep.subr.bf16.mxu0 %v2011_v16  ;;  %v2677_v59 = vsub.s32 1, %v68_v54 }
  0x8d   :  { %1077 = vmatprep.subr.bf16.mxu1 %v1984_v62  ;;  %v65_v62 = vld [vmem:[%s2732_s4] sm:$0x3f] }
  0x8e   :  { %v70_v0 = vrot.slane %v65_v62, %v2675_v57  ;;  %v74_v2 = vrot.slane %v65_v62, %v2677_v59  ;;  %v78_v10 = vrot.slane %v65_v62, %v77_v6  ;;  %v82_v12 = vrot.slane %v65_v62, %v81_v7 }
  0x8f   :  { %1365 = vmatpush1.bf16.msra.mxu0 %v2009_v17 }
  0x90   :  { %1078 = vmatpush1.bf16.msra.mxu1 %v1982_v63  ;;  %1366 = vmatprep.subr.bf16.mxu0 %v2014_v18  ;;  %v453_v63 = vld [vmem:[%s2733_s5] sm:$0x3f] }
  0x91   :  { %1765 = vmatprep.subr.bf16.mxu1 %v2033_v36  ;;  %v458_v1 = vrot.slane %v453_v63, %v2675_v57  ;;  %v462_v3 = vrot.slane %v453_v63, %v2677_v59  ;;  %v466_v11 = vrot.slane %v453_v63, %v77_v6  ;;  %v470_v13 = vrot.slane %v453_v63, %v81_v7  ;;  %v2046_v6 = vld [vmem:[%s2736_s8 + $0x30] sm:$0xff]   ;;  %v1176_v7 = vld [vmem:[%s2735_s7] sm:$0x3] }
  0x93   :  { %1080 = vmatmul.mubr.bf16.vlgmr.msra.gmra.mrb[4].mxu1 %v2423_v24  ;;  %1367 = vmatpush1.bf16.msra.mxu0 %v2012_v19  ;;  %v2021_v24 = vld [vmem:[%s2734_s6 + $0xc0] ss:$8 sps:$4 sm:$0xff]   ;;  %v1787_v4 = vadd.f32 %v458_v1, %v70_v0  ;;  %v1789_v5 = vadd.f32 %v462_v3, %v74_v2  ;;  %v1791_v16 = vadd.f32 %v466_v11, %v78_v10 }
  0x94   :  { %1368 = vmatprep.subr.bf16.mxu0 %v2017_v20  ;;  %1766 = vmatpush3.bf16.msra.mxu1 %v2034_v37  ;;  %v1793_v17 = vadd.f32 %v470_v13, %v82_v12 }
  0x95   :  { %1767 = vmatprep.subr.bf16.mxu1 %v2035_v38 }
  0x97   :  { %1369 = vmatpush1.bf16.msra.mxu0 %v2015_v21 }
  0x98   :  { %1370 = vmatprep.subr.bf16.mxu0 %v2020_v22  ;;  %1768 = vmatpush3.bf16.msra.mxu1 %v2036_v39 }
  0x99   :  { %1769 = vmatprep.subr.bf16.mxu1 %v2037_v40 }
  0x9b   :  { %1371 = vmatpush1.bf16.msra.mxu0 %v2018_v23 }
  0x9c   :  { %1372 = vmatprep.subr.bf16.mxu0 %v2023_v25  ;;  %1770 = vmatpush3.bf16.msra.mxu1 %v2038_v41 }
  0x9d   :  { %1771 = vmatprep.subr.bf16.mxu1 %v2039_v42 }
  0x9f   :  { %1373 = vmatpush1.bf16.msra.mxu0 %v2021_v24 }
  0xa0   :  { %1374 = vmatprep.subr.bf16.mxu0 %v2026_v26  ;;  %1772 = vmatpush3.bf16.msra.mxu1 %v2040_v43  ;;  %v85_v26 = vsub.s32 4, %v68_v54 }
  0xa1   :  { %1773 = vmatprep.subr.bf16.mxu1 %v2041_v44 }
  0xa3   :  { %1375 = vmatpush1.bf16.msra.mxu0 %v2024_v27 }
  0xa4   :  { %1376 = vmatprep.subr.bf16.mxu0 %v2029_v28  ;;  %1774 = vmatpush3.bf16.msra.mxu1 %v2042_v45  ;;  %v89_v28 = vsub.s32 5, %v68_v54 }
  0xa5   :  { %1775 = vmatprep.subr.bf16.mxu1 %v2043_v46 }
  0xa6   :  { %v90_v36 = vrot.slane %v65_v62, %v89_v28 }
  0xa7   :  { %1377 = vmatpush1.bf16.msra.mxu0 %v2027_v29 }
  0xa8   :  { %1378 = vmatprep.subr.bf16.mxu0 %v2032_v31  ;;  %1776 = vmatpush3.bf16.msra.mxu1 %v2044_v47  ;;  %v474_v31 = vrot.slane %v453_v63, %v85_v26 }
  0xab   :  { %1379 = vmatpush1.bf16.msra.mxu0 %v2030_v35 }
  0xf5   :  { %v2629_v30 = vpop.f32.mrb[4].mxu0 }
  0xf6   :  { %v2634_v32 = vpop.f32.mrb[5].mxu0 }
  0xf7   :  { %v341_v33 = vpop.f32.mrb[6].mxu0 }
  0xf8   :  { %v342_v34 = vpop.f32.mrb[7].mxu0  ;;  %v478_v33 = vrot.slane %v453_v63, %v89_v28 }
  0xf9   :  { %v86_v34 = vrot.slane %v65_v62, %v85_v26 }
  0xfb   :  { %v338_v45 = vadd.f32 %v2629_v30, %v86_v34 }
 0x126   :  { %v1040_v48 = vpop.f32.mrb[0].mxu1 }
 0x127   :  { %v1042_v49 = vpop.f32.mrb[1].mxu1  ;;  %v1792_v18 = vadd.f32 %v1791_v16, %v1040_v48  ;;  %v340_v48 = vadd.f32 %v2634_v32, %v90_v36 }
 0x128   :  { %v1044_v50 = vpop.f32.mrb[2].mxu1  ;;  %v1794_v19 = vadd.f32 %v1793_v17, %v1042_v49 }
 0x129   :  { %v1045_v51 = vpop.f32.mrb[3].mxu1  ;;  %v1713_v20 = vmul.f32 -1.442695, %v1792_v18 }
 0x12a   :  { %v1714_v21 = vmul.f32 -1.442695, %v1794_v19 }
 0x135   :  { %v999_v53 = vpop.f32.mrb[0].mxu0 }
 0x136   :  { %v1001_v55 = vpop.f32.mrb[1].mxu0  ;;  %v1788_v8 = vadd.f32 %v1787_v4, %v999_v53 }
 0x137   :  { %v1003_v56 = vpop.f32.mrb[2].mxu0  ;;  %v1790_v9 = vadd.f32 %v1789_v5, %v1001_v55  ;;  %v2045_v5 = vld [vmem:[%s2736_s8 + $0x70] sm:$0xff]  }
 0x138   :  { %v1004_v58 = vpop.f32.mrb[3].mxu0  ;;  %v1711_v14 = vmul.f32 -1.442695, %v1788_v8  ;;  %1777 = vmatprep.subr.bf16.mxu1 %v2045_v5  ;;  %v1181_v8 = vrot.slane %v1176_v7, %v2675_v57 }
 0x139   :  { %v1712_v15 = vmul.f32 -1.442695, %v1790_v9  ;;  %1778 = vmatpush3.bf16.msra.mxu1 %v2046_v6  ;;  %v1185_v9 = vrot.slane %v1176_v7, %v2677_v59 }
 0x13a   :  { %2049 = vpow2.f32 %v1711_v14 }
 0x13b   :  { %2051 = vpow2.f32 %v1712_v15 }
 0x13c   :  { %2053 = vpow2.f32 %v1713_v20 }
 0x13d   :  { %2055 = vpow2.f32 %v1714_v21 }
 0x144   :  { %v2050_v22 = vpop.eup %2049 }
 0x145   :  { %v2052_v23 = vpop.eup %2051  ;;  %v1096_v24 = vadd.f32 1.0, %v2050_v22 }
 0x146   :  { %v1097_v25 = vadd.f32 1.0, %v2052_v23  ;;  %v2054_v27 = vpop.eup %2053 }
 0x147   :  { %2057 = vrcp.f32 %v1096_v24  ;;  %v2056_v29 = vpop.eup %2055  ;;  %v1110_v35 = vadd.f32 1.0, %v2054_v27 }
 0x148   :  { %2059 = vrcp.f32 %v1097_v25  ;;  %v1111_v37 = vadd.f32 1.0, %v2056_v29 }
 0x149   :  { %2061 = vrcp.f32 %v1110_v35 }
 0x14a   :  { %2063 = vrcp.f32 %v1111_v37 }
 0x151   :  { %v2058_v41 = vpop.eup %2057 }
 0x152   :  { %v2060_v44 = vpop.eup %2059 }
 0x153   :  { %v2062_v52 = vpop.eup %2061 }
 0x154   :  { %v2064_v53 = vpop.eup %2063  ;;  %v1122_v54 = vsub.f32 1.0, %v2062_v52  ;;  %v1126_v30 = vmul.f32 %v2062_v52, %v2338_v60  ;;  %v2047_v60 = vld [vmem:[%s2736_s8 + $0x78] sm:$0xff]  }
 0x155   :  { %v1123_v56 = vsub.f32 1.0, %v2064_v53  ;;  %v1127_v0 = vmul.f32 %v2064_v53, %v2342_v61  ;;  %v2048_v61 = vld [vmem:[%s2736_s8 + $0x38] sm:$0xff]   ;;  %1779 = vmatprep.subr.bf16.mxu1 %v2047_v60  ;;  %s2094_s8 = smov [#allocation2]  }
 0x156   :  { %1780 = vmatpush3.bf16.msra.mxu1 %v2048_v61  ;;  %s1575_s14 = sshll.u32 %s2094_s8, 4  ;;  %s1576_s14 = int_to_ptr.vmem [resolvable:$true] %s1575_s14 }
 0x157   :  { %s2069_s7 = scalar_lea.vmem %s1576_s14, 64  ;;  %p2074_p1 = scmp.lt.s32.totalorder %s1576_s14, %s1576_s14 }
 0x158   :  { %p2070_p0 = scmp.ne.s32.totalorder %s1576_s14, %s2069_s7  ;;  %p2075_p2 = scmp.lt.s32.totalorder %s2069_s7, %s2069_s7 }
 0x15a   :  { %p2076_p3 = por %p2075_p2, %p2074_p1 }
 0x15c   :  { %p2077_p4 = pnand %p2076_p3, %p2070_p0 }
 0x166   :  { %v1081_v38 = vpop.f32.mrb[4].mxu1 }
 0x167   :  { %v1082_v39 = vadd.f32 %v1081_v38, %v474_v31  ;;  %v1083_v40 = vpop.f32.mrb[5].mxu1 }
 0x168   :  { %v1084_v42 = vadd.f32 %v1083_v40, %v478_v33  ;;  %v1085_v43 = vpop.f32.mrb[6].mxu1 }
 0x169   :  { %v1116_v46 = vmul.f32 %v2058_v41, %v1082_v39  ;;  %v1086_v47 = vpop.f32.mrb[7].mxu1 }
 0x16a   :  { %v1117_v49 = vmul.f32 %v2060_v44, %v1084_v42 }
 0x16b   :  { %v1118_v50 = vadd.f32 %v1116_v46, %v338_v45 }
 0x16c   :  { %v1119_v51 = vadd.f32 %v1117_v49, %v340_v48 }
 0x16d   :  { %2065 = vtanh.f32 %v1118_v50 }
 0x16e   :  { %2067 = vtanh.f32 %v1119_v51 }
 0x177   :  { %v2066_v55 = vpop.eup %2065 }
 0x178   :  { %v2068_v58 = vpop.eup %2067  ;;  %v1124_v62 = vmul.f32 %v2066_v55, %v1122_v54 }
 0x179   :  { %v1125_v63 = vmul.f32 %v2068_v58, %v1123_v56 }
 0x17a   :  { %v1128_v1 = vadd.f32 %v1126_v30, %v1124_v62 }
 0x17b   :  { %v1129_v32 = vadd.f32 %v1127_v0, %v1125_v63 }
 0x17c   :  { %v1142_v4 = vpack.c.bf16 %v1128_v1, %v1128_v1 }
 0x17d   :  { %v1143_v2 = vpack.c.bf16 %v1129_v32, %v1129_v32  ;;  %v1132_v3 = vcombine.low %v1128_v1, %v1129_v32 }
 0x17f   :  { %1380 = vmatprep.mubr.bf16.mxu0 %v1143_v2  ;;  %1715 = vst.sshfl [vmem:[#allocation2] sm:$0x33 pattern:$0x76325410] %v1132_v3 }
 0x180   :  { %1381 = vmatmul.mubr.bf16.vlgmr.msra.gmra.mrb[8].mxu0 %v1142_v4 }
 0x253   :  { %v1382_v10 = vpop.f32.mrb[8].mxu0 }
 0x254   :  { %v1383_v11 = vadd.f32 %v1382_v10, %v1181_v8  ;;  %v1384_v12 = vpop.f32.mrb[9].mxu0 }
 0x255   :  { %v1385_v13 = vadd.f32 %v1384_v12, %v1185_v9  ;;  %v1386_v14 = vpop.f32.mrb[10].mxu0 }
 0x256   :  { %v1389_v15 = vmax.f32 %v1383_v11, 0.0  ;;  %v1387_v16 = vpop.f32.mrb[11].mxu0 }
 0x257   :  { %v1390_v17 = vmax.f32 %v1385_v13, 0.0 }
 0x258   :  { %v1391_v19 = vpack.c.bf16 %v1389_v15, %v1389_v15 }
 0x259   :  { %v1392_v18 = vpack.c.bf16 %v1390_v17, %v1390_v17 }
 0x25b   :  { %1560 = vmatprep.mubr.bf16.mxu1 %v1392_v18 }
 0x25c   :  { %1561 = vmatmul.mubr.bf16.vlgmr.msra.gmra.mrb[8].mxu1 %v1391_v19 }
 0x25d   :  { %2080 = shalt.err (!%p2077_p4)
}
 0x25e   :  { %s2081_s16 = scalar_lea.hbm %s2738_s10, 64 }
 0x25f   :  { %p2082_p5 = scmp.ne.s32.totalorder %s2738_s10, %s2081_s16  ;;  %p2085_p6 = scmp.lt.u32.totalorder %s2081_s16, %s2738_s10 }
 0x261   :  { %p2087_p7 = pnand %p2085_p6, %p2082_p5 }
 0x263   :  { %2090 = shalt.err (!%p2087_p7)
}
 0x264   :  { %1578 = dma.vmem_to_hbm [thread:$0]  %s1576_s14, 64, %s2738_s10, [#allocation3]   ;;  %v1748_v59 = vld [vmem:[%s2737_s9] ss:$0 sm:$0xff] }
 0x32f   :  { %v1781_v57 = vpop.f32.mrb[8].mxu1 }
 0x330   :  { %v1782_v20 = vpop.f32.mrb[9].mxu1 }
 0x331   :  { %v1783_v21 = vadd.f32 %v1782_v20, %v1781_v57  ;;  %v1784_v22 = vpop.f32.mrb[10].mxu1 }
 0x332   :  { %v1785_v23 = vpop.f32.mrb[11].mxu1 }
 0x333   :  { %v1563_v24 = vadd.f32 %v1783_v21, %v1748_v59 }
 0x335   :  { %1568 = vst [vmem:[%s2739_s11] sm:$0x3] %v1563_v24 }
 0x336   :  { %2091 = dma.done.wait [#allocation3], 64  }
 0x337   :  { %2092 = vsyncadd [#allocation3], 4294967232 }
 0x338   :  { %1586 = vsyncpa [#allocation3], 1 }

</bundles_post_ra>
